<compile_context>
chip_gen: v6e
topology: v6e:2x2x1
jax: 0.10.0
libtpu: 0.0.40
codegen_flags: <defaults>
</compile_context>

<pallas_src>
import functools

import jax
import jax.numpy as jnp
from jax import lax
from jax.experimental import pallas as pl
from jax.experimental.pallas import tpu as pltpu

_LANE = 128
_BN_EPS = 1e-5


def _round_up(v, m):
    return (v + m - 1) // m * m


# ----------------------------- Pallas kernel -------------------------------

def _fused_residual_kernel(xph_ref, w1_ref, sc1_ref, sh1_ref,
                           w2_ref, sc2_ref, sh2_ref, *rest,
                           stride, Ho, Wo, has_proj):
    # xph_ref : (1, stride*stride, Hp, Wp, Cpi) bf16 phase planes of padded x
    # w1_ref  : (9, Cpi, Cpo) bf16    w2_ref : (9, Cpo, Cpo) bf16
    # sc*/sh* : (1, Cpo) f32 folded BN scale/shift
    # ws_ref  : (Cpi, Cpo) bf16 (projection shortcut only)
    # out_ref : (1, Ho*Wo, Cpo) f32   mid_ref: VMEM (Ho+2, Wo+2, Cpo) bf16
    if has_proj:
        ws_ref, scs_ref, shs_ref, out_ref, mid_ref = rest
    else:
        ws_ref = scs_ref = shs_ref = None
        out_ref, mid_ref = rest

    s = stride
    Cpi = xph_ref.shape[-1]
    Cpo = w1_ref.shape[-1]
    npix = Ho * Wo

    def in_tap(kh, kw):
        # 3x3 tap (kh, kw) of the strided conv == contiguous slice of a phase.
        pidx = (kh % s) * s + (kw % s)
        ah, aw = kh // s, kw // s
        t = xph_ref[0, pidx, ah:ah + Ho, aw:aw + Wo, :]
        return t.reshape(npix, Cpi)

    # ---- conv1 + BN1 + ReLU : 9 accumulated MXU matmuls (K = Cpi >= 128) ---
    acc1 = jnp.zeros((npix, Cpo), jnp.float32)
    for kh in range(3):
        for kw in range(3):
            acc1 = acc1 + jnp.dot(in_tap(kh, kw), w1_ref[kh * 3 + kw],
                                  preferred_element_type=jnp.float32)
    y1 = jnp.maximum(acc1 * sc1_ref[...] + sh1_ref[...], 0.0)

    # Park conv1 output (bf16) in VMEM with a zero halo; zero only the 1-wide
    # halo ring (interior is fully overwritten every grid step).
    zrow = jnp.zeros((1, Wo + 2, Cpo), mid_ref.dtype)
    zcol = jnp.zeros((Ho, 1, Cpo), mid_ref.dtype)
    mid_ref[0:1, :, :] = zrow
    mid_ref[Ho + 1:Ho + 2, :, :] = zrow
    mid_ref[1:Ho + 1, 0:1, :] = zcol
    mid_ref[1:Ho + 1, Wo + 1:Wo + 2, :] = zcol
    mid_ref[1:Ho + 1, 1:Wo + 1, :] = (
        y1.reshape(Ho, Wo, Cpo).astype(mid_ref.dtype))

    # ---- conv2 + BN2 : 9 accumulated MXU matmuls (K = Cpo >= 128) ----------
    acc2 = jnp.zeros((npix, Cpo), jnp.float32)
    for kh in range(3):
        for kw in range(3):
            t = mid_ref[kh:kh + Ho, kw:kw + Wo, :].reshape(npix, Cpo)
            acc2 = acc2 + jnp.dot(t, w2_ref[kh * 3 + kw],
                                  preferred_element_type=jnp.float32)
    y2 = acc2 * sc2_ref[...] + sh2_ref[...]

    # ---- shortcut (strided 1x1 conv + BN, or plain identity) ---------------
    xs = in_tap(1, 1)                       # == x[::stride, ::stride, :]
    if has_proj:
        idn = jnp.dot(xs, ws_ref[...], preferred_element_type=jnp.float32)
        idn = idn * scs_ref[...] + shs_ref[...]
    else:
        idn = xs.astype(jnp.float32)

    out_ref[0] = jnp.maximum(y2 + idn, 0.0).astype(out_ref.dtype)


# ------------------------------ JAX glue ------------------------------------

def _phase_decompose(x_nhwc, stride):
    """Pad spatially by 1 and split into stride*stride phase planes.

    Returns (N, stride*stride, Hp, Wp, C) with phase (ph, pw) equal to
    xpad[:, ph::stride, pw::stride, :].  Total size == padded input size
    (no im2col blow-up); every 3x3 tap becomes a contiguous slice.
    """
    N, H, W, C = x_nhwc.shape
    s = stride
    Ho = (H + 2 - 3) // s + 1
    Wo = (W + 2 - 3) // s + 1
    xp = jnp.pad(x_nhwc, ((0, 0), (1, 1), (1, 1), (0, 0)))
    Hp = -(-(H + 2) // s)
    Wp = -(-(W + 2) // s)
    phases = []
    for ph in range(s):
        for pw in range(s):
            p = xp[:, ph::s, pw::s, :]
            p = jnp.pad(p, ((0, 0), (0, Hp - p.shape[1]),
                            (0, Wp - p.shape[2]), (0, 0)))
            phases.append(p)
    xph = jnp.stack(phases, axis=1)
    assert (2 // s) + Ho <= Hp and (2 // s) + Wo <= Wp
    return xph, Ho, Wo


def residual_block_forward(x_nchw, params, *, stride):
    x = jnp.transpose(x_nchw, (0, 2, 3, 1))            # NCHW -> NHWC
    N, H, W, Cin = x.shape
    Cout = params["w1"].shape[-1]
    Cpi = max(_LANE, _round_up(Cin, _LANE))
    Cpo = max(_LANE, _round_up(Cout, _LANE))

    # Channel-pad to a lane multiple and cast the MXU operands to bf16.
    xpad = jnp.pad(x, ((0, 0), (0, 0), (0, 0), (0, Cpi - Cin)))
    xph, Ho, Wo = _phase_decompose(xpad.astype(jnp.bfloat16), stride)
    nphase = stride * stride
    Hp, Wp = xph.shape[2], xph.shape[3]

    def pad_w(w, ci, co):        # (3,3,cin,cout) -> (9, ci, co) bf16
        w = jnp.pad(w, ((0, 0), (0, 0),
                        (0, ci - w.shape[2]), (0, co - w.shape[3])))
        return w.reshape(9, ci, co).astype(jnp.bfloat16)

    def pad_c(v):                # (1, Cout) -> (1, Cpo) f32
        return jnp.pad(v.astype(jnp.float32),
                       ((0, 0), (0, Cpo - v.shape[-1])))

    w1 = pad_w(params["w1"], Cpi, Cpo)
    w2 = pad_w(params["w2"], Cpo, Cpo)
    sc1, sh1 = pad_c(params["s1"]), pad_c(params["b1"])
    sc2, sh2 = pad_c(params["s2"]), pad_c(params["b2"])

    has_proj = "ws" in params
    operands = [xph, w1, sc1, sh1, w2, sc2, sh2]
    in_specs = [
        pl.BlockSpec((1, nphase, Hp, Wp, Cpi), lambda n: (n, 0, 0, 0, 0)),
        pl.BlockSpec((9, Cpi, Cpo), lambda n: (0, 0, 0)),
        pl.BlockSpec((1, Cpo), lambda n: (0, 0)),
        pl.BlockSpec((1, Cpo), lambda n: (0, 0)),
        pl.BlockSpec((9, Cpo, Cpo), lambda n: (0, 0, 0)),
        pl.BlockSpec((1, Cpo), lambda n: (0, 0)),
        pl.BlockSpec((1, Cpo), lambda n: (0, 0)),
    ]
    if has_proj:
        ws = jnp.pad(params["ws"],
                     ((0, Cpi - Cin), (0, Cpo - Cout))).astype(jnp.bfloat16)
        operands += [ws, pad_c(params["ss"]), pad_c(params["bs"])]
        in_specs += [
            pl.BlockSpec((Cpi, Cpo), lambda n: (0, 0)),
            pl.BlockSpec((1, Cpo), lambda n: (0, 0)),
            pl.BlockSpec((1, Cpo), lambda n: (0, 0)),
        ]
    else:
        assert Cin == Cout and stride == 1

    kernel = functools.partial(_fused_residual_kernel, stride=stride,
                               Ho=Ho, Wo=Wo, has_proj=has_proj)

    flops = 2 * N * Ho * Wo * (9 * Cpi * Cpo + 9 * Cpo * Cpo
                               + (Cpi * Cpo if has_proj else 0))
    bytes_accessed = (2 * (xph.size + w1.size + w2.size)
                      + (2 * Cpi * Cpo if has_proj else 0)
                      + 4 * (6 * Cpo + N * Ho * Wo * Cpo))

    out2d = pl.pallas_call(
        kernel,
        out_shape=jax.ShapeDtypeStruct((N, Ho * Wo, Cpo), x.dtype),
        grid=(N,),
        in_specs=in_specs,
        out_specs=pl.BlockSpec((1, Ho * Wo, Cpo), lambda n: (n, 0, 0)),
        scratch_shapes=[pltpu.VMEM((Ho + 2, Wo + 2, Cpo), jnp.bfloat16)],
        compiler_params=pltpu.CompilerParams(
            dimension_semantics=("parallel",),
            vmem_limit_bytes=64 * 1024 * 1024),
        cost_estimate=pl.CostEstimate(flops=int(flops), transcendentals=0,
                                      bytes_accessed=int(bytes_accessed)),
    )(*operands)

    out = out2d[:, :, :Cout].reshape(N, Ho, Wo, Cout)
    return jnp.transpose(out, (0, 3, 1, 2))             # NHWC -> NCHW


# -------------------------- parameters & reference --------------------------

def init_params(key, in_channels, out_channels, stride):
    ks = jax.random.split(key, 6)

    def bn_affine(k):
        k1, k2, k3, k4 = jax.random.split(k, 4)
        gamma = 1.0 + 0.1 * jax.random.normal(k1, (out_channels,), jnp.float32)
        beta = 0.1 * jax.random.normal(k2, (out_channels,), jnp.float32)
        mean = 0.1 * jax.random.normal(k3, (out_channels,), jnp.float32)
        var = jnp.abs(jax.random.normal(k4, (out_channels,), jnp.float32)) + 0.5
        scale = gamma / jnp.sqrt(var + _BN_EPS)
        shift = beta - mean * scale
        return scale.reshape(1, -1), shift.reshape(1, -1)

    p = {
        "w1": 0.1 * jax.random.normal(
            ks[0], (3, 3, in_channels, out_channels), jnp.float32),
        "w2": 0.1 * jax.random.normal(
            ks[1], (3, 3, out_channels, out_channels), jnp.float32),
    }
    p["s1"], p["b1"] = bn_affine(ks[2])
    p["s2"], p["b2"] = bn_affine(ks[3])
    if stride != 1 or in_channels != out_channels:
        p["ws"] = 0.1 * jax.random.normal(
            ks[4], (in_channels, out_channels), jnp.float32)
        p["ss"], p["bs"] = bn_affine(ks[5])
    return p


def _reference_forward(x_nchw, params, *, stride):
    x = jnp.transpose(x_nchw, (0, 2, 3, 1))

    def conv(inp, w, s):
        return lax.conv_general_dilated(
            inp, w, window_strides=(s, s), padding=((1, 1), (1, 1)),
            dimension_numbers=("NHWC", "HWIO", "NHWC"))

    if "ws" in params:
        idn = x[:, ::stride, ::stride, :] @ params["ws"]
        idn = idn * params["ss"] + params["bs"]
    else:
        idn = x
    out = conv(x, params["w1"], stride) * params["s1"] + params["b1"]
    out = jnp.maximum(out, 0.0)
    out = conv(out, params["w2"], 1) * params["s2"] + params["b2"]
    out = jnp.maximum(out + idn, 0.0)
    return jnp.transpose(out, (0, 3, 1, 2))


# -------------------------------- main ---------------------------------------

if __name__ == "__main__":
    key = jax.random.PRNGKey(0)
    k_x, k_p, k_x2, k_p2 = jax.random.split(key, 4)

    fwd = jax.jit(residual_block_forward, static_argnames=("stride",))

    # bf16 MXU inputs (f32 accumulation) => compare against f32 XLA reference
    # with mixed-precision tolerances.
    RTOL, ATOL = 5e-2, 5e-2

    # Case 1: projection shortcut (stride=2, Cin != Cout).
    batch, cin, cout, spatial, stride = 2, 4, 8, 16, 2
    x = jax.random.normal(k_x, (batch, cin, spatial, spatial), jnp.float32)
    params = init_params(k_p, cin, cout, stride)
    out = jax.block_until_ready(fwd(x, params, stride=stride))
    ref = jax.block_until_ready(_reference_forward(x, params, stride=stride))
    assert out.shape == ref.shape, (out.shape, ref.shape)
    assert jnp.allclose(out, ref, rtol=RTOL, atol=ATOL), \
        float(jnp.max(jnp.abs(out - ref)))

    # Case 2: identity shortcut (stride=1, Cin == Cout).
    x2 = jax.random.normal(k_x2, (batch, cout, spatial, spatial), jnp.float32)
    params2 = init_params(k_p2, cout, cout, 1)
    out2 = jax.block_until_ready(fwd(x2, params2, stride=1))
    ref2 = jax.block_until_ready(_reference_forward(x2, params2, stride=1))
    assert out2.shape == ref2.shape, (out2.shape, ref2.shape)
    assert jnp.allclose(out2, ref2, rtol=RTOL, atol=ATOL), \
        float(jnp.max(jnp.abs(out2 - ref2)))

    print("KERNEL_OK")
</pallas_src>

<mosaic_0001>
module attributes {stable_mosaic.version = 11 : i64} {
  func.func @_fused_residual_kernel(%arg0: i32, %arg1: memref<1x4x9x9x128xbf16, #tpu.memory_space<vmem>>, %arg2: memref<9x128x128xbf16, #tpu.memory_space<vmem>>, %arg3: memref<1x128xf32, #tpu.memory_space<vmem>>, %arg4: memref<1x128xf32, #tpu.memory_space<vmem>>, %arg5: memref<9x128x128xbf16, #tpu.memory_space<vmem>>, %arg6: memref<1x128xf32, #tpu.memory_space<vmem>>, %arg7: memref<1x128xf32, #tpu.memory_space<vmem>>, %arg8: memref<128x128xbf16, #tpu.memory_space<vmem>>, %arg9: memref<1x128xf32, #tpu.memory_space<vmem>>, %arg10: memref<1x128xf32, #tpu.memory_space<vmem>>, %arg11: memref<1x64x128xf32, #tpu.memory_space<vmem>>, %arg12: memref<10x10x128xbf16, #tpu.memory_space<vmem>>) attributes {dimension_semantics = [#tpu.dimension_semantics<parallel>], iteration_bounds = array<i64: 2>, scalar_prefetch = 0 : i64, scratch_operands = 1 : i64, tpu.core_type = #tpu.core_type<tc>, window_params = [{transform_indices = @transform_0, window_bounds = array<i64: 1, 4, 9, 9, 128>}, {pipeline_mode = #tpu.pipeline_mode<synchronous>, transform_indices = @transform_1, window_bounds = array<i64: 9, 128, 128>}, {pipeline_mode = #tpu.pipeline_mode<synchronous>, transform_indices = @transform_2, window_bounds = array<i64: 1, 128>}, {pipeline_mode = #tpu.pipeline_mode<synchronous>, transform_indices = @transform_3, window_bounds = array<i64: 1, 128>}, {pipeline_mode = #tpu.pipeline_mode<synchronous>, transform_indices = @transform_4, window_bounds = array<i64: 9, 128, 128>}, {pipeline_mode = #tpu.pipeline_mode<synchronous>, transform_indices = @transform_5, window_bounds = array<i64: 1, 128>}, {pipeline_mode = #tpu.pipeline_mode<synchronous>, transform_indices = @transform_6, window_bounds = array<i64: 1, 128>}, {pipeline_mode = #tpu.pipeline_mode<synchronous>, transform_indices = @transform_7, window_bounds = array<i64: 128, 128>}, {pipeline_mode = #tpu.pipeline_mode<synchronous>, transform_indices = @transform_8, window_bounds = array<i64: 1, 128>}, {pipeline_mode = #tpu.pipeline_mode<synchronous>, transform_indices = @transform_9, window_bounds = array<i64: 1, 128>}, {transform_indices = @transform_10, window_bounds = array<i64: 1, 64, 128>}]} {
    %cst = arith.constant 0.000000e+00 : f32
    %0 = vector.broadcast %cst : f32 to vector<64x128xf32>
    %c0 = arith.constant 0 : index
    %c0_0 = arith.constant 0 : index
    %c0_1 = arith.constant 0 : index
    %c0_2 = arith.constant 0 : index
    %c0_3 = arith.constant 0 : index
    %1 = vector.load %arg1[%c0, %c0_0, %c0_1, %c0_2, %c0_3] : memref<1x4x9x9x128xbf16, #tpu.memory_space<vmem>>, vector<1x1x8x8x128xbf16>
    %2 = vector.shape_cast %1 : vector<1x1x8x8x128xbf16> to vector<8x8x128xbf16>
    %3 = vector.shape_cast %2 : vector<8x8x128xbf16> to vector<64x128xbf16>
    %c0_4 = arith.constant 0 : index
    %c0_5 = arith.constant 0 : index
    %c0_6 = arith.constant 0 : index
    %4 = vector.load %arg2[%c0_4, %c0_5, %c0_6] : memref<9x128x128xbf16, #tpu.memory_space<vmem>>, vector<1x128x128xbf16>
    %5 = vector.shape_cast %4 : vector<1x128x128xbf16> to vector<128x128xbf16>
    %cst_7 = arith.constant dense<0.000000e+00> : vector<64x128xf32>
    %6 = tpu.matmul %3, %5, %cst_7 {dimension_numbers = #tpu.dot_dimension_numbers<[1], [0], [0], [1], [0, 0, 1, 1], [], []>} : vector<64x128xbf16>, vector<128x128xbf16>, vector<64x128xf32> -> vector<64x128xf32>
    %7 = arith.addf %0, %6 : vector<64x128xf32>
    %c0_8 = arith.constant 0 : index
    %c1 = arith.constant 1 : index
    %c0_9 = arith.constant 0 : index
    %c0_10 = arith.constant 0 : index
    %c0_11 = arith.constant 0 : index
    %8 = vector.load %arg1[%c0_8, %c1, %c0_9, %c0_10, %c0_11] : memref<1x4x9x9x128xbf16, #tpu.memory_space<vmem>>, vector<1x1x8x8x128xbf16>
    %9 = vector.shape_cast %8 : vector<1x1x8x8x128xbf16> to vector<8x8x128xbf16>
    %10 = vector.shape_cast %9 : vector<8x8x128xbf16> to vector<64x128xbf16>
    %c1_12 = arith.constant 1 : index
    %c0_13 = arith.constant 0 : index
    %c0_14 = arith.constant 0 : index
    %11 = vector.load %arg2[%c1_12, %c0_13, %c0_14] : memref<9x128x128xbf16, #tpu.memory_space<vmem>>, vector<1x128x128xbf16>
    %12 = vector.shape_cast %11 : vector<1x128x128xbf16> to vector<128x128xbf16>
    %cst_15 = arith.constant dense<0.000000e+00> : vector<64x128xf32>
    %13 = tpu.matmul %10, %12, %cst_15 {dimension_numbers = #tpu.dot_dimension_numbers<[1], [0], [0], [1], [0, 0, 1, 1], [], []>} : vector<64x128xbf16>, vector<128x128xbf16>, vector<64x128xf32> -> vector<64x128xf32>
    %14 = arith.addf %7, %13 : vector<64x128xf32>
    %c0_16 = arith.constant 0 : index
    %c0_17 = arith.constant 0 : index
    %c0_18 = arith.constant 0 : index
    %c1_19 = arith.constant 1 : index
    %c0_20 = arith.constant 0 : index
    %15 = vector.load %arg1[%c0_16, %c0_17, %c0_18, %c1_19, %c0_20] : memref<1x4x9x9x128xbf16, #tpu.memory_space<vmem>>, vector<1x1x8x8x128xbf16>
    %16 = vector.shape_cast %15 : vector<1x1x8x8x128xbf16> to vector<8x8x128xbf16>
    %17 = vector.shape_cast %16 : vector<8x8x128xbf16> to vector<64x128xbf16>
    %c2 = arith.constant 2 : index
    %c0_21 = arith.constant 0 : index
    %c0_22 = arith.constant 0 : index
    %18 = vector.load %arg2[%c2, %c0_21, %c0_22] : memref<9x128x128xbf16, #tpu.memory_space<vmem>>, vector<1x128x128xbf16>
    %19 = vector.shape_cast %18 : vector<1x128x128xbf16> to vector<128x128xbf16>
    %cst_23 = arith.constant dense<0.000000e+00> : vector<64x128xf32>
    %20 = tpu.matmul %17, %19, %cst_23 {dimension_numbers = #tpu.dot_dimension_numbers<[1], [0], [0], [1], [0, 0, 1, 1], [], []>} : vector<64x128xbf16>, vector<128x128xbf16>, vector<64x128xf32> -> vector<64x128xf32>
    %21 = arith.addf %14, %20 : vector<64x128xf32>
    %c0_24 = arith.constant 0 : index
    %c2_25 = arith.constant 2 : index
    %c0_26 = arith.constant 0 : index
    %c0_27 = arith.constant 0 : index
    %c0_28 = arith.constant 0 : index
    %22 = vector.load %arg1[%c0_24, %c2_25, %c0_26, %c0_27, %c0_28] : memref<1x4x9x9x128xbf16, #tpu.memory_space<vmem>>, vector<1x1x8x8x128xbf16>
    %23 = vector.shape_cast %22 : vector<1x1x8x8x128xbf16> to vector<8x8x128xbf16>
    %24 = vector.shape_cast %23 : vector<8x8x128xbf16> to vector<64x128xbf16>
    %c3 = arith.constant 3 : index
    %c0_29 = arith.constant 0 : index
    %c0_30 = arith.constant 0 : index
    %25 = vector.load %arg2[%c3, %c0_29, %c0_30] : memref<9x128x128xbf16, #tpu.memory_space<vmem>>, vector<1x128x128xbf16>
    %26 = vector.shape_cast %25 : vector<1x128x128xbf16> to vector<128x128xbf16>
    %cst_31 = arith.constant dense<0.000000e+00> : vector<64x128xf32>
    %27 = tpu.matmul %24, %26, %cst_31 {dimension_numbers = #tpu.dot_dimension_numbers<[1], [0], [0], [1], [0, 0, 1, 1], [], []>} : vector<64x128xbf16>, vector<128x128xbf16>, vector<64x128xf32> -> vector<64x128xf32>
    %28 = arith.addf %21, %27 : vector<64x128xf32>
    %c0_32 = arith.constant 0 : index
    %c3_33 = arith.constant 3 : index
    %c0_34 = arith.constant 0 : index
    %c0_35 = arith.constant 0 : index
    %c0_36 = arith.constant 0 : index
    %29 = vector.load %arg1[%c0_32, %c3_33, %c0_34, %c0_35, %c0_36] : memref<1x4x9x9x128xbf16, #tpu.memory_space<vmem>>, vector<1x1x8x8x128xbf16>
    %30 = vector.shape_cast %29 : vector<1x1x8x8x128xbf16> to vector<8x8x128xbf16>
    %31 = vector.shape_cast %30 : vector<8x8x128xbf16> to vector<64x128xbf16>
    %c4 = arith.constant 4 : index
    %c0_37 = arith.constant 0 : index
    %c0_38 = arith.constant 0 : index
    %32 = vector.load %arg2[%c4, %c0_37, %c0_38] : memref<9x128x128xbf16, #tpu.memory_space<vmem>>, vector<1x128x128xbf16>
    %33 = vector.shape_cast %32 : vector<1x128x128xbf16> to vector<128x128xbf16>
    %cst_39 = arith.constant dense<0.000000e+00> : vector<64x128xf32>
    %34 = tpu.matmul %31, %33, %cst_39 {dimension_numbers = #tpu.dot_dimension_numbers<[1], [0], [0], [1], [0, 0, 1, 1], [], []>} : vector<64x128xbf16>, vector<128x128xbf16>, vector<64x128xf32> -> vector<64x128xf32>
    %35 = arith.addf %28, %34 : vector<64x128xf32>
    %c0_40 = arith.constant 0 : index
    %c2_41 = arith.constant 2 : index
    %c0_42 = arith.constant 0 : index
    %c1_43 = arith.constant 1 : index
    %c0_44 = arith.constant 0 : index
    %36 = vector.load %arg1[%c0_40, %c2_41, %c0_42, %c1_43, %c0_44] : memref<1x4x9x9x128xbf16, #tpu.memory_space<vmem>>, vector<1x1x8x8x128xbf16>
    %37 = vector.shape_cast %36 : vector<1x1x8x8x128xbf16> to vector<8x8x128xbf16>
    %38 = vector.shape_cast %37 : vector<8x8x128xbf16> to vector<64x128xbf16>
    %c5 = arith.constant 5 : index
    %c0_45 = arith.constant 0 : index
    %c0_46 = arith.constant 0 : index
    %39 = vector.load %arg2[%c5, %c0_45, %c0_46] : memref<9x128x128xbf16, #tpu.memory_space<vmem>>, vector<1x128x128xbf16>
    %40 = vector.shape_cast %39 : vector<1x128x128xbf16> to vector<128x128xbf16>
    %cst_47 = arith.constant dense<0.000000e+00> : vector<64x128xf32>
    %41 = tpu.matmul %38, %40, %cst_47 {dimension_numbers = #tpu.dot_dimension_numbers<[1], [0], [0], [1], [0, 0, 1, 1], [], []>} : vector<64x128xbf16>, vector<128x128xbf16>, vector<64x128xf32> -> vector<64x128xf32>
    %42 = arith.addf %35, %41 : vector<64x128xf32>
    %c0_48 = arith.constant 0 : index
    %c0_49 = arith.constant 0 : index
    %c1_50 = arith.constant 1 : index
    %c0_51 = arith.constant 0 : index
    %c0_52 = arith.constant 0 : index
    %43 = vector.load %arg1[%c0_48, %c0_49, %c1_50, %c0_51, %c0_52] : memref<1x4x9x9x128xbf16, #tpu.memory_space<vmem>>, vector<1x1x8x8x128xbf16>
    %44 = vector.shape_cast %43 : vector<1x1x8x8x128xbf16> to vector<8x8x128xbf16>
    %45 = vector.shape_cast %44 : vector<8x8x128xbf16> to vector<64x128xbf16>
    %c6 = arith.constant 6 : index
    %c0_53 = arith.constant 0 : index
    %c0_54 = arith.constant 0 : index
    %46 = vector.load %arg2[%c6, %c0_53, %c0_54] : memref<9x128x128xbf16, #tpu.memory_space<vmem>>, vector<1x128x128xbf16>
    %47 = vector.shape_cast %46 : vector<1x128x128xbf16> to vector<128x128xbf16>
    %cst_55 = arith.constant dense<0.000000e+00> : vector<64x128xf32>
    %48 = tpu.matmul %45, %47, %cst_55 {dimension_numbers = #tpu.dot_dimension_numbers<[1], [0], [0], [1], [0, 0, 1, 1], [], []>} : vector<64x128xbf16>, vector<128x128xbf16>, vector<64x128xf32> -> vector<64x128xf32>
    %49 = arith.addf %42, %48 : vector<64x128xf32>
    %c0_56 = arith.constant 0 : index
    %c1_57 = arith.constant 1 : index
    %c1_58 = arith.constant 1 : index
    %c0_59 = arith.constant 0 : index
    %c0_60 = arith.constant 0 : index
    %50 = vector.load %arg1[%c0_56, %c1_57, %c1_58, %c0_59, %c0_60] : memref<1x4x9x9x128xbf16, #tpu.memory_space<vmem>>, vector<1x1x8x8x128xbf16>
    %51 = vector.shape_cast %50 : vector<1x1x8x8x128xbf16> to vector<8x8x128xbf16>
    %52 = vector.shape_cast %51 : vector<8x8x128xbf16> to vector<64x128xbf16>
    %c7 = arith.constant 7 : index
    %c0_61 = arith.constant 0 : index
    %c0_62 = arith.constant 0 : index
    %53 = vector.load %arg2[%c7, %c0_61, %c0_62] : memref<9x128x128xbf16, #tpu.memory_space<vmem>>, vector<1x128x128xbf16>
    %54 = vector.shape_cast %53 : vector<1x128x128xbf16> to vector<128x128xbf16>
    %cst_63 = arith.constant dense<0.000000e+00> : vector<64x128xf32>
    %55 = tpu.matmul %52, %54, %cst_63 {dimension_numbers = #tpu.dot_dimension_numbers<[1], [0], [0], [1], [0, 0, 1, 1], [], []>} : vector<64x128xbf16>, vector<128x128xbf16>, vector<64x128xf32> -> vector<64x128xf32>
    %56 = arith.addf %49, %55 : vector<64x128xf32>
    %c0_64 = arith.constant 0 : index
    %c0_65 = arith.constant 0 : index
    %c1_66 = arith.constant 1 : index
    %c1_67 = arith.constant 1 : index
    %c0_68 = arith.constant 0 : index
    %57 = vector.load %arg1[%c0_64, %c0_65, %c1_66, %c1_67, %c0_68] : memref<1x4x9x9x128xbf16, #tpu.memory_space<vmem>>, vector<1x1x8x8x128xbf16>
    %58 = vector.shape_cast %57 : vector<1x1x8x8x128xbf16> to vector<8x8x128xbf16>
    %59 = vector.shape_cast %58 : vector<8x8x128xbf16> to vector<64x128xbf16>
    %c8 = arith.constant 8 : index
    %c0_69 = arith.constant 0 : index
    %c0_70 = arith.constant 0 : index
    %60 = vector.load %arg2[%c8, %c0_69, %c0_70] : memref<9x128x128xbf16, #tpu.memory_space<vmem>>, vector<1x128x128xbf16>
    %61 = vector.shape_cast %60 : vector<1x128x128xbf16> to vector<128x128xbf16>
    %cst_71 = arith.constant dense<0.000000e+00> : vector<64x128xf32>
    %62 = tpu.matmul %59, %61, %cst_71 {dimension_numbers = #tpu.dot_dimension_numbers<[1], [0], [0], [1], [0, 0, 1, 1], [], []>} : vector<64x128xbf16>, vector<128x128xbf16>, vector<64x128xf32> -> vector<64x128xf32>
    %63 = arith.addf %56, %62 : vector<64x128xf32>
    %c0_72 = arith.constant 0 : index
    %c0_73 = arith.constant 0 : index
    %64 = vector.load %arg3[%c0_72, %c0_73] : memref<1x128xf32, #tpu.memory_space<vmem>>, vector<1x128xf32>
    %65 = vector.broadcast %64 : vector<1x128xf32> to vector<64x128xf32>
    %66 = arith.mulf %63, %65 : vector<64x128xf32>
    %c0_74 = arith.constant 0 : index
    %c0_75 = arith.constant 0 : index
    %67 = vector.load %arg4[%c0_74, %c0_75] : memref<1x128xf32, #tpu.memory_space<vmem>>, vector<1x128xf32>
    %68 = vector.broadcast %67 : vector<1x128xf32> to vector<64x128xf32>
    %69 = arith.addf %66, %68 : vector<64x128xf32>
    %cst_76 = arith.constant 0.000000e+00 : f32
    %70 = vector.broadcast %cst_76 : f32 to vector<64x128xf32>
    %71 = arith.maximumf %69, %70 : vector<64x128xf32>
    %cst_77 = arith.constant 0.000000e+00 : bf16
    %72 = vector.broadcast %cst_77 : bf16 to vector<1x10x128xbf16>
    %cst_78 = arith.constant 0.000000e+00 : bf16
    %73 = vector.broadcast %cst_78 : bf16 to vector<8x1x128xbf16>
    %c0_79 = arith.constant 0 : index
    %c0_80 = arith.constant 0 : index
    %c0_81 = arith.constant 0 : index
    %74 = vector.load %arg12[%c0_79, %c0_80, %c0_81] : memref<10x10x128xbf16, #tpu.memory_space<vmem>>, vector<1x10x128xbf16>
    tpu.vector_store %arg12[%c0_79, %c0_80, %c0_81], %72 {strides = array<i32>} : memref<10x10x128xbf16, #tpu.memory_space<vmem>>, vector<1x10x128xbf16>,
    %c9 = arith.constant 9 : index
    %c0_82 = arith.constant 0 : index
    %c0_83 = arith.constant 0 : index
    %75 = vector.load %arg12[%c9, %c0_82, %c0_83] : memref<10x10x128xbf16, #tpu.memory_space<vmem>>, vector<1x10x128xbf16>
    tpu.vector_store %arg12[%c9, %c0_82, %c0_83], %72 {strides = array<i32>} : memref<10x10x128xbf16, #tpu.memory_space<vmem>>, vector<1x10x128xbf16>,
    %c1_84 = arith.constant 1 : index
    %c0_85 = arith.constant 0 : index
    %c0_86 = arith.constant 0 : index
    %76 = vector.load %arg12[%c1_84, %c0_85, %c0_86] : memref<10x10x128xbf16, #tpu.memory_space<vmem>>, vector<8x1x128xbf16>
    tpu.vector_store %arg12[%c1_84, %c0_85, %c0_86], %73 {strides = array<i32>} : memref<10x10x128xbf16, #tpu.memory_space<vmem>>, vector<8x1x128xbf16>,
    %c1_87 = arith.constant 1 : index
    %c9_88 = arith.constant 9 : index
    %c0_89 = arith.constant 0 : index
    %77 = vector.load %arg12[%c1_87, %c9_88, %c0_89] : memref<10x10x128xbf16, #tpu.memory_space<vmem>>, vector<8x1x128xbf16>
    tpu.vector_store %arg12[%c1_87, %c9_88, %c0_89], %73 {strides = array<i32>} : memref<10x10x128xbf16, #tpu.memory_space<vmem>>, vector<8x1x128xbf16>,
    %78 = vector.shape_cast %71 : vector<64x128xf32> to vector<8x8x128xf32>
    %79 = arith.truncf %78 : vector<8x8x128xf32> to vector<8x8x128xbf16>
    %c1_90 = arith.constant 1 : index
    %c1_91 = arith.constant 1 : index
    %c0_92 = arith.constant 0 : index
    %80 = vector.load %arg12[%c1_90, %c1_91, %c0_92] : memref<10x10x128xbf16, #tpu.memory_space<vmem>>, vector<8x8x128xbf16>
    tpu.vector_store %arg12[%c1_90, %c1_91, %c0_92], %79 {strides = array<i32>} : memref<10x10x128xbf16, #tpu.memory_space<vmem>>, vector<8x8x128xbf16>,
    %cst_93 = arith.constant 0.000000e+00 : f32
    %81 = vector.broadcast %cst_93 : f32 to vector<64x128xf32>
    %c0_94 = arith.constant 0 : index
    %c0_95 = arith.constant 0 : index
    %c0_96 = arith.constant 0 : index
    %82 = vector.load %arg12[%c0_94, %c0_95, %c0_96] : memref<10x10x128xbf16, #tpu.memory_space<vmem>>, vector<8x8x128xbf16>
    %83 = vector.shape_cast %82 : vector<8x8x128xbf16> to vector<64x128xbf16>
    %c0_97 = arith.constant 0 : index
    %c0_98 = arith.constant 0 : index
    %c0_99 = arith.constant 0 : index
    %84 = vector.load %arg5[%c0_97, %c0_98, %c0_99] : memref<9x128x128xbf16, #tpu.memory_space<vmem>>, vector<1x128x128xbf16>
    %85 = vector.shape_cast %84 : vector<1x128x128xbf16> to vector<128x128xbf16>
    %cst_100 = arith.constant dense<0.000000e+00> : vector<64x128xf32>
    %86 = tpu.matmul %83, %85, %cst_100 {dimension_numbers = #tpu.dot_dimension_numbers<[1], [0], [0], [1], [0, 0, 1, 1], [], []>} : vector<64x128xbf16>, vector<128x128xbf16>, vector<64x128xf32> -> vector<64x128xf32>
    %87 = arith.addf %81, %86 : vector<64x128xf32>
    %c0_101 = arith.constant 0 : index
    %c1_102 = arith.constant 1 : index
    %c0_103 = arith.constant 0 : index
    %88 = vector.load %arg12[%c0_101, %c1_102, %c0_103] : memref<10x10x128xbf16, #tpu.memory_space<vmem>>, vector<8x8x128xbf16>
    %89 = vector.shape_cast %88 : vector<8x8x128xbf16> to vector<64x128xbf16>
    %c1_104 = arith.constant 1 : index
    %c0_105 = arith.constant 0 : index
    %c0_106 = arith.constant 0 : index
    %90 = vector.load %arg5[%c1_104, %c0_105, %c0_106] : memref<9x128x128xbf16, #tpu.memory_space<vmem>>, vector<1x128x128xbf16>
    %91 = vector.shape_cast %90 : vector<1x128x128xbf16> to vector<128x128xbf16>
    %cst_107 = arith.constant dense<0.000000e+00> : vector<64x128xf32>
    %92 = tpu.matmul %89, %91, %cst_107 {dimension_numbers = #tpu.dot_dimension_numbers<[1], [0], [0], [1], [0, 0, 1, 1], [], []>} : vector<64x128xbf16>, vector<128x128xbf16>, vector<64x128xf32> -> vector<64x128xf32>
    %93 = arith.addf %87, %92 : vector<64x128xf32>
    %c0_108 = arith.constant 0 : index
    %c2_109 = arith.constant 2 : index
    %c0_110 = arith.constant 0 : index
    %94 = vector.load %arg12[%c0_108, %c2_109, %c0_110] : memref<10x10x128xbf16, #tpu.memory_space<vmem>>, vector<8x8x128xbf16>
    %95 = vector.shape_cast %94 : vector<8x8x128xbf16> to vector<64x128xbf16>
    %c2_111 = arith.constant 2 : index
    %c0_112 = arith.constant 0 : index
    %c0_113 = arith.constant 0 : index
    %96 = vector.load %arg5[%c2_111, %c0_112, %c0_113] : memref<9x128x128xbf16, #tpu.memory_space<vmem>>, vector<1x128x128xbf16>
    %97 = vector.shape_cast %96 : vector<1x128x128xbf16> to vector<128x128xbf16>
    %cst_114 = arith.constant dense<0.000000e+00> : vector<64x128xf32>
    %98 = tpu.matmul %95, %97, %cst_114 {dimension_numbers = #tpu.dot_dimension_numbers<[1], [0], [0], [1], [0, 0, 1, 1], [], []>} : vector<64x128xbf16>, vector<128x128xbf16>, vector<64x128xf32> -> vector<64x128xf32>
    %99 = arith.addf %93, %98 : vector<64x128xf32>
    %c1_115 = arith.constant 1 : index
    %c0_116 = arith.constant 0 : index
    %c0_117 = arith.constant 0 : index
    %100 = vector.load %arg12[%c1_115, %c0_116, %c0_117] : memref<10x10x128xbf16, #tpu.memory_space<vmem>>, vector<8x8x128xbf16>
    %101 = vector.shape_cast %100 : vector<8x8x128xbf16> to vector<64x128xbf16>
    %c3_118 = arith.constant 3 : index
    %c0_119 = arith.constant 0 : index
    %c0_120 = arith.constant 0 : index
    %102 = vector.load %arg5[%c3_118, %c0_119, %c0_120] : memref<9x128x128xbf16, #tpu.memory_space<vmem>>, vector<1x128x128xbf16>
    %103 = vector.shape_cast %102 : vector<1x128x128xbf16> to vector<128x128xbf16>
    %cst_121 = arith.constant dense<0.000000e+00> : vector<64x128xf32>
    %104 = tpu.matmul %101, %103, %cst_121 {dimension_numbers = #tpu.dot_dimension_numbers<[1], [0], [0], [1], [0, 0, 1, 1], [], []>} : vector<64x128xbf16>, vector<128x128xbf16>, vector<64x128xf32> -> vector<64x128xf32>
    %105 = arith.addf %99, %104 : vector<64x128xf32>
    %c1_122 = arith.constant 1 : index
    %c1_123 = arith.constant 1 : index
    %c0_124 = arith.constant 0 : index
    %106 = vector.load %arg12[%c1_122, %c1_123, %c0_124] : memref<10x10x128xbf16, #tpu.memory_space<vmem>>, vector<8x8x128xbf16>
    %107 = vector.shape_cast %106 : vector<8x8x128xbf16> to vector<64x128xbf16>
    %c4_125 = arith.constant 4 : index
    %c0_126 = arith.constant 0 : index
    %c0_127 = arith.constant 0 : index
    %108 = vector.load %arg5[%c4_125, %c0_126, %c0_127] : memref<9x128x128xbf16, #tpu.memory_space<vmem>>, vector<1x128x128xbf16>
    %109 = vector.shape_cast %108 : vector<1x128x128xbf16> to vector<128x128xbf16>
    %cst_128 = arith.constant dense<0.000000e+00> : vector<64x128xf32>
    %110 = tpu.matmul %107, %109, %cst_128 {dimension_numbers = #tpu.dot_dimension_numbers<[1], [0], [0], [1], [0, 0, 1, 1], [], []>} : vector<64x128xbf16>, vector<128x128xbf16>, vector<64x128xf32> -> vector<64x128xf32>
    %111 = arith.addf %105, %110 : vector<64x128xf32>
    %c1_129 = arith.constant 1 : index
    %c2_130 = arith.constant 2 : index
    %c0_131 = arith.constant 0 : index
    %112 = vector.load %arg12[%c1_129, %c2_130, %c0_131] : memref<10x10x128xbf16, #tpu.memory_space<vmem>>, vector<8x8x128xbf16>
    %113 = vector.shape_cast %112 : vector<8x8x128xbf16> to vector<64x128xbf16>
    %c5_132 = arith.constant 5 : index
    %c0_133 = arith.constant 0 : index
    %c0_134 = arith.constant 0 : index
    %114 = vector.load %arg5[%c5_132, %c0_133, %c0_134] : memref<9x128x128xbf16, #tpu.memory_space<vmem>>, vector<1x128x128xbf16>
    %115 = vector.shape_cast %114 : vector<1x128x128xbf16> to vector<128x128xbf16>
    %cst_135 = arith.constant dense<0.000000e+00> : vector<64x128xf32>
    %116 = tpu.matmul %113, %115, %cst_135 {dimension_numbers = #tpu.dot_dimension_numbers<[1], [0], [0], [1], [0, 0, 1, 1], [], []>} : vector<64x128xbf16>, vector<128x128xbf16>, vector<64x128xf32> -> vector<64x128xf32>
    %117 = arith.addf %111, %116 : vector<64x128xf32>
    %c2_136 = arith.constant 2 : index
    %c0_137 = arith.constant 0 : index
    %c0_138 = arith.constant 0 : index
    %118 = vector.load %arg12[%c2_136, %c0_137, %c0_138] : memref<10x10x128xbf16, #tpu.memory_space<vmem>>, vector<8x8x128xbf16>
    %119 = vector.shape_cast %118 : vector<8x8x128xbf16> to vector<64x128xbf16>
    %c6_139 = arith.constant 6 : index
    %c0_140 = arith.constant 0 : index
    %c0_141 = arith.constant 0 : index
    %120 = vector.load %arg5[%c6_139, %c0_140, %c0_141] : memref<9x128x128xbf16, #tpu.memory_space<vmem>>, vector<1x128x128xbf16>
    %121 = vector.shape_cast %120 : vector<1x128x128xbf16> to vector<128x128xbf16>
    %cst_142 = arith.constant dense<0.000000e+00> : vector<64x128xf32>
    %122 = tpu.matmul %119, %121, %cst_142 {dimension_numbers = #tpu.dot_dimension_numbers<[1], [0], [0], [1], [0, 0, 1, 1], [], []>} : vector<64x128xbf16>, vector<128x128xbf16>, vector<64x128xf32> -> vector<64x128xf32>
    %123 = arith.addf %117, %122 : vector<64x128xf32>
    %c2_143 = arith.constant 2 : index
    %c1_144 = arith.constant 1 : index
    %c0_145 = arith.constant 0 : index
    %124 = vector.load %arg12[%c2_143, %c1_144, %c0_145] : memref<10x10x128xbf16, #tpu.memory_space<vmem>>, vector<8x8x128xbf16>
    %125 = vector.shape_cast %124 : vector<8x8x128xbf16> to vector<64x128xbf16>
    %c7_146 = arith.constant 7 : index
    %c0_147 = arith.constant 0 : index
    %c0_148 = arith.constant 0 : index
    %126 = vector.load %arg5[%c7_146, %c0_147, %c0_148] : memref<9x128x128xbf16, #tpu.memory_space<vmem>>, vector<1x128x128xbf16>
    %127 = vector.shape_cast %126 : vector<1x128x128xbf16> to vector<128x128xbf16>
    %cst_149 = arith.constant dense<0.000000e+00> : vector<64x128xf32>
    %128 = tpu.matmul %125, %127, %cst_149 {dimension_numbers = #tpu.dot_dimension_numbers<[1], [0], [0], [1], [0, 0, 1, 1], [], []>} : vector<64x128xbf16>, vector<128x128xbf16>, vector<64x128xf32> -> vector<64x128xf32>
    %129 = arith.addf %123, %128 : vector<64x128xf32>
    %c2_150 = arith.constant 2 : index
    %c2_151 = arith.constant 2 : index
    %c0_152 = arith.constant 0 : index
    %130 = vector.load %arg12[%c2_150, %c2_151, %c0_152] : memref<10x10x128xbf16, #tpu.memory_space<vmem>>, vector<8x8x128xbf16>
    %131 = vector.shape_cast %130 : vector<8x8x128xbf16> to vector<64x128xbf16>
    %c8_153 = arith.constant 8 : index
    %c0_154 = arith.constant 0 : index
    %c0_155 = arith.constant 0 : index
    %132 = vector.load %arg5[%c8_153, %c0_154, %c0_155] : memref<9x128x128xbf16, #tpu.memory_space<vmem>>, vector<1x128x128xbf16>
    %133 = vector.shape_cast %132 : vector<1x128x128xbf16> to vector<128x128xbf16>
    %cst_156 = arith.constant dense<0.000000e+00> : vector<64x128xf32>
    %134 = tpu.matmul %131, %133, %cst_156 {dimension_numbers = #tpu.dot_dimension_numbers<[1], [0], [0], [1], [0, 0, 1, 1], [], []>} : vector<64x128xbf16>, vector<128x128xbf16>, vector<64x128xf32> -> vector<64x128xf32>
    %135 = arith.addf %129, %134 : vector<64x128xf32>
    %c0_157 = arith.constant 0 : index
    %c0_158 = arith.constant 0 : index
    %136 = vector.load %arg6[%c0_157, %c0_158] : memref<1x128xf32, #tpu.memory_space<vmem>>, vector<1x128xf32>
    %137 = vector.broadcast %136 : vector<1x128xf32> to vector<64x128xf32>
    %138 = arith.mulf %135, %137 : vector<64x128xf32>
    %c0_159 = arith.constant 0 : index
    %c0_160 = arith.constant 0 : index
    %139 = vector.load %arg7[%c0_159, %c0_160] : memref<1x128xf32, #tpu.memory_space<vmem>>, vector<1x128xf32>
    %140 = vector.broadcast %139 : vector<1x128xf32> to vector<64x128xf32>
    %141 = arith.addf %138, %140 : vector<64x128xf32>
    %c0_161 = arith.constant 0 : index
    %c3_162 = arith.constant 3 : index
    %c0_163 = arith.constant 0 : index
    %c0_164 = arith.constant 0 : index
    %c0_165 = arith.constant 0 : index
    %142 = vector.load %arg1[%c0_161, %c3_162, %c0_163, %c0_164, %c0_165] : memref<1x4x9x9x128xbf16, #tpu.memory_space<vmem>>, vector<1x1x8x8x128xbf16>
    %143 = vector.shape_cast %142 : vector<1x1x8x8x128xbf16> to vector<8x8x128xbf16>
    %144 = vector.shape_cast %143 : vector<8x8x128xbf16> to vector<64x128xbf16>
    %c0_166 = arith.constant 0 : index
    %c0_167 = arith.constant 0 : index
    %145 = vector.load %arg8[%c0_166, %c0_167] : memref<128x128xbf16, #tpu.memory_space<vmem>>, vector<128x128xbf16>
    %cst_168 = arith.constant dense<0.000000e+00> : vector<64x128xf32>
    %146 = tpu.matmul %144, %145, %cst_168 {dimension_numbers = #tpu.dot_dimension_numbers<[1], [0], [0], [1], [0, 0, 1, 1], [], []>} : vector<64x128xbf16>, vector<128x128xbf16>, vector<64x128xf32> -> vector<64x128xf32>
    %c0_169 = arith.constant 0 : index
    %c0_170 = arith.constant 0 : index
    %147 = vector.load %arg9[%c0_169, %c0_170] : memref<1x128xf32, #tpu.memory_space<vmem>>, vector<1x128xf32>
    %148 = vector.broadcast %147 : vector<1x128xf32> to vector<64x128xf32>
    %149 = arith.mulf %146, %148 : vector<64x128xf32>
    %c0_171 = arith.constant 0 : index
    %c0_172 = arith.constant 0 : index
    %150 = vector.load %arg10[%c0_171, %c0_172] : memref<1x128xf32, #tpu.memory_space<vmem>>, vector<1x128xf32>
    %151 = vector.broadcast %150 : vector<1x128xf32> to vector<64x128xf32>
    %152 = arith.addf %149, %151 : vector<64x128xf32>
    %153 = arith.addf %141, %152 : vector<64x128xf32>
    %cst_173 = arith.constant 0.000000e+00 : f32
    %154 = vector.broadcast %cst_173 : f32 to vector<64x128xf32>
    %155 = arith.maximumf %153, %154 : vector<64x128xf32>
    %c0_174 = arith.constant 0 : index
    %c0_175 = arith.constant 0 : index
    %c0_176 = arith.constant 0 : index
    %156 = vector.load %arg11[%c0_174, %c0_175, %c0_176] : memref<1x64x128xf32, #tpu.memory_space<vmem>>, vector<1x64x128xf32>
    %157 = vector.shape_cast %156 : vector<1x64x128xf32> to vector<64x128xf32>
    %158 = vector.shape_cast %155 : vector<64x128xf32> to vector<1x64x128xf32>
    tpu.vector_store %arg11[%c0_174, %c0_175, %c0_176], %158 {strides = array<i32>} : memref<1x64x128xf32, #tpu.memory_space<vmem>>, vector<1x64x128xf32>,
    return
  }
  func.func @transform_0(%arg0: i32) -> (i32, i32, i32, i32, i32) {
    %c0_i32 = arith.constant 0 : i32
    %c0_i32_0 = arith.constant 0 : i32
    %c0_i32_1 = arith.constant 0 : i32
    %c0_i32_2 = arith.constant 0 : i32
    %c0_i32_3 = arith.constant 0 : i32
    return %arg0, %c0_i32, %c0_i32_0, %c0_i32_1, %c0_i32_2 : i32, i32, i32, i32, i32
  }
  func.func @transform_1(%arg0: i32) -> (i32, i32, i32) {
    %c0_i32 = arith.constant 0 : i32
    %c0_i32_0 = arith.constant 0 : i32
    %c0_i32_1 = arith.constant 0 : i32
    %c0_i32_2 = arith.constant 0 : i32
    return %c0_i32, %c0_i32_0, %c0_i32_1 : i32, i32, i32
  }
  func.func @transform_2(%arg0: i32) -> (i32, i32) {
    %c0_i32 = arith.constant 0 : i32
    %c0_i32_0 = arith.constant 0 : i32
    %c0_i32_1 = arith.constant 0 : i32
    return %c0_i32, %c0_i32_0 : i32, i32
  }
  func.func @transform_3(%arg0: i32) -> (i32, i32) {
    %c0_i32 = arith.constant 0 : i32
    %c0_i32_0 = arith.constant 0 : i32
    %c0_i32_1 = arith.constant 0 : i32
    return %c0_i32, %c0_i32_0 : i32, i32
  }
  func.func @transform_4(%arg0: i32) -> (i32, i32, i32) {
    %c0_i32 = arith.constant 0 : i32
    %c0_i32_0 = arith.constant 0 : i32
    %c0_i32_1 = arith.constant 0 : i32
    %c0_i32_2 = arith.constant 0 : i32
    return %c0_i32, %c0_i32_0, %c0_i32_1 : i32, i32, i32
  }
  func.func @transform_5(%arg0: i32) -> (i32, i32) {
    %c0_i32 = arith.constant 0 : i32
    %c0_i32_0 = arith.constant 0 : i32
    %c0_i32_1 = arith.constant 0 : i32
    return %c0_i32, %c0_i32_0 : i32, i32
  }
  func.func @transform_6(%arg0: i32) -> (i32, i32) {
    %c0_i32 = arith.constant 0 : i32
    %c0_i32_0 = arith.constant 0 : i32
    %c0_i32_1 = arith.constant 0 : i32
    return %c0_i32, %c0_i32_0 : i32, i32
  }
  func.func @transform_7(%arg0: i32) -> (i32, i32) {
    %c0_i32 = arith.constant 0 : i32
    %c0_i32_0 = arith.constant 0 : i32
    %c0_i32_1 = arith.constant 0 : i32
    return %c0_i32, %c0_i32_0 : i32, i32
  }
  func.func @transform_8(%arg0: i32) -> (i32, i32) {
    %c0_i32 = arith.constant 0 : i32
    %c0_i32_0 = arith.constant 0 : i32
    %c0_i32_1 = arith.constant 0 : i32
    return %c0_i32, %c0_i32_0 : i32, i32
  }
  func.func @transform_9(%arg0: i32) -> (i32, i32) {
    %c0_i32 = arith.constant 0 : i32
    %c0_i32_0 = arith.constant 0 : i32
    %c0_i32_1 = arith.constant 0 : i32
    return %c0_i32, %c0_i32_0 : i32, i32
  }
  func.func @transform_10(%arg0: i32) -> (i32, i32, i32) {
    %c0_i32 = arith.constant 0 : i32
    %c0_i32_0 = arith.constant 0 : i32
    %c0_i32_1 = arith.constant 0 : i32
    return %arg0, %c0_i32, %c0_i32_0 : i32, i32, i32
  }
}

</mosaic_0001>

<bundles_post_ra>
// kernel: residual_block_forward.1
= control target key start
LH: loop header
LB: loop body
LE: loop exit
PB: predicated region body
PF: predicated region fallthrough
CT: control target
= control target key end

     0   :  { %s6329_s13 = smov 0   ;;  %s7568_s0 = inlined_call_operand.vmem [shape: bf16[2,4,9,9,128], index: 0, kind: input, shape index: {}]   ;;  %s7569_s1 = inlined_call_operand.vmem [shape: bf16[9,128,128], index: 1, kind: input, shape index: {}]   ;;  %s7570_s2 = inlined_call_operand.vmem [shape: f32[1,128], index: 2, kind: input, shape index: {}]   ;;  %s7571_s3 = inlined_call_operand.vmem [shape: f32[1,128], index: 3, kind: input, shape index: {}]   ;;  %s7572_s4 = inlined_call_operand.vmem [shape: bf16[9,128,128], index: 4, kind: input, shape index: {}]   ;;  %s7573_s5 = inlined_call_operand.vmem [shape: f32[1,128], index: 5, kind: input, shape index: {}]   ;;  %s7574_s6 = inlined_call_operand.vmem [shape: f32[1,128], index: 6, kind: input, shape index: {}]   ;;  %s7575_s7 = inlined_call_operand.vmem [shape: bf16[128,128], index: 7, kind: input, shape index: {}]   ;;  %s7576_s8 = inlined_call_operand.vmem [shape: f32[1,128], index: 8, kind: input, shape index: {}]   ;;  %s7577_s9 = inlined_call_operand.vmem [shape: f32[1,128], index: 9, kind: input, shape index: {}]   ;;  %s7578_s10 = inlined_call_operand.vmem [shape: f32[2,64,128], index: 10, kind: output, shape index: {}]  }
   0x1 LB: > { %s4742_s14 = sadd.s32 4294967295, %s6271_s13   ;;  %p4746_p0 = scmp.ge.s32.totalorder %s6271_s13, 1  ;;  %s6271_s13 = sphi %s6329_s13, %s20_s13  }
   0x2   : > { %p312_p1 = scmp.lt.s32.totalorder %s6271_s13, 3 }
   0x4   : > { %p313_p2 = pnand %p4746_p0, %p312_p1 }
   0x6   : > { %316 = sbr.rel (%p313_p2) target bundleno = 781 (0x30d), region = 60 }
   0xb   : > { %v6073_v0 = vld [vmem:[%s7569_s1 + $0x78] sm:$0xff]   ;;  %p350_p3 = scmp.lt.s32.totalorder %s4742_s14, 1  ;;  %v6075_v2 = vld [vmem:[%s7569_s1 + $0x70] sm:$0xff]   ;;  %v6077_v4 = vld [vmem:[%s7569_s1 + $0x68] sm:$0xff]   ;;  %vm701_vm0 = vsmask.f32 3328 }
   0xc   : > { %v6074_v1 = vld [vmem:[%s7569_s1 + $0x38] sm:$0xff]   ;;  %5591 = vmatprep.subr.bf16.mxu0 %v6073_v0  ;;  %v6076_v3 = vld [vmem:[%s7569_s1 + $0x30] sm:$0xff]   ;;  %v6078_v5 = vld [vmem:[%s7569_s1 + $0x28] sm:$0xff]   ;;  %vm702_vm1 = vsmask.f32 7440  ;;  %v7585_v60 = vmov 0 }
   0xd   : > { %5615 = vmatprep.subr.bf16.mxu1 %v6074_v1  ;;  %5592 = vmatpush3.bf16.msra.mxu0 %v6073_v0  ;;  %s7614_s14 = smov (!%p350_p3, %s4742_s14), 1  ;;  %v6079_v6 = vld [vmem:[%s7569_s1 + $0x60] sm:$0xff]   ;;  %v6081_v8 = vld [vmem:[%s7569_s1 + $0x58] sm:$0xff]   ;;  %v6083_v10 = vld [vmem:[%s7569_s1 + $0x50] sm:$0xff]   ;;  %vm2262_vm3 = vcmask 1040384   ;;  %vm2427_vm8 = vcmask 1043456  }
   0xe   : > { %5616 = vmatpush3.bf16.msra.mxu1 %v6074_v1  ;;  %5593 = vmatprep.subr.bf16.mxu0 %v6075_v2  ;;  %v6080_v7 = vld [vmem:[%s7569_s1 + $0x20] sm:$0xff]   ;;  %s6063_s11 = smul.u32 288, %s7614_s14  ;;  %v6082_v9 = vld [vmem:[%s7569_s1 + $0x18] sm:$0xff]   ;;  %v6084_v11 = vld [vmem:[%s7569_s1 + $0x10] sm:$0xff]   ;;  %vm2263_vm4 = vsmask.f32 256 }
   0xf   : > { %5617 = vmatprep.subr.bf16.mxu1 %v6076_v3  ;;  %v6085_v14 = vld [vmem:[%s7569_s1 + $0x48] sm:$0xff]   ;;  %v6087_v16 = vld [vmem:[%s7569_s1 + $0x40] sm:$0xff]   ;;  %v6093_v19 = vld [vmem:[%s7569_s1 + $0xb8] sm:$0xff]   ;;  %vm2289_vm6 = vsmask.f32 7938  ;;  %vm2928_vm10 = vcmask 1042432  }
  0x10   : > { %s6373_s20 = scalar_lea.vmem %s7568_s0, %s6063_s11  ;;  %v6086_v15 = vld [vmem:[%s7569_s1 + $0x8] sm:$0xff]   ;;  %v6088_v17 = vld [vmem:[%s7569_s1] sm:$0xff]   ;;  %v6094_v20 = vld [vmem:[%s7569_s1 + $0xf8] sm:$0xff]   ;;  %vm2929_vm11 = vcmask 1046532   ;;  %s5354_s27 = sshll.u32 %s7614_s14, 6 }
  0x11   : > { %5594 = vmatpush3.bf16.msra.mxu0 %v6075_v2  ;;  %v6089_v12 = vld [vmem:[%s6373_s20 + $0x48] ss:$8 sps:$4 sm:$0xff]   ;;  %v6091_v18 = vld [vmem:[%s6373_s20 + $0x58] ss:$8 sps:$4 sm:$0xff]   ;;  %v686_v33 = vld [vmem:[%s6373_s20 + $0x4] sm:$0x1]  ;;  %s7509_s30 = scalar_lea.vmem %s7578_s10, %s5354_s27 }
  0x12   : > { %5618 = vmatpush3.bf16.msra.mxu1 %v6076_v3  ;;  %5595 = vmatprep.subr.bf16.mxu0 %v6077_v4  ;;  %v6090_v13 = vld [vmem:[%s6373_s20] ss:$8 sps:$4 sm:$0xff]   ;;  %v6092_v21 = vld [vmem:[%s6373_s20 + $0x10] ss:$8 sps:$4 sm:$0xff]   ;;  %v688_v35 = vld [vmem:[%s6373_s20 + $0xc] sm:$0x1] }
  0x13   : > { %5619 = vmatprep.subr.bf16.mxu1 %v6078_v5  ;;  %5607 = vmatprep.mubr.bf16.mxu0 %v6089_v12  ;;  %v6095_v22 = vld [vmem:[%s7569_s1 + $0xb0] sm:$0xff]   ;;  %v6103_v25 = vld [vmem:[%s6373_s20 + $0x20] ss:$8 sps:$4 sm:$0xff]   ;;  %v6101_v36 = vld [vmem:[%s7569_s1 + $0x98] sm:$0xff]   ;;  %v714_v39 = vshll.u32 %v686_v33, 16  ;;  %v728_v44 = vshll.u32 %v688_v35, 16 }
  0x14   : > { %5631 = vmatprep.mubr.bf16.mxu1 %v6090_v13  ;;  %v6096_v23 = vld [vmem:[%s7569_s1 + $0xf0] sm:$0xff]   ;;  %v6097_v26 = vld [vmem:[%s7569_s1 + $0xa8] sm:$0xff]   ;;  %v6099_v28 = vld [vmem:[%s7569_s1 + $0xa0] sm:$0xff]  }
  0x15   : > { %5596 = vmatpush3.bf16.msra.mxu0 %v6077_v4  ;;  %v6102_v24 = vld [vmem:[%s6373_s20 + $0x68] ss:$8 sps:$4 sm:$0xff]   ;;  %v6105_v29 = vld [vmem:[%s6373_s20 + $0x78] ss:$8 sps:$4 sm:$0xff]   ;;  %v690_v45 = vld [vmem:[%s6373_s20 + $0x14] sm:$0x1] }
  0x16   : > { %5620 = vmatpush3.bf16.msra.mxu1 %v6078_v5  ;;  %5597 = vmatprep.subr.bf16.mxu0 %v6079_v6  ;;  %v6098_v27 = vld [vmem:[%s7569_s1 + $0xe8] sm:$0xff]   ;;  %v6100_v30 = vld [vmem:[%s7569_s1 + $0xe0] sm:$0xff]   ;;  %v6106_v31 = vld [vmem:[%s6373_s20 + $0x30] ss:$8 sps:$4 sm:$0xff]   ;;  %v716_v49 = vrot.slane %v714_v39, 5  ;;  %v730_v53 = vrot.slane %v728_v44, 5 }
  0x17   : > { %5621 = vmatprep.subr.bf16.mxu1 %v6080_v7  ;;  %v685_v32 = vld [vmem:[%s6373_s20] sm:$0xf]  ;;  %v687_v34 = vld [vmem:[%s6373_s20 + $0x8] sm:$0xf]  ;;  %v689_v41 = vld [vmem:[%s6373_s20 + $0x10] sm:$0xf] }
  0x18   : > { %v705_v37 = vshrl.u32 %v685_v32, 16  ;;  %v708_v38 = vshll.u32 %v685_v32, 16  ;;  %v719_v40 = vshrl.u32 %v687_v34, 16  ;;  %v6104_v42 = vld [vmem:[%s7569_s1 + $0xd8] sm:$0xff]   ;;  %v722_v43 = vshll.u32 %v687_v34, 16  ;;  %vm6441_vm2 = vmor %vm701_vm0, %vm702_vm1  ;;  %v6107_v1 = vld [vmem:[%s7569_s1 + $0x90] sm:$0xff]  }
  0x19   : > { %5598 = vmatpush3.bf16.msra.mxu0 %v6079_v6  ;;  %v691_v46 = vld [vmem:[%s6373_s20 + $0x18] sm:$0xf]  ;;  %v692_v51 = vld [vmem:[%s6373_s20 + $0x1c] sm:$0x1]  ;;  %v733_v54 = vshrl.u32 %v689_v41, 16  ;;  %v736_v55 = vshll.u32 %v689_v41, 16  ;;  %vm6702_vm5 = vmand %vm2262_vm3, %vm2263_vm4 }
  0x1a   : > { %5622 = vmatpush3.bf16.msra.mxu1 %v6080_v7  ;;  %5599 = vmatprep.subr.bf16.mxu0 %v6081_v8  ;;  %v707_v47 = vrot.slane %v705_v37, 4  ;;  %v710_v48 = vrot.slane %v708_v38, 5  ;;  %v721_v50 = vrot.slane %v719_v40, 4  ;;  %v724_v52 = vrot.slane %v722_v43, 5  ;;  %v6108_v5 = vld [vmem:[%s7569_s1 + $0xd0] sm:$0xff]   ;;  %vm6709_vm7 = vmand %vm2262_vm3, %vm2289_vm6 }
  0x1b   : > { %5623 = vmatprep.subr.bf16.mxu1 %v6082_v9  ;;  %v742_v57 = vshll.u32 %v690_v45, 16  ;;  %v747_v58 = vshrl.u32 %v691_v46, 16  ;;  %v750_v59 = vshll.u32 %v691_v46, 16  ;;  %v7586_v60 = vsel %vm6441_vm2, 4294967295, %v7585_v60  ;;  %v697_v32 = vld [vmem:[%s6373_s20 + $0x30] sm:$0xf]  ;;  %vm6901_vm9 = vmand %vm2427_vm8, %vm2289_vm6 }
  0x1c   : > { %v711_v56 = vor.u32 %v710_v48, %v707_v47  ;;  %7587 = vst [vmem:[#allocation3_spill] sm:$0xff] %v7586_v60  ;;  %v725_v61 = vor.u32 %v724_v52, %v721_v50  ;;  %v735_v62 = vrot.slane %v733_v54, 4  ;;  %v738_v63 = vrot.slane %v736_v55, 5  ;;  %v699_v41 = vld [vmem:[%s6373_s20 + $0x38] sm:$0xf]  ;;  %vm7025_vm12 = vmor %vm2928_vm10, %vm2929_vm11 }
  0x1d   : > { %5600 = vmatpush3.bf16.msra.mxu0 %v6081_v8  ;;  %v756_v0 = vshll.u32 %v692_v51, 16  ;;  %v749_v3 = vrot.slane %v747_v58, 4  ;;  %v752_v4 = vrot.slane %v750_v59, 5  ;;  %v6114_v8 = vld [vmem:[%s6373_s20 + $0x90] ss:$8 sps:$4 sm:$0xff]   ;;  %v789_v37 = vshrl.u32 %v697_v32, 16 }
  0x1e   : > { %5624 = vmatpush3.bf16.msra.mxu1 %v6082_v9  ;;  %5601 = vmatprep.subr.bf16.mxu0 %v6083_v10  ;;  %v712_v2 = vrot.slane %v711_v56, 4  ;;  %v726_v6 = vrot.slane %v725_v61, 4  ;;  %v739_v7 = vor.u32 %v738_v63, %v735_v62  ;;  %v6109_v9 = vld [vmem:[%s7569_s1 + $0x88] sm:$0xff]   ;;  %v700_v45 = vld [vmem:[%s6373_s20 + $0x3c] sm:$0x1]  ;;  %v803_v50 = vshrl.u32 %v699_v41, 16 }
  0x1f   : > { %5625 = vmatprep.subr.bf16.mxu1 %v6084_v11  ;;  %v753_v12 = vor.u32 %v752_v4, %v749_v3  ;;  %v791_v46 = vrot.slane %v789_v37, 4  ;;  %v806_v51 = vshll.u32 %v699_v41, 16  ;;  %v6113_v52 = vld [vmem:[%s7569_s1 + $0x138] sm:$0xff]   ;;  %v812_v54 = vshll.u32 %v700_v45, 16  ;;  %v6115_v62 = vld [vmem:[%s6373_s20 + $0xa0] ss:$8 sps:$4 sm:$0xff]  }
  0x20   : > { %v731_v13 = vsel %vm6441_vm2, %v726_v6, %v730_v53  ;;  %v6116_v55 = vld [vmem:[%s7569_s1 + $0x178] sm:$0xff]   ;;  %v805_v58 = vrot.slane %v803_v50, 4  ;;  %v6117_v63 = vld [vmem:[%s7569_s1 + $0x130] sm:$0xff]   ;;  %v4905_v41 = vld [vmem:[%s6373_s20 + $0xac] sm:$0x1] }
  0x21   : > { %5602 = vmatpush3.bf16.msra.mxu0 %v6083_v10  ;;  %v717_v10 = vsel %vm6441_vm2, %v712_v2, %v716_v49  ;;  %v808_v59 = vrot.slane %v806_v51, 5  ;;  %v6120_v6 = vld [vmem:[%s6373_s20 + $0xb0] ss:$8 sps:$4 sm:$0xff]   ;;  %v1380_v50 = vshll.u32 %v4905_v41, 16 }
  0x22   : > { %5626 = vmatpush3.bf16.msra.mxu1 %v6084_v11  ;;  %5603 = vmatprep.subr.bf16.mxu0 %v6085_v14  ;;  %v6457_v11 = vrot.slane %v742_v57, 5 }
  0x23   : > { %5627 = vmatprep.subr.bf16.mxu1 %v6086_v15  ;;  %v809_v4 = vor.u32 %v808_v59, %v805_v58  ;;  %v6130_v58 = vld [vmem:[%s7569_s1 + $0x148] sm:$0xff]  }
  0x25   : > { %5604 = vmatpush3.bf16.msra.mxu0 %v6085_v14  ;;  %v740_v14 = vrot.slane %v739_v7, 4  ;;  %v6118_v7 = vld [vmem:[%s7569_s1 + $0x170] sm:$0xff]  }
  0x26   : > { %5628 = vmatpush3.bf16.msra.mxu1 %v6086_v15  ;;  %5605 = vmatprep.subr.bf16.mxu0 %v6087_v16  ;;  %v758_v15 = vrot.slane %v756_v0, 5 }
  0x27   : > { %5629 = vmatprep.subr.bf16.mxu1 %v6088_v17 }
  0x29   : > { %5606 = vmatpush3.bf16.msra.mxu0 %v6087_v16  ;;  %v6110_v16 = vld [vmem:[%s7569_s1 + $0xc8] sm:$0xff]  }
  0x2a   : > { %5630 = vmatpush3.bf16.msra.mxu1 %v6088_v17  ;;  %5639 = vmatprep.subr.bf16.mxu0 %v6093_v19  ;;  %v4814_v17 = vcombine.low %v717_v10, %v731_v13  ;;  %v6119_v10 = vld [vmem:[%s7569_s1 + $0x128] sm:$0xff]  }
  0x2b   : > { %5663 = vmatprep.subr.bf16.mxu1 %v6094_v20  ;;  %v6122_v13 = vld [vmem:[%s7569_s1 + $0x168] sm:$0xff]  }
  0x2c   : > { %5608 = vmatmul.mubr.bf16.vlgmr.msra.gmra.mxu0 %v6091_v18  ;;  %v754_v18 = vrot.slane %v753_v12, 4 }
  0x2d   : > { %5632 = vmatmul.mubr.bf16.vlgmr.msra.gmra.mxu1 %v6092_v21  ;;  %5640 = vmatpush3.bf16.msra.mxu0 %v6093_v19  ;;  %v693_v19 = vld [vmem:[%s6373_s20 + $0x20] sm:$0xf] }
  0x2e   : > { %5664 = vmatpush3.bf16.msra.mxu1 %v6094_v20  ;;  %5641 = vmatprep.subr.bf16.mxu0 %v6095_v22  ;;  %v694_v20 = vld [vmem:[%s6373_s20 + $0x24] sm:$0x1] }
  0x2f   : > { %5665 = vmatprep.subr.bf16.mxu1 %v6096_v23  ;;  %5611 = vmatprep.mubr.bf16.mxu0 %v6102_v24  ;;  %v6111_v21 = vld [vmem:[%s7569_s1 + $0x80] sm:$0xff]   ;;  %v696_v24 = vld [vmem:[%s6373_s20 + $0x2c] sm:$0x1] }
  0x30   : > { %5635 = vmatprep.mubr.bf16.mxu1 %v6103_v25  ;;  %v761_v25 = vshrl.u32 %v693_v19, 16  ;;  %v784_v35 = vshll.u32 %v696_v24, 16  ;;  %v4901_v24 = vld [vmem:[%s6373_s20 + $0x9c] sm:$0x1] }
  0x31   : > { %5642 = vmatpush3.bf16.msra.mxu0 %v6095_v22  ;;  %v745_v22 = vsel %vm6441_vm2, %v740_v14, %v6457_v11 }
  0x32   : > { %5666 = vmatpush3.bf16.msra.mxu1 %v6096_v23  ;;  %5643 = vmatprep.subr.bf16.mxu0 %v6097_v26  ;;  %v695_v23 = vld [vmem:[%s6373_s20 + $0x28] sm:$0xf]  ;;  %v763_v33 = vrot.slane %v761_v25, 4  ;;  %v786_v44 = vrot.slane %v784_v35, 5  ;;  %v4903_v35 = vld [vmem:[%s6373_s20 + $0xa4] sm:$0x1] }
  0x33   : > { %5667 = vmatprep.subr.bf16.mxu1 %v6098_v27 }
  0x34   : > { %5612 = vmatmul.mubr.bf16.gmra.mxu0 %v6105_v29  ;;  %v770_v29 = vshll.u32 %v694_v20, 16  ;;  %v6126_v20 = vld [vmem:[%s7569_s1 + $0x158] sm:$0xff]  }
  0x35   : > { %5644 = vmatpush3.bf16.msra.mxu0 %v6097_v26  ;;  %5636 = vmatmul.mubr.bf16.gmra.mxu1 %v6106_v31  ;;  %v764_v26 = vshll.u32 %v693_v19, 16  ;;  %v778_v31 = vshll.u32 %v695_v23, 16  ;;  %v6125_v19 = vld [vmem:[%s7569_s1 + $0x118] sm:$0xff]  }
  0x36   : > { %5668 = vmatpush3.bf16.msra.mxu1 %v6098_v27  ;;  %5645 = vmatprep.subr.bf16.mxu0 %v6099_v28  ;;  %v6112_v27 = vld [vmem:[%s7569_s1 + $0xc0] sm:$0xff]   ;;  %v772_v38 = vrot.slane %v770_v29, 5 }
  0x37   : > { %5669 = vmatprep.subr.bf16.mxu1 %v6100_v30  ;;  %5679 = vmatprep.mubr.bf16.mxu1 %v6114_v8  ;;  %v766_v34 = vrot.slane %v764_v26, 5  ;;  %v780_v40 = vrot.slane %v778_v31, 5  ;;  %v1352_v31 = vshll.u32 %v4901_v24, 16 }
  0x38   : > { %5655 = vmatprep.mubr.bf16.mxu0 %v4814_v17  ;;  %v6124_v17 = vld [vmem:[%s7569_s1 + $0x160] sm:$0xff]  }
  0x39   : > { %5646 = vmatpush3.bf16.msra.mxu0 %v6099_v28  ;;  %v759_v28 = vsel %vm6441_vm2, %v754_v18, %v758_v15  ;;  %v767_v43 = vor.u32 %v766_v34, %v763_v33  ;;  %v6121_v15 = vld [vmem:[%s6373_s20 + $0xc0] ss:$8 sps:$4 sm:$0xff]  }
  0x3a   : > { %5670 = vmatpush3.bf16.msra.mxu1 %v6100_v30  ;;  %5647 = vmatprep.subr.bf16.mxu0 %v6101_v36  ;;  %v775_v30 = vshrl.u32 %v695_v23, 16  ;;  %v4815_v61 = vcombine.low %v745_v22, %v759_v28  ;;  %v6133_v18 = vld [vmem:[%s6373_s20 + $0xd8] ss:$8 sps:$4 sm:$0xff]   ;;  %v4899_v22 = vld [vmem:[%s6373_s20 + $0x94] sm:$0x1] }
  0x3b   : > { %5671 = vmatprep.subr.bf16.mxu1 %v6104_v42  ;;  %v768_v53 = vrot.slane %v767_v43, 4  ;;  %v4900_v23 = vld [vmem:[%s6373_s20 + $0x98] sm:$0xf]  ;;  %v1338_v28 = vshll.u32 %v4899_v22, 16  ;;  %v6134_v22 = vld [vmem:[%s6373_s20 + $0xe8] ss:$8 sps:$4 sm:$0xff]  }
  0x3c   : > { %v777_v39 = vrot.slane %v775_v30, 4  ;;  %v1343_v29 = vshrl.u32 %v4900_v23, 16  ;;  %v1346_v30 = vshll.u32 %v4900_v23, 16 }
  0x3d   : > { %5648 = vmatpush3.bf16.msra.mxu0 %v6101_v36  ;;  %v698_v36 = vld [vmem:[%s6373_s20 + $0x34] sm:$0x1]  ;;  %v773_v0 = vsel %vm6441_vm2, %v768_v53, %v772_v38  ;;  %v1340_v37 = vrot.slane %v1338_v28, 5 }
  0x3e   : > { %5672 = vmatpush3.bf16.msra.mxu1 %v6104_v42  ;;  %5649 = vmatprep.subr.bf16.mxu0 %v6107_v1  ;;  %v792_v42 = vshll.u32 %v697_v32, 16  ;;  %v798_v47 = vshll.u32 %v698_v36, 16  ;;  %v781_v48 = vor.u32 %v780_v40, %v777_v39  ;;  %v4902_v32 = vld [vmem:[%s6373_s20 + $0xa0] sm:$0xf]  ;;  %v4904_v36 = vld [vmem:[%s6373_s20 + $0xa8] sm:$0xf] }
  0x3f   : > { %5673 = vmatprep.subr.bf16.mxu1 %v6108_v5  ;;  %v1345_v38 = vrot.slane %v1343_v29, 4  ;;  %v1348_v39 = vrot.slane %v1346_v30, 5  ;;  %v1354_v40 = vrot.slane %v1352_v31, 5  ;;  %v1360_v45 = vshll.u32 %v4902_v32, 16  ;;  %v4912_v31 = vld [vmem:[%s6373_s20 + $0xc8] sm:$0xf] }
  0x40   : > { %v794_v49 = vrot.slane %v792_v42, 5  ;;  %v782_v56 = vrot.slane %v781_v48, 4  ;;  %v6128_v42 = vld [vmem:[%s7569_s1 + $0x150] sm:$0xff]   ;;  %v1371_v48 = vshrl.u32 %v4904_v36, 16  ;;  %v1427_v41 = vshrl.u32 %v4912_v31, 16 }
  0x41   : > { %5650 = vmatpush3.bf16.msra.mxu0 %v6107_v1  ;;  %v800_v1 = vrot.slane %v798_v47, 5  ;;  %v1349_v47 = vor.u32 %v1348_v39, %v1345_v38  ;;  %v1362_v53 = vrot.slane %v1360_v45, 5  ;;  %v6139_v38 = vld [vmem:[%s6373_s20 + $0xf8] ss:$8 sps:$4 sm:$0xff]  }
  0x42   : > { %5674 = vmatpush3.bf16.msra.mxu1 %v6108_v5  ;;  %5651 = vmatprep.subr.bf16.mxu0 %v6109_v9  ;;  %v795_v57 = vor.u32 %v794_v49, %v791_v46  ;;  %v787_v2 = vsel %vm6441_vm2, %v782_v56, %v786_v44  ;;  %v814_v5 = vrot.slane %v812_v54, 5  ;;  %v1357_v44 = vshrl.u32 %v4902_v32, 16  ;;  %v6129_v54 = vld [vmem:[%s7569_s1 + $0x108] sm:$0xff]  }
  0x43   : > { %5675 = vmatprep.subr.bf16.mxu1 %v6110_v16  ;;  %v4816_v8 = vcombine.low %v773_v0, %v787_v2  ;;  %v1366_v46 = vshll.u32 %v4903_v35, 16  ;;  %v1374_v49 = vshll.u32 %v4904_v36, 16  ;;  %v1373_v56 = vrot.slane %v1371_v48, 4  ;;  %v4913_v35 = vld [vmem:[%s6373_s20 + $0xcc] sm:$0x1] }
  0x44   : > { %v796_v3 = vrot.slane %v795_v57, 4 }
  0x45   : > { %5652 = vmatpush3.bf16.msra.mxu0 %v6109_v9  ;;  %v810_v9 = vrot.slane %v809_v4, 4  ;;  %v1376_v57 = vrot.slane %v1374_v49, 5  ;;  %v6131_v4 = vld [vmem:[%s7569_s1 + $0x100] sm:$0xff]  }
  0x46   : > { %5676 = vmatpush3.bf16.msra.mxu1 %v6110_v16  ;;  %5653 = vmatprep.subr.bf16.mxu0 %v6111_v21  ;;  %v801_v11 = vsel %vm6441_vm2, %v796_v3, %v800_v1  ;;  %v6123_v16 = vld [vmem:[%s7569_s1 + $0x120] sm:$0xff]   ;;  %v1382_v1 = vrot.slane %v1380_v50, 5  ;;  %v1429_v50 = vrot.slane %v1427_v41, 4 }
  0x47   : > { %5677 = vmatprep.subr.bf16.mxu1 %v6112_v27  ;;  %v815_v12 = vsel %vm6441_vm2, %v810_v9, %v814_v5  ;;  %v1377_v0 = vor.u32 %v1376_v57, %v1373_v56  ;;  %v6132_v5 = vld [vmem:[%s7569_s1 + $0x140] sm:$0xff]   ;;  %v4907_v9 = vld [vmem:[%s6373_s20 + $0xb4] sm:$0x1] }
  0x48   : > { %v4817_v14 = vcombine.low %v801_v11, %v815_v12  ;;  %v4908_v12 = vld [vmem:[%s6373_s20 + $0xb8] sm:$0xf] }
  0x49   : > { %5654 = vmatpush3.bf16.msra.mxu0 %v6111_v21  ;;  %v4898_v21 = vld [vmem:[%s6373_s20 + $0x90] sm:$0xf] }
  0x4a   : > { %5678 = vmatpush3.bf16.msra.mxu1 %v6112_v27  ;;  %5687 = vmatprep.subr.bf16.mxu0 %v6113_v52  ;;  %v1329_v25 = vshrl.u32 %v4898_v21, 16  ;;  %v1332_v26 = vshll.u32 %v4898_v21, 16  ;;  %v6127_v27 = vld [vmem:[%s7569_s1 + $0x110] sm:$0xff]   ;;  %v4910_v21 = vld [vmem:[%s6373_s20 + $0xc0] sm:$0xf] }
  0x4b   : > { %5711 = vmatprep.subr.bf16.mxu1 %v6116_v55  ;;  %v1416_v32 = vshll.u32 %v4910_v21, 16 }
  0x4c   : > { %5656 = vmatmul.mubr.bf16.vlgmr.msra.gmra.mxu0 %v4815_v61  ;;  %v1331_v33 = vrot.slane %v1329_v25, 4  ;;  %v1334_v34 = vrot.slane %v1332_v26, 5  ;;  %v4911_v26 = vld [vmem:[%s6373_s20 + $0xc4] sm:$0x1] }
  0x4d   : > { %5688 = vmatpush3.bf16.msra.mxu0 %v6113_v52  ;;  %5680 = vmatmul.mubr.bf16.vlgmr.msra.gmra.mxu1 %v6115_v62  ;;  %v1359_v52 = vrot.slane %v1357_v44, 4  ;;  %v1368_v62 = vrot.slane %v1366_v46, 5  ;;  %v1436_v46 = vshll.u32 %v4913_v35, 16 }
  0x4e   : > { %5712 = vmatpush3.bf16.msra.mxu1 %v6116_v55  ;;  %5689 = vmatprep.subr.bf16.mxu0 %v6117_v63  ;;  %v1335_v43 = vor.u32 %v1334_v34, %v1331_v33  ;;  %v1350_v55 = vrot.slane %v1349_v47, 4  ;;  %v6138_v47 = vld [vmem:[%s7569_s1 + $0x1f0] sm:$0xff]  }
  0x4f   : > { %5713 = vmatprep.subr.bf16.mxu1 %v6118_v7  ;;  %5659 = vmatprep.mubr.bf16.mxu0 %v4816_v8  ;;  %v1363_v61 = vor.u32 %v1362_v53, %v1359_v52  ;;  %v4906_v8 = vld [vmem:[%s6373_s20 + $0xb0] sm:$0xf]  ;;  %v6141_v52 = vld [vmem:[%s7569_s1 + $0x1a8] sm:$0xff]   ;;  %v1438_v57 = vrot.slane %v1436_v46, 5 }
  0x50   : > { %5683 = vmatprep.mubr.bf16.mxu1 %v6120_v6  ;;  %v1336_v51 = vrot.slane %v1335_v43, 4  ;;  %v1378_v6 = vrot.slane %v1377_v0, 4  ;;  %v6137_v43 = vld [vmem:[%s7569_s1 + $0x1b0] sm:$0xff]  }
  0x51   : > { %5690 = vmatpush3.bf16.msra.mxu0 %v6117_v63  ;;  %v1355_v63 = vsel %vm6441_vm2, %v1350_v55, %v1354_v40  ;;  %v1364_v3 = vrot.slane %v1363_v61, 4  ;;  %v1418_v40 = vrot.slane %v1416_v32, 5  ;;  %v5020_v32 = vld [vmem:[%s6373_s20 + $0x20] sm:$0xf] }
  0x52   : > { %5714 = vmatpush3.bf16.msra.mxu1 %v6118_v7  ;;  %5691 = vmatprep.subr.bf16.mxu0 %v6119_v10  ;;  %v1341_v59 = vsel %vm6441_vm2, %v1336_v51, %v1340_v37  ;;  %v1383_v11 = vsel %vm6441_vm2, %v1378_v6, %v1382_v1  ;;  %v1422_v37 = vshll.u32 %v4911_v26, 16  ;;  %v6146_v6 = vld [vmem:[%s7569_s1 + $0x1d8] sm:$0xff]   ;;  %v1995_v41 = vshrl.u32 %v5020_v32, 16 }
  0x53   : > { %5715 = vmatprep.subr.bf16.mxu1 %v6122_v13  ;;  %v4930_v2 = vcombine.low %v1341_v59, %v1355_v63  ;;  %v1369_v7 = vsel %vm6441_vm2, %v1364_v3, %v1368_v62  ;;  %v6142_v63 = vld [vmem:[%s7569_s1 + $0x1e8] sm:$0xff]   ;;  %v6144_v3 = vld [vmem:[%s7569_s1 + $0x1e0] sm:$0xff]   ;;  %v5019_v26 = vld [vmem:[%s6373_s20 + $0x1c] sm:$0x1] }
  0x54   : > { %5660 = vmatmul.mubr.bf16.gmra.mxu0 %v4817_v14  ;;  %v1385_v14 = vshrl.u32 %v4906_v8, 16  ;;  %v1424_v45 = vrot.slane %v1422_v37, 5 }
  0x55   : > { %5692 = vmatpush3.bf16.msra.mxu0 %v6119_v10  ;;  %5684 = vmatmul.mubr.bf16.gmra.mxu1 %v6121_v15  ;;  %v6135_v10 = vld [vmem:[%s7569_s1 + $0x1b8] sm:$0xff]   ;;  %v1388_v15 = vshll.u32 %v4906_v8, 16  ;;  %v6147_v8 = vld [vmem:[%s7569_s1 + $0x190] sm:$0xff]  }
  0x56   : > { %5716 = vmatpush3.bf16.msra.mxu1 %v6122_v13  ;;  %5693 = vmatprep.subr.bf16.mxu0 %v6123_v16  ;;  %v4909_v13 = vld [vmem:[%s6373_s20 + $0xbc] sm:$0x1]  ;;  %v1387_v23 = vrot.slane %v1385_v14, 4  ;;  %v5014_v14 = vld [vmem:[%s6373_s20 + $0x8] sm:$0xf] }
  0x57   : > { %5717 = vmatprep.subr.bf16.mxu1 %v6124_v17  ;;  %5703 = vmatprep.mubr.bf16.mxu0 %v6133_v18  ;;  %v1394_v18 = vshll.u32 %v4907_v9, 16  ;;  %v1390_v24 = vrot.slane %v1388_v15, 5  ;;  %v1408_v25 = vshll.u32 %v4909_v13, 16  ;;  %v6148_v9 = vld [vmem:[%s7569_s1 + $0x1d0] sm:$0xff]   ;;  %v6152_v13 = vld [vmem:[%s7569_s1 + $0x1c0] sm:$0xff]  }
  0x58   : > { %5727 = vmatprep.mubr.bf16.mxu1 %v4930_v2  ;;  %v6143_v2 = vld [vmem:[%s7569_s1 + $0x1a0] sm:$0xff]   ;;  %v5015_v15 = vld [vmem:[%s6373_s20 + $0xc] sm:$0x1] }
  0x59   : > { %5694 = vmatpush3.bf16.msra.mxu0 %v6123_v16  ;;  %v4931_v16 = vcombine.low %v1369_v7, %v1383_v11  ;;  %v1396_v28 = vrot.slane %v1394_v18, 5  ;;  %v1391_v33 = vor.u32 %v1390_v24, %v1387_v23  ;;  %v1410_v34 = vrot.slane %v1408_v25, 5  ;;  %v6156_v7 = vld [vmem:[%s6373_s20 + $0x50] ss:$8 sps:$4 sm:$0xff]   ;;  %v6150_v11 = vld [vmem:[%s7569_s1 + $0x1c8] sm:$0xff]  }
  0x5a   : > { %5718 = vmatpush3.bf16.msra.mxu1 %v6124_v17  ;;  %5695 = vmatprep.subr.bf16.mxu0 %v6125_v19  ;;  %v6136_v17 = vld [vmem:[%s7569_s1 + $0x1f8] sm:$0xff]   ;;  %v1953_v18 = vshrl.u32 %v5014_v14, 16 }
  0x5b   : > { %5719 = vmatprep.subr.bf16.mxu1 %v6126_v20  ;;  %v1392_v44 = vrot.slane %v1391_v33, 4  ;;  %v6155_v23 = vld [vmem:[%s7569_s1 + $0x238] sm:$0xff]   ;;  %v6159_v33 = vld [vmem:[%s6373_s20 + $0x28] ss:$8 sps:$4 sm:$0xff]  }
  0x5c   : > { %v5018_v25 = vld [vmem:[%s6373_s20 + $0x18] sm:$0xf] }
  0x5d   : > { %5696 = vmatpush3.bf16.msra.mxu0 %v6125_v19  ;;  %v1399_v19 = vshrl.u32 %v4908_v12, 16  ;;  %v1397_v53 = vsel %vm6441_vm2, %v1392_v44, %v1396_v28  ;;  %v1955_v28 = vrot.slane %v1953_v18, 4  ;;  %v1981_v37 = vshrl.u32 %v5018_v25, 16  ;;  %v6158_v44 = vld [vmem:[%s7569_s1 + $0x230] sm:$0xff]  }
  0x5e   : > { %5720 = vmatpush3.bf16.msra.mxu1 %v6126_v20  ;;  %5697 = vmatprep.subr.bf16.mxu0 %v6127_v27  ;;  %v1402_v20 = vshll.u32 %v4908_v12, 16  ;;  %v6151_v12 = vld [vmem:[%s7569_s1 + $0x180] sm:$0xff]  }
  0x5f   : > { %5721 = vmatprep.subr.bf16.mxu1 %v6128_v42  ;;  %v1401_v29 = vrot.slane %v1399_v19, 4  ;;  %v1956_v19 = vshll.u32 %v5014_v14, 16 }
  0x60   : > { %v1404_v30 = vrot.slane %v1402_v20, 5  ;;  %v1962_v20 = vshll.u32 %v5015_v15, 16 }
  0x61   : > { %5698 = vmatpush3.bf16.msra.mxu0 %v6127_v27  ;;  %v1413_v27 = vshrl.u32 %v4910_v21, 16 }
  0x62   : > { %5722 = vmatpush3.bf16.msra.mxu1 %v6128_v42  ;;  %5699 = vmatprep.subr.bf16.mxu0 %v6129_v54  ;;  %v1405_v39 = vor.u32 %v1404_v30, %v1401_v29  ;;  %v1430_v42 = vshll.u32 %v4912_v31, 16  ;;  %v1958_v29 = vrot.slane %v1956_v19, 5 }
  0x63   : > { %5723 = vmatprep.subr.bf16.mxu1 %v6130_v58  ;;  %v1415_v36 = vrot.slane %v1413_v27, 4  ;;  %v6157_v27 = vld [vmem:[%s6373_s20 + $0x60] ss:$8 sps:$4 sm:$0xff]  }
  0x64   : > { %v1406_v48 = vrot.slane %v1405_v39, 4  ;;  %v1432_v51 = vrot.slane %v1430_v42, 5  ;;  %v1959_v39 = vor.u32 %v1958_v29, %v1955_v28  ;;  %v1998_v42 = vshll.u32 %v5020_v32, 16 }
  0x65   : > { %5700 = vmatpush3.bf16.msra.mxu0 %v6129_v54  ;;  %v1419_v49 = vor.u32 %v1418_v40, %v1415_v36  ;;  %v5021_v36 = vld [vmem:[%s6373_s20 + $0x24] sm:$0x1]  ;;  %v1990_v40 = vshll.u32 %v5019_v26, 16 }
  0x66   : > { %5724 = vmatpush3.bf16.msra.mxu1 %v6130_v58  ;;  %5701 = vmatprep.subr.bf16.mxu0 %v6131_v4  ;;  %v1411_v54 = vsel %vm6441_vm2, %v1406_v48, %v1410_v34  ;;  %v1433_v56 = vor.u32 %v1432_v51, %v1429_v50  ;;  %v6140_v58 = vld [vmem:[%s6373_s20 + $0x108] ss:$8 sps:$4 sm:$0xff]   ;;  %v1964_v34 = vrot.slane %v1962_v20, 5  ;;  %v1960_v50 = vrot.slane %v1959_v39, 4  ;;  %v6164_v20 = vld [vmem:[%s7569_s1 + $0x220] sm:$0xff]  }
  0x67   : > { %5725 = vmatprep.subr.bf16.mxu1 %v6132_v5  ;;  %v1420_v55 = vrot.slane %v1419_v49, 4  ;;  %v4932_v59 = vcombine.low %v1397_v53, %v1411_v54  ;;  %v2004_v49 = vshll.u32 %v5021_v36, 16  ;;  %v2000_v53 = vrot.slane %v1998_v42, 5  ;;  %v5024_v54 = vld [vmem:[%s6373_s20 + $0x30] sm:$0xf] }
  0x68   : > { %v1434_v62 = vrot.slane %v1433_v56, 4  ;;  %v6166_v42 = vld [vmem:[%s7569_s1 + $0x210] sm:$0xff]  }
  0x69   : > { %5702 = vmatpush3.bf16.msra.mxu0 %v6131_v4  ;;  %v1425_v61 = vsel %vm6441_vm2, %v1420_v55, %v1424_v45  ;;  %v6153_v4 = vld [vmem:[%s6373_s20 + $0x8] ss:$8 sps:$4 sm:$0xff]  }
  0x6a   : > { %5726 = vmatpush3.bf16.msra.mxu1 %v6132_v5  ;;  %5735 = vmatprep.subr.bf16.mxu0 %v6135_v10  ;;  %v1439_v0 = vsel %vm6441_vm2, %v1434_v62, %v1438_v57  ;;  %v6145_v5 = vld [vmem:[%s7569_s1 + $0x198] sm:$0xff]   ;;  %v5023_v57 = vld [vmem:[%s6373_s20 + $0x2c] sm:$0x1]  ;;  %v6654_v62 = vrot.slane %v2004_v49, 5 }
  0x6b   : > { %5759 = vmatprep.subr.bf16.mxu1 %v6136_v17  ;;  %v4933_v1 = vcombine.low %v1425_v61, %v1439_v0  ;;  %v6162_v45 = vld [vmem:[%s6373_s20 + $0x70] ss:$8 sps:$4 sm:$0xff]   ;;  %v6652_v61 = vrot.slane %v1990_v40, 5 }
  0x6c   : > { %5704 = vmatmul.mubr.bf16.vlgmr.msra.gmra.mxu0 %v6134_v22  ;;  %v6154_v22 = vld [vmem:[%s6373_s20 + $0x18] ss:$8 sps:$4 sm:$0xff]  }
  0x6d   : > { %5736 = vmatpush3.bf16.msra.mxu0 %v6135_v10  ;;  %5728 = vmatmul.mubr.bf16.vlgmr.msra.gmra.mxu1 %v4931_v16  ;;  %v6149_v10 = vld [vmem:[%s7569_s1 + $0x188] sm:$0xff]   ;;  %v5016_v16 = vld [vmem:[%s6373_s20 + $0x10] sm:$0xf] }
  0x6e   : > { %5760 = vmatpush3.bf16.msra.mxu1 %v6136_v17  ;;  %5737 = vmatprep.subr.bf16.mxu0 %v6137_v43  ;;  %v5017_v17 = vld [vmem:[%s6373_s20 + $0x14] sm:$0x1]  ;;  %v1967_v21 = vshrl.u32 %v5016_v16, 16  ;;  %v1970_v24 = vshll.u32 %v5016_v16, 16  ;;  %v2026_v16 = vshll.u32 %v5024_v54, 16 }
  0x6f   : > { %5761 = vmatprep.subr.bf16.mxu1 %v6138_v47  ;;  %5707 = vmatprep.mubr.bf16.mxu0 %v6139_v38  ;;  %v1976_v31 = vshll.u32 %v5017_v17, 16  ;;  %v1984_v38 = vshll.u32 %v5018_v25, 16 }
  0x70   : > { %5731 = vmatprep.mubr.bf16.mxu1 %v4932_v59  ;;  %v1969_v30 = vrot.slane %v1967_v21, 4  ;;  %v1972_v35 = vrot.slane %v1970_v24, 5  ;;  %v6161_v59 = vld [vmem:[%s7569_s1 + $0x228] sm:$0xff]  }
  0x71   : > { %5738 = vmatpush3.bf16.msra.mxu0 %v6137_v43  ;;  %v5022_v43 = vld [vmem:[%s6373_s20 + $0x28] sm:$0xf]  ;;  %v1986_v48 = vrot.slane %v1984_v38, 5  ;;  %v1978_v51 = vrot.slane %v1976_v31, 5 }
  0x72   : > { %5762 = vmatpush3.bf16.msra.mxu1 %v6138_v47  ;;  %5739 = vmatprep.subr.bf16.mxu0 %v6141_v52  ;;  %v1973_v46 = vor.u32 %v1972_v35, %v1969_v30  ;;  %v1983_v47 = vrot.slane %v1981_v37, 4  ;;  %v2012_v0 = vshll.u32 %v5022_v43, 16  ;;  %v6165_v35 = vld [vmem:[%s7569_s1 + $0x218] sm:$0xff]  }
  0x73   : > { %5763 = vmatprep.subr.bf16.mxu1 %v6142_v63 }
  0x74   : > { %5708 = vmatmul.mubr.bf16.gmra.mxu0 %v6140_v58  ;;  %v1974_v55 = vrot.slane %v1973_v46, 4  ;;  %v1987_v56 = vor.u32 %v1986_v48, %v1983_v47  ;;  %v2009_v58 = vshrl.u32 %v5022_v43, 16  ;;  %v6167_v46 = vld [vmem:[%s7569_s1 + $0x208] sm:$0xff]   ;;  %v6168_v47 = vld [vmem:[%s7569_s1 + $0x200] sm:$0xff]  }
  0x75   : > { %5740 = vmatpush3.bf16.msra.mxu0 %v6141_v52  ;;  %5732 = vmatmul.mubr.bf16.gmra.mxu1 %v4933_v1  ;;  %v1997_v52 = vrot.slane %v1995_v41, 4  ;;  %v6160_v1 = vld [vmem:[%s6373_s20 + $0x38] ss:$8 sps:$4 sm:$0xff]  }
  0x76   : > { %5764 = vmatpush3.bf16.msra.mxu1 %v6142_v63  ;;  %5741 = vmatprep.subr.bf16.mxu0 %v6143_v2  ;;  %v5025_v63 = vld [vmem:[%s6373_s20 + $0x34] sm:$0x1]  ;;  %v1988_v14 = vrot.slane %v1987_v56, 4 }
  0x77   : > { %5765 = vmatprep.subr.bf16.mxu1 %v6144_v3  ;;  %5751 = vmatprep.mubr.bf16.mxu0 %v6153_v4  ;;  %v2023_v4 = vshrl.u32 %v5024_v54, 16  ;;  %v2032_v17 = vshll.u32 %v5025_v63, 16 }
  0x78   : > { %5775 = vmatprep.mubr.bf16.mxu1 %v6156_v7  ;;  %v6163_v7 = vld [vmem:[%s6373_s20 + $0x80] ss:$8 sps:$4 sm:$0xff]   ;;  %v1993_v48 = vsel %vm6441_vm2, %v1988_v14, %v6652_v61  ;;  %v7588_v61 = vmov 0  ;;  %v2268_v14 = vld [vmem:[#allocation2 + $0x10] sm:$0x1] }
  0x79   : > { %5742 = vmatpush3.bf16.msra.mxu0 %v6143_v2  ;;  %v1965_v2 = vsel %vm6441_vm2, %v1960_v50, %v1964_v34  ;;  %v2025_v15 = vrot.slane %v2023_v4, 4  ;;  %v7589_v61 = vsel %vm6702_vm5, 4294967295, %v7588_v61  ;;  %v2265_v4 = vld [vmem:[#allocation2 + $0x8] sm:$0x1] }
  0x7a   : > { %5766 = vmatpush3.bf16.msra.mxu1 %v6144_v3  ;;  %5743 = vmatprep.subr.bf16.mxu0 %v6145_v5  ;;  %v2011_v3 = vrot.slane %v2009_v58, 4  ;;  %v6170_v58 = vld [vmem:[%s7572_s4 + $0x30] sm:$0xff]   ;;  %7590 = vst [vmem:[#allocation4_spill] sm:$0xff] %v7589_v61 }
  0x7b   : > { %5767 = vmatprep.subr.bf16.mxu1 %v6146_v6 }
  0x7d   : > { %5744 = vmatpush3.bf16.msra.mxu0 %v6145_v5  ;;  %v5026_v5 = vld [vmem:[%s6373_s20 + $0x38] sm:$0xf] }
  0x7e   : > { %5768 = vmatpush3.bf16.msra.mxu1 %v6146_v6  ;;  %5745 = vmatprep.subr.bf16.mxu0 %v6147_v8  ;;  %v5027_v6 = vld [vmem:[%s6373_s20 + $0x3c] sm:$0x1]  ;;  %v2037_v18 = vshrl.u32 %v5026_v5, 16  ;;  %v2040_v19 = vshll.u32 %v5026_v5, 16  ;;  %v2291_v5 = vld [vmem:[#allocation2 + $0xc] sm:$0x1] }
  0x7f   : > { %5769 = vmatprep.subr.bf16.mxu1 %v6148_v9  ;;  %v2046_v24 = vshll.u32 %v5027_v6, 16  ;;  %v6172_v6 = vld [vmem:[%s7572_s4 + $0x78] sm:$0xff]  }
  0x80   : > { %v2039_v26 = vrot.slane %v2037_v18, 4  ;;  %v2283_v18 = vld [vmem:[#allocation2 + $0x38] sm:$0x1] }
  0x81   : > { %5746 = vmatpush3.bf16.msra.mxu0 %v6147_v8  ;;  %v1979_v8 = vsel %vm6441_vm2, %v1974_v55, %v1978_v51  ;;  %v2048_v38 = vrot.slane %v2046_v24, 5  ;;  %v2277_v24 = vld [vmem:[#allocation2 + $0x28] sm:$0x1] }
  0x82   : > { %5770 = vmatpush3.bf16.msra.mxu1 %v6148_v9  ;;  %5747 = vmatprep.subr.bf16.mxu0 %v6149_v10  ;;  %v2001_v9 = vor.u32 %v2000_v53, %v1997_v52  ;;  %v5046_v21 = vcombine.low %v1965_v2, %v1979_v8  ;;  %v2292_v8 = vsel %vm6709_vm7, 0, %v2291_v5 }
  0x83   : > { %5771 = vmatprep.subr.bf16.mxu1 %v6150_v11  ;;  %2293 = vst [vmem:[#allocation2 + $0xc] sm:$0x1] %v2292_v8 }
  0x84   : > { %v2002_v25 = vrot.slane %v2001_v9, 4  ;;  %v2274_v9 = vld [vmem:[#allocation2 + $0x20] sm:$0x1] }
  0x85   : > { %5748 = vmatpush3.bf16.msra.mxu0 %v6149_v10  ;;  %v2014_v10 = vrot.slane %v2012_v0, 5 }
  0x86   : > { %5772 = vmatpush3.bf16.msra.mxu1 %v6150_v11  ;;  %5749 = vmatprep.subr.bf16.mxu0 %v6151_v12  ;;  %v2018_v11 = vshll.u32 %v5023_v57, 16  ;;  %v2007_v49 = vsel %vm6441_vm2, %v2002_v25, %v6654_v62  ;;  %v6169_v57 = vld [vmem:[%s7572_s4 + $0x38] sm:$0xff]  }
  0x87   : > { %5773 = vmatprep.subr.bf16.mxu1 %v6152_v13  ;;  %v5047_v52 = vcombine.low %v1993_v48, %v2007_v49  ;;  %v2297_v62 = vld [vmem:[#allocation2 + $0x1c] sm:$0x1]  ;;  %v6179_v48 = vld [vmem:[%s7572_s4 + $0x8] sm:$0xff]  }
  0x88   : > { %v2020_v29 = vrot.slane %v2018_v11, 5  ;;  %v2275_v11 = vsel %vm6702_vm5, 0, %v2274_v9  ;;  %v6180_v49 = vld [vmem:[%s7572_s4 + $0x58] sm:$0xff]  }
  0x89   : > { %5750 = vmatpush3.bf16.msra.mxu0 %v6151_v12  ;;  %v5028_v12 = vld [vmem:[%s6373_s20 + $0x40] sm:$0xf]  ;;  %2276 = vst [vmem:[#allocation2 + $0x20] sm:$0x1] %v2275_v11 }
  0x8a   : > { %5774 = vmatpush3.bf16.msra.mxu1 %v6152_v13  ;;  %5783 = vmatprep.subr.bf16.mxu0 %v6155_v23  ;;  %v5029_v13 = vld [vmem:[%s6373_s20 + $0x44] sm:$0x1]  ;;  %v2051_v28 = vshrl.u32 %v5028_v12, 16  ;;  %v2054_v31 = vshll.u32 %v5028_v12, 16 }
  0x8b   : > { %v2060_v32 = vshll.u32 %v5029_v13, 16  ;;  %5807 = vmatprep.subr.bf16.mxu1 %v6172_v6 }
  0x8c   : > { %5752 = vmatmul.mubr.bf16.vlgmr.msra.gmra.mxu0 %v6154_v22  ;;  %v2015_v22 = vor.u32 %v2014_v10, %v2011_v3  ;;  %v2053_v34 = vrot.slane %v2051_v28, 4  ;;  %v2056_v39 = vrot.slane %v2054_v31, 5  ;;  %v2298_v3 = vsel %vm6709_vm7, 0, %v2297_v62  ;;  %v2300_v10 = vld [vmem:[#allocation2 + $0x24] sm:$0x1]  ;;  %v6174_v28 = vld [vmem:[%s7572_s4 + $0x70] sm:$0xff]  }
  0x8d   : > { %5784 = vmatpush3.bf16.msra.mxu0 %v6155_v23  ;;  %5776 = vmatmul.mubr.bf16.vlgmr.msra.gmra.mxu1 %v6157_v27  ;;  %v2028_v23 = vrot.slane %v2026_v16, 5  ;;  %v2042_v27 = vrot.slane %v2040_v19, 5  ;;  %v2062_v41 = vrot.slane %v2060_v32, 5  ;;  %2299 = vst [vmem:[#allocation2 + $0x1c] sm:$0x1] %v2298_v3  ;;  %v2301_v12 = vsel %vm6709_vm7, 0, %v2300_v10 }
  0x8e   : > { %5785 = vmatprep.subr.bf16.mxu0 %v6158_v44  ;;  %5755 = vmatprep.mubr.bf16.mxu0 %v6159_v33  ;;  %v2034_v33 = vrot.slane %v2032_v17, 5  ;;  %v2016_v36 = vrot.slane %v2015_v22, 4  ;;  %v2057_v43 = vor.u32 %v2056_v39, %v2053_v34  ;;  %2302 = vst [vmem:[#allocation2 + $0x24] sm:$0x1] %v2301_v12  ;;  %v2269_v16 = vsel %vm6702_vm5, 0, %v2268_v14  ;;  %v6173_v22 = vld [vmem:[%s7572_s4 + $0x20] sm:$0xff]  }
  0x8f   : > { %5779 = vmatprep.mubr.bf16.mxu1 %v6162_v45  ;;  %v2029_v30 = vor.u32 %v2028_v23, %v2025_v15  ;;  %v2043_v37 = vor.u32 %v2042_v27, %v2039_v26  ;;  %5808 = vmatpush3.bf16.msra.mxu1 %v6172_v6  ;;  %v2294_v15 = vld [vmem:[#allocation2 + $0x14] sm:$0x1]  ;;  %2270 = vst [vmem:[#allocation2 + $0x10] sm:$0x1] %v2269_v16  ;;  %v2309_v19 = vld [vmem:[#allocation2 + $0x3c] sm:$0x1] }
  0x90   : > { %v2058_v45 = vrot.slane %v2057_v43, 4  ;;  %v2021_v50 = vsel %vm6441_vm2, %v2016_v36, %v2020_v29  ;;  %v2295_v17 = vsel %vm6709_vm7, 0, %v2294_v15  ;;  %v2278_v26 = vsel %vm6702_vm5, 0, %v2277_v24  ;;  %v2303_v27 = vld [vmem:[#allocation2 + $0x2c] sm:$0x1]  ;;  %5809 = vmatprep.subr.bf16.mxu1 %v6174_v28  ;;  %v6175_v31 = vld [vmem:[%s7572_s4 + $0x18] sm:$0xff]  }
  0x91   : > { %5786 = vmatpush3.bf16.msra.mxu0 %v6158_v44  ;;  %v2030_v40 = vrot.slane %v2029_v30, 4  ;;  %v2044_v44 = vrot.slane %v2043_v37, 4  ;;  %2296 = vst [vmem:[#allocation2 + $0x14] sm:$0x1] %v2295_v17  ;;  %2279 = vst [vmem:[#allocation2 + $0x28] sm:$0x1] %v2278_v26 }
  0x92   : > { %5787 = vmatprep.subr.bf16.mxu0 %v6161_v59  ;;  %v2063_v55 = vsel %vm6441_vm2, %v2058_v45, %v2062_v41  ;;  %v2304_v29 = vsel %vm6709_vm7, 0, %v2303_v27  ;;  %v2286_v32 = vld [vmem:[#allocation2 + $0x40] sm:$0x1]  ;;  %v2312_v36 = vld [vmem:[#allocation2 + $0x44] sm:$0x1]  ;;  %v6176_v37 = vld [vmem:[%s7572_s4 + $0x68] sm:$0xff]  }
  0x93   : > { %v2035_v51 = vsel %vm6441_vm2, %v2030_v40, %v2034_v33  ;;  %v2049_v54 = vsel %vm6441_vm2, %v2044_v44, %v2048_v38  ;;  %2305 = vst [vmem:[#allocation2 + $0x2c] sm:$0x1] %v2304_v29  ;;  %5810 = vmatpush3.bf16.msra.mxu1 %v6174_v28  ;;  %v2313_v38 = vsel %vm6709_vm7, 0, %v2312_v36  ;;  %v6177_v39 = vld [vmem:[%s7572_s4 + $0x10] sm:$0xff]   ;;  %v6178_v40 = vld [vmem:[%s7572_s4 + $0x60] sm:$0xff]   ;;  %v6273_v41 = vmov 0  }
  0x94   : > { %5756 = vmatmul.mubr.bf16.gmra.mxu0 %v6160_v1  ;;  %v5048_v53 = vcombine.low %v2021_v50, %v2035_v51  ;;  %v5049_v56 = vcombine.low %v2049_v54, %v2063_v55  ;;  %v6171_v1 = vld [vmem:[%s7572_s4 + $0x28] sm:$0xff]   ;;  %2314 = vst [vmem:[#allocation2 + $0x44] sm:$0x1] %v2313_v38  ;;  %5811 = vmatprep.subr.bf16.mxu1 %v6176_v37  ;;  %2256 = vst [vmem:[#allocation2] sm:$0xf] %v6273_v41  ;;  %v6182_v54 = vld [vmem:[%s7572_s4 + $0x50] sm:$0xff]  }
  0x95   : > { %5788 = vmatpush3.bf16.msra.mxu0 %v6161_v59  ;;  %5780 = vmatmul.mubr.bf16.gmra.mxu1 %v6163_v7  ;;  %v2271_v59 = vld [vmem:[#allocation2 + $0x18] sm:$0x1]  ;;  %v2266_v7 = vsel %vm6702_vm5, 0, %v2265_v4  ;;  %2257 = vst [vmem:[#allocation2 + $0x4] sm:$0x1] %v6273_v41  ;;  %v6188_v62 = vld [vmem:[%s7572_s4 + $0x40] sm:$0xff]  }
  0x96   : > { %5789 = vmatprep.subr.bf16.mxu0 %v6164_v20  ;;  %5799 = vmatprep.mubr.bf16.mxu0 %v5046_v21  ;;  %v2272_v63 = vsel %vm6702_vm5, 0, %v2271_v59  ;;  %2267 = vst [vmem:[#allocation2 + $0x8] sm:$0x1] %v2266_v7  ;;  %v2310_v21 = vsel %vm6709_vm7, 0, %v2309_v19  ;;  %2259 = vst [vmem:[#allocation2 + $0x48] sm:$0xf] %v6273_v41 }
  0x97   : > { %2273 = vst [vmem:[#allocation2 + $0x18] sm:$0x1] %v2272_v63  ;;  %2311 = vst [vmem:[#allocation2 + $0x3c] sm:$0x1] %v2310_v21  ;;  %5812 = vmatpush3.bf16.msra.mxu1 %v6176_v37  ;;  %v2280_v44 = vld [vmem:[#allocation2 + $0x30] sm:$0x1] }
  0x98   : > { %2260 = vst [vmem:[#allocation2 + $0x4c] sm:$0x1] %v6273_v41  ;;  %v2306_v45 = vld [vmem:[#allocation2 + $0x34] sm:$0x1]  ;;  %5813 = vmatprep.subr.bf16.mxu1 %v6178_v40  ;;  %v6185_v59 = vld [vmem:[%s7572_s4 + $0x48] sm:$0xff]   ;;  %v6824_v4 = vld [vmem:[%s7572_s4 + $0xb8] sm:$0xff]  }
  0x99   : > { %5790 = vmatpush3.bf16.msra.mxu0 %v6164_v20  ;;  %v2284_v20 = vsel %vm6702_vm5, 0, %v2283_v18  ;;  %7594 = vst [vmem:[#allocation6_spill] sm:$0xff] %v6824_v4 }
  0x9a   : > { %5791 = vmatprep.subr.bf16.mxu0 %v6165_v35  ;;  %2285 = vst [vmem:[#allocation2 + $0x38] sm:$0x1] %v2284_v20 }
  0x9b   : > { %5814 = vmatpush3.bf16.msra.mxu1 %v6178_v40 }
  0x9c   : > { %5815 = vmatprep.subr.bf16.mxu1 %v6180_v49 }
  0x9d   : > { %5792 = vmatpush3.bf16.msra.mxu0 %v6165_v35  ;;  %v2287_v35 = vsel %vm6702_vm5, 0, %v2286_v32 }
  0x9e   : > { %5793 = vmatprep.subr.bf16.mxu0 %v6166_v42  ;;  %2288 = vst [vmem:[#allocation2 + $0x40] sm:$0x1] %v2287_v35 }
  0x9f   : > { %5816 = vmatpush3.bf16.msra.mxu1 %v6180_v49 }
  0xa0   : > { %5817 = vmatprep.subr.bf16.mxu1 %v6182_v54 }
  0xa1   : > { %5794 = vmatpush3.bf16.msra.mxu0 %v6166_v42 }
  0xa2   : > { %5795 = vmatprep.subr.bf16.mxu0 %v6167_v46 }
  0xa3   : > { %5818 = vmatpush3.bf16.msra.mxu1 %v6182_v54 }
  0xa4   : > { %5819 = vmatprep.subr.bf16.mxu1 %v6185_v59 }
  0xa5   : > { %5796 = vmatpush3.bf16.msra.mxu0 %v6167_v46  ;;  %v2281_v46 = vsel %vm6702_vm5, 0, %v2280_v44 }
  0xa6   : > { %5797 = vmatprep.subr.bf16.mxu0 %v6168_v47  ;;  %2282 = vst [vmem:[#allocation2 + $0x30] sm:$0x1] %v2281_v46 }
  0xa7   : > { %5820 = vmatpush3.bf16.msra.mxu1 %v6185_v59 }
  0xa8   : > { %5821 = vmatprep.subr.bf16.mxu1 %v6188_v62 }
  0xa9   : > { %5798 = vmatpush3.bf16.msra.mxu0 %v6168_v47  ;;  %v2307_v47 = vsel %vm6709_vm7, 0, %v2306_v45 }
  0xaa   : > { %5831 = vmatprep.subr.bf16.mxu0 %v6169_v57  ;;  %2308 = vst [vmem:[#allocation2 + $0x34] sm:$0x1] %v2307_v47 }
  0xab   : > { %5822 = vmatpush3.bf16.msra.mxu1 %v6188_v62 }
  0xac   : > { %5800 = vmatmul.mubr.bf16.vlgmr.msra.gmra.mxu0 %v5047_v52  ;;  %5855 = vmatprep.subr.bf16.mxu1 %v6824_v4 }
  0xad   : > { %5803 = vmatprep.mubr.bf16.mxu0 %v5048_v53  ;;  %5832 = vmatpush3.bf16.msra.mxu0 %v6169_v57  ;;  %v6181_v53 = vld [vmem:[%s7572_s4] sm:$0xff]  }
  0xae   : > { %5833 = vmatprep.subr.bf16.mxu0 %v6170_v58 }
  0xb1   : > { %5834 = vmatpush3.bf16.msra.mxu0 %v6170_v58  ;;  %v6810_v58 = vld [vmem:[%s7572_s4 + $0xf8] sm:$0xff]  }
  0xb2   : > { %5835 = vmatprep.subr.bf16.mxu0 %v6171_v1  ;;  %7593 = vst [vmem:[#allocation5_spill] sm:$0xff] %v6810_v58 }
  0xb4   : > { %5804 = vmatmul.mubr.bf16.gmra.mxu0 %v5049_v56 }
  0xb5   : > { %5836 = vmatpush3.bf16.msra.mxu0 %v6171_v1 }
  0xb6   : > { %5837 = vmatprep.subr.bf16.mxu0 %v6173_v22 }
  0xb9   : > { %5838 = vmatpush3.bf16.msra.mxu0 %v6173_v22 }
  0xba   : > { %5839 = vmatprep.subr.bf16.mxu0 %v6175_v31 }
  0xbd   : > { %5840 = vmatpush3.bf16.msra.mxu0 %v6175_v31 }
  0xbe   : > { %5841 = vmatprep.subr.bf16.mxu0 %v6177_v39 }
  0xc1   : > { %5842 = vmatpush3.bf16.msra.mxu0 %v6177_v39 }
  0xc2   : > { %5843 = vmatprep.subr.bf16.mxu0 %v6179_v48 }
  0xc5   : > { %5844 = vmatpush3.bf16.msra.mxu0 %v6179_v48 }
  0xc6   : > { %5845 = vmatprep.subr.bf16.mxu0 %v6181_v53 }
  0xc9   : > { %5846 = vmatpush3.bf16.msra.mxu0 %v6181_v53 }
  0xca   : > { %5879 = vmatprep.subr.bf16.mxu0 %v6810_v58 }
  0xec   : > { %v6716_v2 = vpop.f32.mrf.mxu0 }
  0xed   : > { %v6746_v25 = vpop.f32.mrf.mxu1 }
  0xee   : > { %v6731_v13 = vpop.f32.mrf.mxu0  ;;  %v663_v46 = vadd.f32 %v6746_v25, %v6716_v2 }
  0xef   : > { %v6760_v33 = vpop.f32.mrf.mxu1 }
  0xf0   : > { %v6744_v23 = vpop.f32.mrf.mxu0  ;;  %v655_v48 = vadd.f32 %v6760_v33, %v6731_v13 }
  0xf1   : > { %v6777_v42 = vpop.f32.mrf.mxu1 }
  0xf2   : > { %v6755_v30 = vpop.f32.mrf.mxu0  ;;  %v666_v54 = vadd.f32 %v6777_v42, %v6744_v23 }
  0xf3   : > { %v6791_v50 = vpop.f32.mrf.mxu1 }
  0xf4   : > { %v6762_v34 = vpop.f32.mrf.mxu0  ;;  %v658_v4 = vadd.f32 %v6791_v50, %v6755_v30 }
  0xf5   : > { %v6795_v52 = vpop.f32.mrf.mxu1 }
  0xf6   : > { %v6779_v43 = vpop.f32.mrf.mxu0  ;;  %v679_v13 = vadd.f32 %v6795_v52, %v6762_v34 }
  0xf7   : > { %v6805_v56 = vpop.f32.mrf.mxu1 }
  0xf8   : > { %v6793_v51 = vpop.f32.mrf.mxu0  ;;  %v671_v42 = vadd.f32 %v6805_v56, %v6779_v43 }
  0xf9   : > { %v6819_v63 = vpop.f32.mrf.mxu1 }
  0xfa   : > { %v6803_v55 = vpop.f32.mrf.mxu0  ;;  %v682_v30 = vadd.f32 %v6819_v63, %v6793_v51 }
  0xfb   : > { %v673_v1 = vpop.f32.mrf.mxu1 }
  0xfc   : > { %v674_v50 = vadd.f32 %v673_v1, %v6803_v55 }
 0x10c   : > { %v5657_v57 = vpop.f32.mrf.mxu0 }
 0x10d   : > { %v5681_v5 = vpop.f32.mrf.mxu1  ;;  %v964_v49 = vadd.f32 %v5657_v57, %v663_v46  ;;  %v6855_v57 = vld [vmem:[#allocation2] sm:$0xf] }
 0x10e   : > { %v931_v0 = vpop.f32.mrf.mxu0  ;;  %v2510_v34 = vshrl.u32 %v6855_v57, 16  ;;  %v2513_v43 = vshll.u32 %v6855_v57, 16 }
 0x10f   : > { %v1102_v7 = vpop.f32.mrf.mxu1  ;;  %v962_v59 = vadd.f32 %v931_v0, %v655_v48  ;;  %v1135_v58 = vadd.f32 %v5681_v5, %v964_v49 }
 0x110   : > { %v5658_v3 = vpop.f32.mrf.mxu0  ;;  %v2512_v1 = vrot.slane %v2510_v34, 4 }
 0x111   : > { %v5682_v9 = vpop.f32.mrf.mxu1  ;;  %v965_v60 = vadd.f32 %v5658_v3, %v666_v54 }
 0x112   : > { %v934_v6 = vpop.f32.mrf.mxu0 }
 0x113   : > { %v1105_v11 = vpop.f32.mrf.mxu1  ;;  %v963_v2 = vadd.f32 %v934_v6, %v658_v4  ;;  %v1136_v46 = vadd.f32 %v5682_v9, %v965_v60 }
 0x114   : > { %v5661_v8 = vpop.f32.mrf.mxu0 }
 0x115   : > { %v5685_v14 = vpop.f32.mrf.mxu1  ;;  %v968_v0 = vadd.f32 %v5661_v8, %v679_v13  ;;  %v1134_v4 = vadd.f32 %v1105_v11, %v963_v2 }
 0x116   : > { %v947_v10 = vpop.f32.mrf.mxu0 }
 0x117   : > { %v6827_v16 = vpop.f32.mrf.mxu1  ;;  %v966_v52 = vadd.f32 %v947_v10, %v671_v42  ;;  %v1139_v56 = vadd.f32 %v5685_v14, %v968_v0 }
 0x118   : > { %v5662_v12 = vpop.f32.mrf.mxu0 }
 0x119   : > { %v6829_v18 = vpop.f32.mrf.mxu1  ;;  %v969_v6 = vadd.f32 %v5662_v12, %v682_v30  ;;  %v1137_v8 = vadd.f32 %v6827_v16, %v966_v52  ;;  %v6871_v16 = vld [vmem:[%s7570_s2] ss:$0 sm:$0xff] }
 0x11a   : > { %v950_v15 = vpop.f32.mrf.mxu0 }
 0x11b   : > { %v6831_v20 = vpop.f32.mrf.mxu1  ;;  %v1140_v11 = vadd.f32 %v6829_v18, %v969_v6 }
 0x12c   : > { %v5705_v17 = vpop.f32.mrf.mxu0 }
 0x12d   : > { %v5729_v22 = vpop.f32.mrf.mxu1  ;;  %v1306_v25 = vadd.f32 %v5705_v17, %v1135_v58 }
 0x12e   : > { %v1273_v19 = vpop.f32.mrf.mxu0 }
 0x12f   : > { %v1555_v26 = vpop.f32.mrf.mxu1  ;;  %v1588_v58 = vadd.f32 %v5729_v22, %v1306_v25 }
 0x130   : > { %v5706_v21 = vpop.f32.mrf.mxu0 }
 0x131   : > { %v5730_v28 = vpop.f32.mrf.mxu1  ;;  %v1307_v5 = vadd.f32 %v5706_v21, %v1136_v46 }
 0x132   : > { %v1276_v24 = vpop.f32.mrf.mxu0 }
 0x133   : > { %v1558_v31 = vpop.f32.mrf.mxu1  ;;  %v1305_v17 = vadd.f32 %v1276_v24, %v1134_v4  ;;  %v1589_v63 = vadd.f32 %v5730_v28, %v1307_v5  ;;  %v2515_v24 = vrot.slane %v2513_v43, 5 }
 0x134   : > { %v5709_v27 = vpop.f32.mrf.mxu0 }
 0x135   : > { %v6835_v35 = vpop.f32.mrf.mxu1  ;;  %v1310_v10 = vadd.f32 %v5709_v27, %v1139_v56 }
 0x136   : > { %v6833_v29 = vpop.f32.mrf.mxu0 }
 0x137   : > { %v6837_v37 = vpop.f32.mrf.mxu1  ;;  %v1592_v27 = vadd.f32 %v6835_v35, %v1310_v10 }
 0x138   : > { %v5710_v32 = vpop.f32.mrf.mxu0 }
 0x139   : > { %v6839_v39 = vpop.f32.mrf.mxu1 }
 0x13a   : > { %v1292_v36 = vpop.f32.mrf.mxu0 }
 0x13b   : > { %v6841_v41 = vpop.f32.mrf.mxu1 }
 0x13c   : > { %7595 = vst [vmem:[#allocation7_spill] sm:$0xff] %v6841_v41  ;;  %v1133_v41 = vadd.f32 %v1102_v7, %v962_v59  ;;  %v967_v7 = vadd.f32 %v950_v15, %v674_v50  ;;  %v1587_v15 = vadd.f32 %v1558_v31, %v1305_v17  ;;  %v6877_v31 = vld [vmem:[%s7571_s3] ss:$0 sm:$0xff] }
 0x13e   : > { %v1304_v23 = vadd.f32 %v1273_v19, %v1133_v41  ;;  %v1138_v21 = vadd.f32 %v6831_v20, %v967_v7  ;;  %v1311_v41 = vadd.f32 %v5710_v32, %v1140_v11 }
 0x140   : > { %v1586_v9 = vadd.f32 %v1555_v26, %v1304_v23  ;;  %v1309_v14 = vadd.f32 %v1292_v36, %v1138_v21  ;;  %v1593_v54 = vadd.f32 %v6839_v39, %v1311_v41  ;;  %v6886_v23 = vld [vmem:[#allocation2 + $0x4] sm:$0x1]  ;;  %v2441_v41 = vld [vmem:[#allocation2 + $0x18] sm:$0xf] }
 0x141   : > { %v2519_v39 = vshll.u32 %v6886_v23, 16 }
 0x143   : > { %v6895_v56 = vrot.slane %v2519_v39, 5  ;;  %v2447_v39 = vld [vmem:[#allocation2 + $0x20] sm:$0xf] }
 0x14c   : > { %v5753_v38 = vpop.f32.mrf.mxu0 }
 0x14d   : > { %v5777_v45 = vpop.f32.mrf.mxu1  ;;  %v1759_v19 = vadd.f32 %v5753_v38, %v1588_v58  ;;  %v1308_v38 = vadd.f32 %v6833_v29, %v1137_v8 }
 0x14e   : > { %v1726_v40 = vpop.f32.mrf.mxu0 }
 0x14f   : > { %v1897_v53 = vpop.f32.mrf.mxu1  ;;  %v1757_v55 = vadd.f32 %v1726_v40, %v1586_v9  ;;  %v1930_v22 = vadd.f32 %v5777_v45, %v1759_v19  ;;  %v2516_v45 = vor.u32 %v2515_v24, %v2512_v1  ;;  %v1590_v49 = vadd.f32 %v6837_v37, %v1308_v38 }
 0x150   : > { %v5754_v44 = vpop.f32.mrf.mxu0 }
 0x151   : > { %v5778_v61 = vpop.f32.mrf.mxu1  ;;  %v1760_v26 = vadd.f32 %v5754_v44, %v1589_v63  ;;  %v1928_v18 = vadd.f32 %v1897_v53, %v1757_v55  ;;  %v7596_v53 = vld [vmem:[#allocation7_spill] sm:$0xff]  ;;  %v6891_v52 = vrot.slane %v2516_v45, 4 }
 0x152   : > { %v1729_v47 = vpop.f32.mrf.mxu0 }
 0x153   : > { %v1900_v3 = vpop.f32.mrf.mxu1  ;;  %v1758_v40 = vadd.f32 %v1729_v47, %v1587_v15  ;;  %v1931_v32 = vadd.f32 %v5778_v61, %v1760_v26  ;;  %v1591_v47 = vadd.f32 %v7596_v53, %v1309_v14  ;;  %v2444_v14 = vld [vmem:[#allocation2 + $0x1c] sm:$0x1] }
 0x154   : > { %v6849_v62 = vpop.f32.mrf.mxu0 }
 0x155   : > { %v5781_v51 = vpop.f32.mrf.mxu1  ;;  %v1763_v59 = vadd.f32 %v6849_v62, %v1592_v27  ;;  %v1929_v25 = vadd.f32 %v1900_v3, %v1758_v40 }
 0x156   : > { %v1742_v33 = vpop.f32.mrf.mxu0 }
 0x157   : > { %v1913_v48 = vpop.f32.mrf.mxu1  ;;  %v1761_v42 = vadd.f32 %v1742_v33, %v1590_v49  ;;  %v1934_v3 = vadd.f32 %v5781_v51, %v1763_v59 }
 0x158   : > { %v5758_v60 = vpop.f32.mrf.mxu0 }
 0x159   : > { %v5782_v35 = vpop.f32.mrf.mxu1  ;;  %v1764_v30 = vadd.f32 %v5758_v60, %v1593_v54  ;;  %v1932_v9 = vadd.f32 %v1913_v48, %v1761_v42 }
 0x15a   : > { %v1745_v12 = vpop.f32.mrf.mxu0 }
 0x15b   : > { %v1762_v50 = vadd.f32 %v1745_v12, %v1591_v47  ;;  %v1916_v5 = vpop.f32.mrf.mxu1  ;;  %v1935_v17 = vadd.f32 %v5782_v35, %v1764_v30 }
 0x15d   : > { %v1933_v63 = vadd.f32 %v1916_v5, %v1762_v50 }
 0x16c   : > { %v5801_v28 = vpop.f32.mrf.mxu0 }
 0x16d   : > { %v2212_v20 = vadd.f32 %v5801_v28, %v1930_v22 }
 0x16e   : > { %v2179_v29 = vpop.f32.mrf.mxu0 }
 0x16f   : > { %v2227_v36 = vmul.f32 %v6871_v16, %v2212_v20  ;;  %v2210_v44 = vadd.f32 %v2179_v29, %v1928_v18 }
 0x170   : > { %v5802_v2 = vpop.f32.mrf.mxu0 }
 0x171   : > { %v2242_v13 = vadd.f32 %v6877_v31, %v2227_v36  ;;  %v2225_v46 = vmul.f32 %v6871_v16, %v2210_v44  ;;  %v2213_v61 = vadd.f32 %v5802_v2, %v1931_v32  ;;  %v2429_v36 = vld [vmem:[#allocation2 + $0x8] sm:$0xf]  ;;  %v2432_v44 = vld [vmem:[#allocation2 + $0xc] sm:$0x1] }
 0x172   : > { %v2182_v37 = vpop.f32.mrf.mxu0 }
 0x173   : > { %v2250_v0 = vmax.f32 %v2242_v13, 0.0  ;;  %v2240_v4 = vadd.f32 %v6877_v31, %v2225_v46  ;;  %v2228_v62 = vmul.f32 %v6871_v16, %v2213_v61  ;;  %v2211_v58 = vadd.f32 %v2182_v37, %v1929_v25 }
 0x174   : > { %v5805_v34 = vpop.f32.mrf.mxu0 }
 0x175   : > { %v5357_v6 = vpack.c.bf16 %v2250_v0, %v2250_v0  ;;  %v2248_v7 = vmax.f32 %v2240_v4, 0.0  ;;  %v2243_v33 = vadd.f32 %v6877_v31, %v2228_v62  ;;  %v2226_v60 = vmul.f32 %v6871_v16, %v2211_v58  ;;  %v2450_v0 = vld [vmem:[#allocation2 + $0x24] sm:$0x1] }
 0x176   : > { %v2216_v19 = vadd.f32 %v5805_v34, %v1934_v3  ;;  %v2195_v43 = vpop.f32.mrf.mxu0 }
 0x177   : > { %v2364_v55 = vshrl.u32 %v5357_v6, 16  ;;  %v5355_v51 = vpack.c.bf16 %v2248_v7, %v2248_v7  ;;  %v2251_v1 = vmax.f32 %v2243_v33, 0.0  ;;  %v2367_v8 = vshll.u32 %v5357_v6, 16  ;;  %v2435_v6 = vld [vmem:[#allocation2 + $0x10] sm:$0xf] }
 0x178   : > { %v2241_v11 = vadd.f32 %v6877_v31, %v2226_v60  ;;  %v2231_v21 = vmul.f32 %v6871_v16, %v2216_v19  ;;  %v2214_v10 = vadd.f32 %v2195_v43, %v1932_v9  ;;  %v5806_v12 = vpop.f32.mrf.mxu0  ;;  %v2438_v7 = vld [vmem:[#allocation2 + $0x14] sm:$0x1]  ;;  %v2522_v19 = vsel %vm6441_vm2, %v6891_v52, %v6895_v56 }
 0x179   : > { %v2366_v15 = vrot.slane %v2364_v55, 7  ;;  %v2348_v22 = vshrl.u32 %v5355_v51, 16  ;;  %v2351_v26 = vshll.u32 %v5355_v51, 16  ;;  %v5358_v24 = vpack.c.bf16 %v2251_v1, %v2251_v1 }
 0x17a   : > { %v2249_v48 = vmax.f32 %v2241_v11, 0.0  ;;  %v2246_v28 = vadd.f32 %v6877_v31, %v2231_v21  ;;  %v2229_v18 = vmul.f32 %v6871_v16, %v2214_v10  ;;  %v2217_v40 = vadd.f32 %v5806_v12, %v1935_v17  ;;  %v2198_v30 = vpop.f32.mrf.mxu0  ;;  %v2468_v10 = vld [vmem:[#allocation2 + $0x3c] sm:$0x1] }
 0x17b   : > { %v2369_v20 = vor.u32 %v2367_v8, %v2366_v15  ;;  %v2370_v27 = vrot.slane %v2366_v15, 4  ;;  %v2350_v29 = vrot.slane %v2348_v22, 7  ;;  %v2372_v32 = vshrl.u32 %v5358_v24, 16  ;;  %v2465_v8 = vld [vmem:[#allocation2 + $0x38] sm:$0xf] }
 0x17c   : > { %v2375_v45 = vshll.u32 %v5358_v24, 16  ;;  %v5356_v49 = vpack.c.bf16 %v2249_v48, %v2249_v48  ;;  %v2254_v54 = vmax.f32 %v2246_v28, 0.0  ;;  %v2244_v53 = vadd.f32 %v6877_v31, %v2229_v18  ;;  %v2453_v24 = vld [vmem:[#allocation2 + $0x28] sm:$0xf] }
 0x17d   : > { %v2442_v47 = vsel %vm6901_vm9, %v2369_v20, %v2441_v41  ;;  %v2445_v35 = vsel %vm6702_vm5, %v2370_v27, %v2444_v14  ;;  %v2353_v2 = vor.u32 %v2351_v26, %v2350_v29  ;;  %v2354_v25 = vrot.slane %v2350_v29, 4  ;;  %v2456_v41 = vld [vmem:[#allocation2 + $0x2c] sm:$0x1] }
 0x17e   : > { %2443 = vst [vmem:[#allocation2 + $0x18] sm:$0xf] %v2442_v47  ;;  %2446 = vst [vmem:[#allocation2 + $0x1c] sm:$0x1] %v2445_v35  ;;  %v2374_v13 = vrot.slane %v2372_v32, 7  ;;  %v2356_v46 = vshrl.u32 %v5356_v49, 16  ;;  %v5361_v42 = vpack.c.bf16 %v2254_v54, %v2254_v54  ;;  %v2232_v62 = vmul.f32 %v6871_v16, %v2217_v40 }
 0x17f   : > { %v2359_v61 = vshll.u32 %v5356_v49, 16  ;;  %v2430_v50 = vsel %vm6901_vm9, %v2353_v2, %v2429_v36  ;;  %v2433_v37 = vsel %vm6702_vm5, %v2354_v25, %v2432_v44  ;;  %v2252_v4 = vmax.f32 %v2244_v53, 0.0 }
 0x180   : > { %2431 = vst [vmem:[#allocation2 + $0x8] sm:$0xf] %v2430_v50  ;;  %2434 = vst [vmem:[#allocation2 + $0xc] sm:$0x1] %v2433_v37  ;;  %v2377_v58 = vor.u32 %v2375_v45, %v2374_v13  ;;  %v2378_v3 = vrot.slane %v2374_v13, 4  ;;  %v2358_v5 = vrot.slane %v2356_v46, 7  ;;  %v2247_v60 = vadd.f32 %v6877_v31, %v2232_v62 }
 0x181   : > { %v2396_v34 = vshrl.u32 %v5361_v42, 16  ;;  %v5359_v33 = vpack.c.bf16 %v2252_v4, %v2252_v4  ;;  %v2215_v9 = vadd.f32 %v2198_v30, %v1933_v63  ;;  %v2399_v21 = vshll.u32 %v5361_v42, 16  ;;  %v2471_v46 = vld [vmem:[#allocation2 + $0x40] sm:$0xf] }
 0x182   : > { %v2448_v43 = vsel %vm6901_vm9, %v2377_v58, %v2447_v39  ;;  %v2451_v55 = vsel %vm6702_vm5, %v2378_v3, %v2450_v0  ;;  %v2361_v51 = vor.u32 %v2359_v61, %v2358_v5  ;;  %v2362_v1 = vrot.slane %v2358_v5, 4  ;;  %v2474_v61 = vld [vmem:[#allocation2 + $0x44] sm:$0x1] }
 0x183   : > { %2449 = vst [vmem:[#allocation2 + $0x20] sm:$0xf] %v2448_v43  ;;  %2452 = vst [vmem:[#allocation2 + $0x24] sm:$0x1] %v2451_v55  ;;  %v2398_v11 = vrot.slane %v2396_v34, 7  ;;  %v2380_v63 = vshrl.u32 %v5359_v33, 16  ;;  %v2230_v14 = vmul.f32 %v6871_v16, %v2215_v9 }
 0x184   : > { %v2255_v12 = vmax.f32 %v2247_v60, 0.0  ;;  %v2436_v15 = vsel %vm6901_vm9, %v2361_v51, %v2435_v6  ;;  %v2439_v22 = vsel %vm6702_vm5, %v2362_v1, %v2438_v7  ;;  %v2383_v26 = vshll.u32 %v5359_v33, 16  ;;  %v2459_v9 = vld [vmem:[#allocation2 + $0x30] sm:$0xf]  ;;  %v2462_v43 = vld [vmem:[#allocation2 + $0x34] sm:$0x1] }
 0x185   : > { %2437 = vst [vmem:[#allocation2 + $0x10] sm:$0xf] %v2436_v15  ;;  %2440 = vst [vmem:[#allocation2 + $0x14] sm:$0x1] %v2439_v22  ;;  %v2401_v48 = vor.u32 %v2399_v21, %v2398_v11  ;;  %v2402_v28 = vrot.slane %v2398_v11, 4  ;;  %v2382_v18 = vrot.slane %v2380_v63, 7  ;;  %v2245_v29 = vadd.f32 %v6877_v31, %v2230_v14 }
 0x186   : > { %v5362_v40 = vpack.c.bf16 %v2255_v12, %v2255_v12  ;;  %v2480_v20 = vld [vmem:[#allocation2 + $0x18] sm:$0xf]  ;;  %v6931_v27 = vld [vmem:[#allocation2 + $0x1c] sm:$0x1] }
 0x187   : > { %v2552_v32 = vshrl.u32 %v2480_v20, 16  ;;  %v2555_v36 = vshll.u32 %v2480_v20, 16  ;;  %v2561_v44 = vshll.u32 %v6931_v27, 16  ;;  %v2466_v45 = vsel %vm6901_vm9, %v2401_v48, %v2465_v8  ;;  %v2478_v53 = vld [vmem:[#allocation2 + $0x8] sm:$0xf]  ;;  %v6187_v8 = vld [vmem:[%s7572_s4 + $0xf0] sm:$0xff]  }
 0x188   : > { %v2469_v16 = vsel %vm6702_vm5, %v2402_v28, %v2468_v10  ;;  %v2385_v49 = vor.u32 %v2383_v26, %v2382_v18  ;;  %v2386_v54 = vrot.slane %v2382_v18, 4  ;;  %2467 = vst [vmem:[#allocation2 + $0x38] sm:$0xf] %v2466_v45  ;;  %v2404_v47 = vshrl.u32 %v5362_v40, 16  ;;  %v6948_v34 = vld [vmem:[#allocation2 + $0xc] sm:$0x1] }
 0x189   : > { %2470 = vst [vmem:[#allocation2 + $0x3c] sm:$0x1] %v2469_v16  ;;  %v2407_v35 = vshll.u32 %v5362_v40, 16  ;;  %v2253_v2 = vmax.f32 %v2245_v29, 0.0  ;;  %v2524_v25 = vshrl.u32 %v2478_v53, 16  ;;  %v2527_v42 = vshll.u32 %v2478_v53, 16 }
 0x18a   : > { %v2454_v31 = vsel %vm6901_vm9, %v2385_v49, %v2453_v24  ;;  %v2457_v13 = vsel %vm6702_vm5, %v2386_v54, %v2456_v41  ;;  %v5096_v30 = vcombine.low %v6855_v57, %v2478_v53  ;;  %v2406_v50 = vrot.slane %v2404_v47, 7  ;;  %v2481_v4 = vld [vmem:[#allocation2 + $0x20] sm:$0xf]  ;;  %v6190_v45 = vld [vmem:[%s7572_s4 + $0xe8] sm:$0xff]  }
 0x18b   : > { %2455 = vst [vmem:[#allocation2 + $0x28] sm:$0xf] %v2454_v31  ;;  %2458 = vst [vmem:[#allocation2 + $0x2c] sm:$0x1] %v2457_v13  ;;  %v5360_v37 = vpack.c.bf16 %v2253_v2, %v2253_v2  ;;  %v2526_v39 = vrot.slane %v2524_v25, 4  ;;  %v6944_v0 = vrot.slane %v2552_v32, 4 }
 0x18c   : > { %v2529_v62 = vrot.slane %v2527_v42, 5  ;;  %5847 = vmatprep.mubr.bf16.mxu0 %v5096_v30  ;;  %v6946_v58 = vrot.slane %v2555_v36, 5  ;;  %v2566_v3 = vshrl.u32 %v2481_v4, 16  ;;  %v2569_v5 = vshll.u32 %v2481_v4, 16  ;;  %v2479_v60 = vld [vmem:[#allocation2 + $0x10] sm:$0xf] }
 0x18d   : > { %v2409_v6 = vor.u32 %v2407_v35, %v2406_v50  ;;  %v2410_v7 = vrot.slane %v2406_v50, 4  ;;  %v2388_v33 = vshrl.u32 %v5360_v37, 16  ;;  %v2391_v57 = vshll.u32 %v5360_v37, 16  ;;  %v6957_v15 = vld [vmem:[#allocation2 + $0x14] sm:$0x1]  ;;  %v7601_v18 = vld [vmem:[#allocation5_spill] sm:$0xff] }
 0x18e   : > { %v2538_v55 = vshrl.u32 %v2479_v60, 16  ;;  %v2541_v51 = vshll.u32 %v2479_v60, 16  ;;  %v5097_v1 = vcombine.low %v2479_v60, %v2480_v20  ;;  %v2568_v11 = vrot.slane %v2566_v3, 4  ;;  %v6975_v31 = vld [vmem:[#allocation2 + $0x24] sm:$0x1] }
 0x18f   : > { %v2472_v21 = vsel %vm6901_vm9, %v2409_v6, %v2471_v46  ;;  %v2475_v10 = vsel %vm6702_vm5, %v2410_v7, %v2474_v61  ;;  %v2390_v63 = vrot.slane %v2388_v33, 7  ;;  %v2571_v12 = vrot.slane %v2569_v5, 5  ;;  %v6960_v14 = vld [vmem:[#allocation2 + $0x38] sm:$0xf]  ;;  %v6194_v37 = vld [vmem:[%s7572_s4 + $0xe0] sm:$0xff]  }
 0x190   : > { %2473 = vst [vmem:[#allocation2 + $0x40] sm:$0xf] %v2472_v21  ;;  %2476 = vst [vmem:[#allocation2 + $0x44] sm:$0x1] %v2475_v10  ;;  %v2540_v22 = vrot.slane %v2538_v55, 4  ;;  %v2543_v26 = vrot.slane %v2541_v51, 5  ;;  %5848 = vmatmul.mubr.bf16.vlgmr.msra.gmra.mxu0 %v5097_v1  ;;  %v2530_v24 = vor.u32 %v2529_v62, %v2526_v39  ;;  %v2558_v50 = vor.u32 %v6946_v58, %v6944_v0 }
 0x191   : > { %v2533_v41 = vshll.u32 %v6948_v34, 16  ;;  %v2393_v48 = vor.u32 %v2391_v57, %v2390_v63  ;;  %v2394_v28 = vrot.slane %v2390_v63, 4  ;;  %5880 = vmatpush3.bf16.msra.mxu0 %v7601_v18  ;;  %v2608_v40 = vshrl.u32 %v6960_v14, 16  ;;  %v6195_v57 = vld [vmem:[%s7572_s4 + $0xb0] sm:$0xff]   ;;  %v7000_v60 = vld [vmem:[#allocation2 + $0x3c] sm:$0x1] }
 0x192   : > { %v2611_v20 = vshll.u32 %v6960_v14, 16  ;;  %5881 = vmatprep.subr.bf16.mxu0 %v6187_v8  ;;  %v2482_v29 = vld [vmem:[#allocation2 + $0x28] sm:$0xf]  ;;  %v2531_v32 = vrot.slane %v2530_v24, 4  ;;  %v2544_v16 = vor.u32 %v2543_v26, %v2540_v22  ;;  %v2547_v49 = vshll.u32 %v6957_v15, 16  ;;  %v6198_v18 = vld [vmem:[%s7572_s4 + $0xd0] sm:$0xff]  }
 0x193   : > { %v2535_v36 = vrot.slane %v2533_v41, 5  ;;  %v2460_v54 = vsel %vm6901_vm9, %v2393_v48, %v2459_v9  ;;  %v2463_v53 = vsel %vm6702_vm5, %v2394_v28, %v2462_v43  ;;  %v2580_v47 = vshrl.u32 %v2482_v29, 16  ;;  %v6977_v13 = vld [vmem:[#allocation2 + $0x2c] sm:$0x1]  ;;  %v2904_v9 = vld [vmem:[#allocation2] sm:$0xe] }
 0x194   : > { %v2583_v35 = vshll.u32 %v2482_v29, 16  ;;  %2461 = vst [vmem:[#allocation2 + $0x30] sm:$0xf] %v2460_v54  ;;  %2464 = vst [vmem:[#allocation2 + $0x34] sm:$0x1] %v2463_v53  ;;  %v5098_v2 = vcombine.low %v2481_v4, %v2482_v29  ;;  %v2545_v59 = vrot.slane %v2544_v16, 4  ;;  %v2572_v39 = vor.u32 %v2571_v12, %v2568_v11 }
 0x195   : > { %v2536_v25 = vsel %vm6441_vm2, %v2531_v32, %v2535_v36  ;;  %v2582_v46 = vrot.slane %v2580_v47, 4  ;;  %5882 = vmatpush3.bf16.msra.mxu0 %v6187_v8  ;;  %v2610_v42 = vrot.slane %v2608_v40, 4  ;;  %v2549_v30 = vrot.slane %v2547_v49, 5  ;;  %v6196_v12 = vld [vmem:[%s7572_s4 + $0xd8] sm:$0xff]   ;;  %v2905_v22 = vld [vmem:[#allocation2 + $0x8] sm:$0xe] }
 0x196   : > { %v2585_v61 = vrot.slane %v2583_v35, 5  ;;  %v5084_v38 = vcombine.low %v2522_v19, %v2536_v25  ;;  %5851 = vmatprep.mubr.bf16.mxu0 %v5098_v2  ;;  %5883 = vmatprep.subr.bf16.mxu0 %v6190_v45  ;;  %v2613_v4 = vrot.slane %v2611_v20, 5  ;;  %v2575_v62 = vshll.u32 %v6975_v31, 16  ;;  %v6193_v26 = vld [vmem:[#allocation2 + $0x8] ss:$8 sps:$4 sm:$0xff]   ;;  %v6199_v2 = vld [vmem:[%s7572_s4 + $0xa0] sm:$0xff]  }
 0x197   : > { %v2589_v52 = vshll.u32 %v6977_v13, 16  ;;  %v2550_v56 = vsel %vm6441_vm2, %v2545_v59, %v2549_v30  ;;  %v2559_v19 = vrot.slane %v2558_v50, 4  ;;  %v2563_v5 = vrot.slane %v2561_v44, 5  ;;  %v7602_v48 = vld [vmem:[#allocation6_spill] sm:$0xff]  ;;  %v6202_v59 = vld [vmem:[%s7572_s4 + $0xc0] sm:$0xff]   ;;  %v6205_v30 = vld [vmem:[%s7572_s4 + $0x178] sm:$0xff]  }
 0x198   : > { %5823 = vmatprep.mubr.bf16.mxu1 %v5084_v38  ;;  %v2586_v3 = vor.u32 %v2585_v61, %v2582_v46  ;;  %v2573_v0 = vrot.slane %v2572_v39, 4  ;;  %v2577_v58 = vrot.slane %v2575_v62, 5  ;;  %v2614_v8 = vor.u32 %v2613_v4, %v2610_v42  ;;  %v6197_v40 = vld [vmem:[%s7572_s4 + $0xa8] sm:$0xff]   ;;  %v6201_v42 = vld [vmem:[%s7572_s4 + $0x98] sm:$0xff]   ;;  %v6203_v50 = vld [vmem:[%s7572_s4 + $0x90] sm:$0xff]  }
 0x199   : > { %5884 = vmatpush3.bf16.msra.mxu0 %v6190_v45  ;;  %v2591_v7 = vrot.slane %v2589_v52, 5  ;;  %v2564_v33 = vsel %vm6441_vm2, %v2559_v19, %v2563_v5  ;;  %v5108_v20 = vrot.slane %v2904_v9, 9  ;;  %v2933_v29 = vrot.slane %v6886_v23, 5  ;;  %v6200_v23 = vld [vmem:[%s7572_s4 + $0xc8] sm:$0xff]   ;;  %v6204_v39 = vld [vmem:[#allocation2 + $0x18] ss:$8 sps:$4 sm:$0xff]  }
 0x19a   : > { %v2587_v6 = vrot.slane %v2586_v3, 4  ;;  %5885 = vmatprep.subr.bf16.mxu0 %v6194_v37  ;;  %v5085_v55 = vcombine.low %v2550_v56, %v2564_v33  ;;  %v2578_v44 = vsel %vm6441_vm2, %v2573_v0, %v2577_v58  ;;  %v5109_v32 = vrot.slane %v2905_v22, 9  ;;  %v6206_v4 = vld [vmem:[%s7572_s4 + $0x88] sm:$0xff]   ;;  %v7061_v62 = vld [vmem:[#allocation2 + $0x14] sm:$0x1] }
 0x19b   : > { %v2483_v43 = vld [vmem:[#allocation2 + $0x30] sm:$0xf]  ;;  %v7006_v1 = vld [vmem:[#allocation2 + $0x34] sm:$0x1]  ;;  %v2937_v36 = vrot.slane %v6948_v34, 5  ;;  %v2615_v16 = vrot.slane %v2614_v8, 4  ;;  %v2934_v34 = vsel %vm7025_vm12, %v5108_v20, %v2933_v29 }
 0x19c   : > { %v2592_v51 = vsel %vm6441_vm2, %v2587_v6, %v2591_v7  ;;  %v2594_v11 = vshrl.u32 %v2483_v43, 16  ;;  %v2597_v21 = vshll.u32 %v2483_v43, 16  ;;  %v5099_v10 = vcombine.low %v2483_v43, %v6960_v14  ;;  %5824 = vmatmul.mubr.bf16.vlgmr.msra.gmra.mxu1 %v5085_v55  ;;  %v3570_v3 = vld [vmem:[#allocation2 + $0x10] sm:$0xe]  ;;  %v7063_v52 = vld [vmem:[#allocation2 + $0xc] sm:$0x1] }
 0x19d   : > { %v5086_v63 = vcombine.low %v2578_v44, %v2592_v51  ;;  %5886 = vmatpush3.bf16.msra.mxu0 %v6194_v37  ;;  %5856 = vmatpush3.bf16.msra.mxu1 %v7602_v48  ;;  %v2603_v28 = vshll.u32 %v7006_v1, 16  ;;  %v2617_v14 = vshll.u32 %v7000_v60, 16  ;;  %v2938_v35 = vsel %vm7025_vm12, %v5109_v32, %v2937_v36  ;;  %v6208_v37 = vld [vmem:[%s7572_s4 + $0x170] sm:$0xff]   ;;  %v3569_v5 = vld [vmem:[#allocation2 + $0x8] sm:$0xe]  ;;  %v6209_v43 = vld [vmem:[%s7572_s4 + $0x80] sm:$0xff]  }
 0x19e   : > { %v2596_v24 = vrot.slane %v2594_v11, 4  ;;  %v2599_v41 = vrot.slane %v2597_v21, 5  ;;  %5852 = vmatmul.mubr.bf16.gmra.mxu0 %v5099_v10  ;;  %5857 = vmatprep.subr.bf16.mxu1 %v6195_v57  ;;  %v5132_v38 = vcombine.low %v2934_v34, %v2938_v35  ;;  %v3289_v56 = vld [vmem:[#allocation2 + $0x10] sm:$0xf]  ;;  %v5201_v58 = vrot.slane %v3570_v3, 9  ;;  %v6211_v55 = vld [vmem:[%s7572_s4 + $0x168] sm:$0xff]  }
 0x19f   : > { %5895 = vmatprep.mubr.bf16.mxu0 %v6193_v26  ;;  %5827 = vmatprep.mubr.bf16.mxu1 %v5086_v63  ;;  %v2605_v54 = vrot.slane %v2603_v28, 5  ;;  %v2619_v53 = vrot.slane %v2617_v14, 5  ;;  %v6207_v19 = vld [vmem:[#allocation2 + $0x28] ss:$8 sps:$4 sm:$0xff]   ;;  %v3599_v6 = vrot.slane %v7061_v62, 5  ;;  %v3321_v9 = vshll.u32 %v3289_v56, 16 }
 0x1a0   : > { %5887 = vmatprep.subr.bf16.mxu0 %v6196_v12  ;;  %v2600_v45 = vor.u32 %v2599_v41, %v2596_v24  ;;  %v2906_v0 = vld [vmem:[#allocation2 + $0x10] sm:$0xe]  ;;  %v3287_v7 = vld [vmem:[#allocation2 + $0x8] sm:$0xf]  ;;  %v2907_v33 = vld [vmem:[#allocation2 + $0x18] sm:$0xe] }
 0x1a1   : > { %5888 = vmatpush3.bf16.msra.mxu0 %v6196_v12  ;;  %5858 = vmatpush3.bf16.msra.mxu1 %v6195_v57  ;;  %v2620_v46 = vsel %vm6441_vm2, %v2615_v16, %v2619_v53  ;;  %v3318_v57 = vshrl.u32 %v3289_v56, 16  ;;  %v5200_v44 = vrot.slane %v3569_v5, 9  ;;  %v3595_v51 = vrot.slane %v7063_v52, 5  ;;  %v2909_v8 = vld [vmem:[#allocation2 + $0x28] sm:$0xe]  ;;  %v6214_v35 = vld [vmem:[%s7572_s4 + $0x130] sm:$0xff]  }
 0x1a2   : > { %v2601_v49 = vrot.slane %v2600_v45, 4  ;;  %5889 = vmatprep.subr.bf16.mxu0 %v6198_v18  ;;  %5859 = vmatprep.subr.bf16.mxu1 %v6197_v40  ;;  %v5110_v11 = vrot.slane %v2906_v0, 9  ;;  %v2941_v21 = vrot.slane %v6957_v15, 5  ;;  %v2908_v10 = vld [vmem:[#allocation2 + $0x20] sm:$0xe]  ;;  %v3304_v63 = vshrl.u32 %v3287_v7, 16 }
 0x1a3   : > { %v3307_v12 = vshll.u32 %v3287_v7, 16  ;;  %v5111_v22 = vrot.slane %v2907_v33, 9  ;;  %v2945_v26 = vrot.slane %v6931_v27, 5  ;;  %v3600_v24 = vsel %vm7025_vm12, %v5201_v58, %v3599_v6  ;;  %v6213_v27 = vld [vmem:[%s7572_s4 + $0x160] sm:$0xff]   ;;  %v2910_v16 = vld [vmem:[#allocation2 + $0x30] sm:$0xe] }
 0x1a4   : > { %v2606_v25 = vsel %vm6441_vm2, %v2601_v49, %v2605_v54  ;;  %v5113_v41 = vrot.slane %v2909_v8, 9  ;;  %v2953_v48 = vrot.slane %v6977_v13, 5  ;;  %v3320_v28 = vrot.slane %v3318_v57, 4  ;;  %v6212_v13 = vld [vmem:[%s7572_s4 + $0x138] sm:$0xff]   ;;  %v7115_v56 = vld [vmem:[#allocation2 + $0x24] sm:$0x1] }
 0x1a5   : > { %v5087_v61 = vcombine.low %v2606_v25, %v2620_v46  ;;  %5890 = vmatpush3.bf16.msra.mxu0 %v6198_v18  ;;  %5860 = vmatpush3.bf16.msra.mxu1 %v6197_v40  ;;  %v3323_v14 = vrot.slane %v3321_v9, 5  ;;  %v6210_v18 = vld [vmem:[#allocation2 + $0x38] ss:$8 sps:$4 sm:$0xff]   ;;  %v3596_v15 = vsel %vm7025_vm12, %v5200_v44, %v3595_v51  ;;  %v5112_v40 = vrot.slane %v2908_v10, 9  ;;  %v7119_v0 = vld [vmem:[#allocation2 + $0x34] sm:$0x1] }
 0x1a6   : > { %5891 = vmatprep.subr.bf16.mxu0 %v6200_v23  ;;  %5861 = vmatprep.subr.bf16.mxu1 %v6199_v2  ;;  %v2949_v20 = vrot.slane %v6975_v31, 5  ;;  %v2942_v29 = vsel %vm7025_vm12, %v5110_v11, %v2941_v21  ;;  %v5224_v32 = vcombine.low %v3596_v15, %v3600_v24  ;;  %v3306_v36 = vrot.slane %v3304_v63, 4  ;;  %v2911_v54 = vld [vmem:[#allocation2 + $0x38] sm:$0xe]  ;;  %v3572_v5 = vld [vmem:[#allocation2 + $0x20] sm:$0xe] }
 0x1a7   : > { %5828 = vmatmul.mubr.bf16.gmra.mxu1 %v5087_v61  ;;  %v3309_v45 = vrot.slane %v3307_v12, 5  ;;  %v2946_v31 = vsel %vm7025_vm12, %v5111_v22, %v2945_v26  ;;  %v2954_v49 = vsel %vm7025_vm12, %v5113_v41, %v2953_v48  ;;  %v3324_v53 = vor.u32 %v3323_v14, %v3320_v28  ;;  %v3574_v58 = vld [vmem:[#allocation2 + $0x30] sm:$0xe]  ;;  %v6218_v33 = vld [vmem:[%s7572_s4 + $0x120] sm:$0xff]   ;;  %v7127_v44 = vld [vmem:[#allocation2 + $0x2c] sm:$0x1] }
 0x1a8   : > { %5871 = vmatprep.mubr.bf16.mxu1 %v5132_v38  ;;  %v2950_v34 = vsel %vm7025_vm12, %v5112_v40, %v2949_v20  ;;  %v5114_v25 = vrot.slane %v2910_v16, 9  ;;  %v2957_v46 = vrot.slane %v7006_v1, 5  ;;  %v3327_v38 = vshll.u32 %v7061_v62, 16  ;;  %v3571_v1 = vld [vmem:[#allocation2 + $0x18] sm:$0xe]  ;;  %v6219_v21 = vld [vmem:[%s7572_s4 + $0x148] sm:$0xff]  }
 0x1a9   : > { %5892 = vmatpush3.bf16.msra.mxu0 %v6200_v23  ;;  %5862 = vmatpush3.bf16.msra.mxu1 %v6199_v2  ;;  %v5133_v23 = vcombine.low %v2942_v29, %v2946_v31  ;;  %v6215_v2 = vld [vmem:[%s7572_s4 + $0x158] sm:$0xff]   ;;  %v3310_v61 = vor.u32 %v3309_v45, %v3306_v36  ;;  %v5202_v57 = vrot.slane %v3571_v1, 9  ;;  %v7129_v51 = vld [vmem:[#allocation2 + $0x28] sm:$0xe]  ;;  %v5203_v10 = vrot.slane %v3572_v5, 9  ;;  %v6221_v24 = vld [vmem:[%s7572_s4 + $0x140] sm:$0xff]  }
 0x1aa   : > { %5893 = vmatprep.subr.bf16.mxu0 %v6202_v59  ;;  %5863 = vmatprep.subr.bf16.mxu1 %v6201_v42  ;;  %v2958_v62 = vsel %vm7025_vm12, %v5114_v25, %v2957_v46  ;;  %v7131_v8 = vld [vmem:[#allocation2 + $0x38] sm:$0xe]  ;;  %v3607_v63 = vrot.slane %v7115_v56, 5  ;;  %v5205_v12 = vrot.slane %v3574_v58, 9  ;;  %v3615_v41 = vrot.slane %v7119_v0, 5 }
 0x1ab   : > { %v3311_v3 = vrot.slane %v3310_v61, 4  ;;  %v3952_v22 = vld [vmem:[#allocation2 + $0x18] sm:$0xf]  ;;  %v3293_v48 = vld [vmem:[#allocation2 + $0x20] sm:$0xf]  ;;  %v3611_v29 = vrot.slane %v7127_v44, 5 }
 0x1ac   : > { %v7147_v15 = vld [vmem:[#allocation2 + $0x3c] sm:$0x1]  ;;  %v7149_v40 = vld [vmem:[#allocation2 + $0x44] sm:$0x1]  ;;  %v3291_v20 = vld [vmem:[#allocation2 + $0x18] sm:$0xf]  ;;  %v3608_v16 = vsel %vm7025_vm12, %v5203_v10, %v3607_v63 }
 0x1ad   : > { %5894 = vmatpush3.bf16.msra.mxu0 %v6202_v59  ;;  %5864 = vmatpush3.bf16.msra.mxu1 %v6201_v42  ;;  %v5134_v59 = vcombine.low %v2950_v34, %v2954_v49  ;;  %v5115_v42 = vrot.slane %v2911_v54, 9  ;;  %v3297_v36 = vld [vmem:[#allocation2 + $0x30] sm:$0xf]  ;;  %v6220_v45 = vld [vmem:[%s7572_s4 + $0x118] sm:$0xff]   ;;  %v3576_v31 = vld [vmem:[#allocation2 + $0x40] sm:$0xe] }
 0x1ae   : > { %5927 = vmatprep.subr.bf16.mxu0 %v6205_v30  ;;  %5865 = vmatprep.subr.bf16.mxu1 %v6203_v50  ;;  %v5206_v49 = vrot.slane %v7131_v8, 9  ;;  %v3346_v54 = vshrl.u32 %v3293_v48, 16  ;;  %v3619_v34 = vrot.slane %v7147_v15, 5  ;;  %v3295_v25 = vld [vmem:[#allocation2 + $0x28] sm:$0xf]  ;;  %v3332_v46 = vshrl.u32 %v3291_v20, 16 }
 0x1af   : > { %v3335_v61 = vshll.u32 %v3291_v20, 16  ;;  %v6225_v8 = vld [vmem:[%s7572_s4 + $0x1f0] sm:$0xff]   ;;  %v6224_v63 = vld [vmem:[%s7572_s4 + $0x108] sm:$0xff]  }
 0x1b0   : > { %5896 = vmatmul.mubr.bf16.vlgmr.msra.gmra.mxu0 %v6204_v39  ;;  %v6217_v39 = vld [vmem:[%s7572_s4 + $0x150] sm:$0xff]  }
 0x1b1   : > { %5899 = vmatprep.mubr.bf16.mxu0 %v6207_v19  ;;  %5928 = vmatpush3.bf16.msra.mxu0 %v6205_v30  ;;  %v2961_v30 = vrot.slane %v7000_v60, 5  ;;  %v6216_v60 = vld [vmem:[%s7572_s4 + $0x128] sm:$0xff]   ;;  %v4232_v17 = vld [vmem:[#allocation2 + $0x10] sm:$0xe] }
 0x1b2   : > { %5866 = vmatpush3.bf16.msra.mxu1 %v6203_v50  ;;  %5929 = vmatprep.subr.bf16.mxu0 %v6208_v37  ;;  %v3313_v50 = vshll.u32 %v7063_v52, 16  ;;  %v3329_v52 = vrot.slane %v3327_v38, 5  ;;  %v3374_v38 = vshrl.u32 %v3297_v36, 16  ;;  %v6264_v47 = vld [vmem:[%s6373_s20 + $0x108] ss:$8 sps:$4 sm:$0xff]  }
 0x1b3   : > { %5867 = vmatprep.subr.bf16.mxu1 %v6206_v4  ;;  %v2962_v19 = vsel %vm7025_vm12, %v5115_v42, %v2961_v30  ;;  %v6222_v42 = vld [vmem:[%s7572_s4 + $0x110] sm:$0xff]   ;;  %v6223_v30 = vld [vmem:[%s7572_s4 + $0x1f8] sm:$0xff]  }
 0x1b4   : > { %v3315_v6 = vrot.slane %v3313_v50, 5  ;;  %v5207_v50 = vrot.slane %v3576_v31, 9 }
 0x1b5   : > { %5930 = vmatpush3.bf16.msra.mxu0 %v6208_v37  ;;  %v3325_v37 = vrot.slane %v3324_v53, 4  ;;  %v3349_v53 = vshll.u32 %v3293_v48, 16 }
 0x1b6   : > { %5868 = vmatpush3.bf16.msra.mxu1 %v6206_v4  ;;  %5931 = vmatprep.subr.bf16.mxu0 %v6211_v55  ;;  %v7108_v4 = vld [vmem:[#allocation2 + $0x1c] sm:$0x1]  ;;  %v3316_v11 = vsel %vm6441_vm2, %v3311_v3, %v3315_v6  ;;  %v7169_v3 = vld [vmem:[#allocation2 + $0x14] sm:$0x1] }
 0x1b7   : > { %5869 = vmatprep.subr.bf16.mxu1 %v6209_v43  ;;  %v3330_v7 = vsel %vm6441_vm2, %v3325_v37, %v3329_v52  ;;  %v3603_v9 = vrot.slane %v7108_v4, 5  ;;  %v3623_v37 = vrot.slane %v7149_v40, 5  ;;  %v3360_v52 = vshrl.u32 %v3295_v25, 16  ;;  %v7174_v6 = vld [vmem:[#allocation2 + $0x1c] sm:$0x1] }
 0x1b8   : > { %5900 = vmatmul.mubr.bf16.gmra.mxu0 %v6210_v18  ;;  %v5188_v26 = vcombine.low %v3316_v11, %v3330_v7  ;;  %v3620_v11 = vsel %vm7025_vm12, %v5206_v49, %v3619_v34  ;;  %v6226_v49 = vld [vmem:[%s7572_s4 + $0x100] sm:$0xff]  }
 0x1b9   : > { %5932 = vmatpush3.bf16.msra.mxu0 %v6211_v55  ;;  %5943 = vmatprep.mubr.bf16.mxu0 %v5224_v32  ;;  %v5135_v55 = vcombine.low %v2958_v62, %v2962_v19  ;;  %v7145_v18 = vsel %vm7025_vm12, %v5202_v57, %v3603_v9  ;;  %v3984_v32 = vshll.u32 %v3952_v22, 16  ;;  %v3348_v62 = vrot.slane %v3346_v54, 4 }
 0x1ba   : > { %5870 = vmatpush3.bf16.msra.mxu1 %v6209_v43  ;;  %5933 = vmatprep.subr.bf16.mxu0 %v6213_v27  ;;  %v3950_v43 = vld [vmem:[#allocation2 + $0x10] sm:$0xf]  ;;  %v3363_v19 = vshll.u32 %v3295_v25, 16  ;;  %v5225_v5 = vcombine.low %v7145_v18, %v3608_v16  ;;  %v3337_v57 = vrot.slane %v3335_v61, 5  ;;  %v3376_v9 = vrot.slane %v3374_v38, 4 }
 0x1bb   : > { %5903 = vmatprep.subr.bf16.mxu1 %v6212_v13  ;;  %v3967_v28 = vshrl.u32 %v3950_v43, 16  ;;  %v3970_v14 = vshll.u32 %v3950_v43, 16  ;;  %v3986_v1 = vrot.slane %v3984_v32, 5  ;;  %v6227_v32 = vld [vmem:[%s7572_s4 + $0x1e8] sm:$0xff]   ;;  %v3369_v61 = vshll.u32 %v7127_v44, 16  ;;  %v6228_v44 = vld [vmem:[%s7572_s4 + $0x1b8] sm:$0xff]  }
 0x1bd   : > { %5872 = vmatmul.mubr.bf16.vlgmr.msra.gmra.mxu1 %v5133_v23  ;;  %5934 = vmatpush3.bf16.msra.mxu0 %v6213_v27  ;;  %v5204_v27 = vrot.slane %v7129_v51, 9  ;;  %v3616_v23 = vsel %vm7025_vm12, %v5205_v12, %v3615_v41  ;;  %v3624_v12 = vsel %vm7025_vm12, %v5207_v50, %v3623_v37  ;;  %v3299_v41 = vld [vmem:[#allocation2 + $0x38] sm:$0xf] }
 0x1be   : > { %5875 = vmatprep.mubr.bf16.mxu1 %v5134_v59  ;;  %5904 = vmatpush3.bf16.msra.mxu1 %v6212_v13  ;;  %v3981_v13 = vshrl.u32 %v3952_v22, 16  ;;  %v3377_v59 = vshll.u32 %v3297_v36, 16  ;;  %v3388_v16 = vshrl.u32 %v3299_v41, 16  ;;  %v3391_v31 = vshll.u32 %v3299_v41, 16 }
 0x1bf   : > { %5905 = vmatprep.subr.bf16.mxu1 %v6214_v35  ;;  %5935 = vmatprep.subr.bf16.mxu0 %v6215_v2  ;;  %v3612_v58 = vsel %vm7025_vm12, %v5204_v27, %v3611_v29  ;;  %v3341_v27 = vshll.u32 %v7108_v4, 16  ;;  %v3355_v29 = vshll.u32 %v7115_v56, 16  ;;  %v5227_v54 = vcombine.low %v3620_v11, %v3624_v12 }
 0x1c0   : > { %v3379_v43 = vrot.slane %v3377_v59, 5  ;;  %v5226_v51 = vcombine.low %v3612_v58, %v3616_v23  ;;  %v3383_v56 = vshll.u32 %v7119_v0, 16  ;;  %v6229_v0 = vld [vmem:[%s7572_s4 + $0x1e0] sm:$0xff]   ;;  %v3393_v50 = vrot.slane %v3391_v31, 5 }
 0x1c1   : > { %5936 = vmatpush3.bf16.msra.mxu0 %v6215_v2  ;;  %v3972_v2 = vrot.slane %v3970_v14, 5  ;;  %v3343_v59 = vrot.slane %v3341_v27, 5  ;;  %v3397_v11 = vshll.u32 %v7147_v15, 16  ;;  %v6234_v15 = vld [vmem:[%s7572_s4 + $0x1d0] sm:$0xff]   ;;  %v6232_v27 = vld [vmem:[%s7572_s4 + $0x1a8] sm:$0xff]  }
 0x1c2   : > { %5906 = vmatpush3.bf16.msra.mxu1 %v6214_v35  ;;  %5937 = vmatprep.subr.bf16.mxu0 %v6217_v39  ;;  %v3969_v35 = vrot.slane %v3967_v28, 4  ;;  %v3990_v28 = vshll.u32 %v7174_v6, 16  ;;  %v3962_v31 = vld [vmem:[#allocation2 + $0x40] sm:$0xf] }
 0x1c3   : > { %5907 = vmatprep.subr.bf16.mxu1 %v6216_v60 }
 0x1c4   : > { %v3973_v7 = vor.u32 %v3972_v2, %v3969_v35  ;;  %v3992_v34 = vrot.slane %v3990_v28, 5 }
 0x1c5   : > { %5876 = vmatmul.mubr.bf16.gmra.mxu1 %v5135_v55  ;;  %5938 = vmatpush3.bf16.msra.mxu0 %v6217_v39  ;;  %v3983_v39 = vrot.slane %v3981_v13, 4  ;;  %v3301_v55 = vld [vmem:[#allocation2 + $0x40] sm:$0xf]  ;;  %v3380_v13 = vor.u32 %v3379_v43, %v3376_v9  ;;  %v3411_v43 = vshll.u32 %v7149_v40, 16 }
 0x1c6   : > { %5908 = vmatpush3.bf16.msra.mxu1 %v6216_v60  ;;  %5919 = vmatprep.mubr.bf16.mxu1 %v5188_v26  ;;  %v3351_v60 = vrot.slane %v3349_v53, 5  ;;  %v3362_v26 = vrot.slane %v3360_v52, 4  ;;  %v3974_v48 = vrot.slane %v3973_v7, 4  ;;  %v3402_v14 = vshrl.u32 %v3301_v55, 16  ;;  %v3956_v52 = vld [vmem:[#allocation2 + $0x28] sm:$0xf] }
 0x1c7   : > { %5909 = vmatprep.subr.bf16.mxu1 %v6218_v33  ;;  %5939 = vmatprep.subr.bf16.mxu0 %v6219_v21  ;;  %v3987_v10 = vor.u32 %v3986_v1, %v3983_v39  ;;  %v3405_v18 = vshll.u32 %v3301_v55, 16  ;;  %v3381_v38 = vrot.slane %v3380_v13, 4  ;;  %v3958_v7 = vld [vmem:[#allocation2 + $0x30] sm:$0xf]  ;;  %v3954_v55 = vld [vmem:[#allocation2 + $0x20] sm:$0xf] }
 0x1c8   : > { %v3352_v22 = vor.u32 %v3351_v60, %v3348_v62  ;;  %v3404_v35 = vrot.slane %v3402_v14, 4  ;;  %v3385_v62 = vrot.slane %v3383_v56, 5  ;;  %v3995_v40 = vshrl.u32 %v3954_v55, 16  ;;  %v7234_v56 = vld [vmem:[#allocation2 + $0x2c] sm:$0x1] }
 0x1c9   : > { %5940 = vmatpush3.bf16.msra.mxu0 %v6219_v21  ;;  %v3976_v21 = vshll.u32 %v7169_v3, 16  ;;  %v3407_v2 = vrot.slane %v3405_v18, 5  ;;  %v3998_v41 = vshll.u32 %v3954_v55, 16  ;;  %v3413_v14 = vrot.slane %v3411_v43, 5 }
 0x1ca   : > { %5910 = vmatpush3.bf16.msra.mxu1 %v6218_v33  ;;  %5941 = vmatprep.subr.bf16.mxu0 %v6221_v24  ;;  %v3334_v33 = vrot.slane %v3332_v46, 4  ;;  %v3353_v4 = vrot.slane %v3352_v22, 4  ;;  %v3357_v46 = vrot.slane %v3355_v29, 5  ;;  %v3386_v58 = vsel %vm6441_vm2, %v3381_v38, %v3385_v62  ;;  %v7242_v38 = vld [vmem:[#allocation2 + $0x34] sm:$0x1] }
 0x1cb   : > { %5911 = vmatprep.subr.bf16.mxu1 %v6220_v45  ;;  %v3978_v36 = vrot.slane %v3976_v21, 5  ;;  %v3408_v60 = vor.u32 %v3407_v2, %v3404_v35  ;;  %v4009_v21 = vshrl.u32 %v3956_v52, 16  ;;  %v4032_v62 = vshll.u32 %v7242_v38, 16 }
 0x1cc   : > { %v3338_v20 = vor.u32 %v3337_v57, %v3334_v33  ;;  %v3358_v37 = vsel %vm6441_vm2, %v3353_v4, %v3357_v46  ;;  %v6230_v57 = vld [vmem:[%s7572_s4 + $0x1b0] sm:$0xff]   ;;  %v6236_v46 = vld [vmem:[%s7572_s4 + $0x1c8] sm:$0xff]  }
 0x1cd   : > { %5942 = vmatpush3.bf16.msra.mxu0 %v6221_v24  ;;  %v3365_v24 = vrot.slane %v3363_v19, 5  ;;  %v3979_v23 = vsel %vm6441_vm2, %v3974_v48, %v3978_v36  ;;  %v3409_v22 = vrot.slane %v3408_v60, 4  ;;  %v3964_v48 = vld [vmem:[#allocation2 + $0x48] sm:$0xf]  ;;  %v4011_v29 = vrot.slane %v4009_v21, 4 }
 0x1ce   : > { %5912 = vmatpush3.bf16.msra.mxu1 %v6220_v45  ;;  %5975 = vmatprep.subr.bf16.mxu0 %v6223_v30  ;;  %v3988_v45 = vrot.slane %v3987_v10, 4  ;;  %v3339_v25 = vrot.slane %v3338_v20, 4  ;;  %v4012_v10 = vshll.u32 %v3956_v52, 16  ;;  %v4065_v4 = vshrl.u32 %v3964_v48, 16 }
 0x1cf   : > { %5913 = vmatprep.subr.bf16.mxu1 %v6222_v42  ;;  %v3366_v53 = vor.u32 %v3365_v24, %v3362_v26  ;;  %v4023_v26 = vshrl.u32 %v3958_v7, 16  ;;  %v4026_v24 = vshll.u32 %v3958_v7, 16  ;;  %v3414_v36 = vsel %vm6441_vm2, %v3409_v22, %v3413_v14  ;;  %v6239_v22 = vld [vmem:[%s7572_s4 + $0x190] sm:$0xff]  }
 0x1d0   : > { %5944 = vmatmul.mubr.bf16.vlgmr.msra.gmra.mxu0 %v5225_v5  ;;  %v3344_v19 = vsel %vm6441_vm2, %v3339_v25, %v3343_v59  ;;  %v3371_v5 = vrot.slane %v3369_v61, 5  ;;  %v4014_v13 = vrot.slane %v4012_v10, 5  ;;  %v4068_v35 = vshll.u32 %v3964_v48, 16  ;;  %v6235_v25 = vld [vmem:[%s7572_s4 + $0x1a0] sm:$0xff]  }
 0x1d1   : > { %5947 = vmatprep.mubr.bf16.mxu0 %v5226_v51  ;;  %5976 = vmatpush3.bf16.msra.mxu0 %v6223_v30  ;;  %v3390_v30 = vrot.slane %v3388_v16, 4  ;;  %v3367_v1 = vrot.slane %v3366_v53, 4  ;;  %v5189_v33 = vcombine.low %v3344_v19, %v3358_v37  ;;  %v4028_v16 = vrot.slane %v4026_v24, 5  ;;  %v7260_v10 = vld [vmem:[#allocation2 + $0x44] sm:$0x1] }
 0x1d2   : > { %5914 = vmatpush3.bf16.msra.mxu1 %v6222_v42  ;;  %5977 = vmatprep.subr.bf16.mxu0 %v6225_v8  ;;  %v3993_v42 = vsel %vm6441_vm2, %v3988_v45, %v3992_v34  ;;  %v4025_v45 = vrot.slane %v4023_v26, 4  ;;  %v4015_v61 = vor.u32 %v4014_v13, %v4011_v29  ;;  %v4051_v59 = vshrl.u32 %v3962_v31, 16  ;;  %v6240_v29 = vld [vmem:[%s7572_s4 + $0x188] sm:$0xff]  }
 0x1d3   : > { %5915 = vmatprep.subr.bf16.mxu1 %v6224_v63  ;;  %v5280_v39 = vcombine.low %v3979_v23, %v3993_v42  ;;  %v3394_v9 = vor.u32 %v3393_v50, %v3390_v30  ;;  %v3372_v51 = vsel %vm6441_vm2, %v3367_v1, %v3371_v5  ;;  %v4054_v42 = vshll.u32 %v3962_v31, 16  ;;  %v7244_v30 = vld [vmem:[#allocation2 + $0x24] sm:$0x1]  ;;  %v6237_v5 = vld [vmem:[%s7572_s4 + $0x198] sm:$0xff]   ;;  %v7294_v31 = vld [vmem:[%s7575_s7 + $0x28] sm:$0xff]  }
 0x1d4   : > { %v5190_v12 = vcombine.low %v3372_v51, %v3386_v58  ;;  %v4029_v50 = vor.u32 %v4028_v16, %v4025_v45  ;;  %v6238_v1 = vld [vmem:[%s7572_s4 + $0x1c0] sm:$0xff]   ;;  %v4067_v52 = vrot.slane %v4065_v4, 4  ;;  %v4070_v19 = vrot.slane %v4068_v35, 5  ;;  %v6243_v35 = vld [vmem:[%s7572_s4 + $0x238] sm:$0xff]  }
 0x1d5   : > { %5978 = vmatpush3.bf16.msra.mxu0 %v6225_v8  ;;  %v6231_v8 = vld [vmem:[%s7572_s4 + $0x1d8] sm:$0xff]   ;;  %v3395_v28 = vrot.slane %v3394_v9, 4  ;;  %v4004_v58 = vshll.u32 %v7244_v30, 16  ;;  %v4016_v7 = vrot.slane %v4015_v61, 4 }
 0x1d6   : > { %5916 = vmatpush3.bf16.msra.mxu1 %v6224_v63  ;;  %5979 = vmatprep.subr.bf16.mxu0 %v6227_v32  ;;  %v3960_v63 = vld [vmem:[#allocation2 + $0x38] sm:$0xf]  ;;  %v4030_v9 = vrot.slane %v4029_v50, 4  ;;  %v7329_v50 = vld [vmem:[%s7575_s7 + $0x10] sm:$0xff]  }
 0x1d7   : > { %5917 = vmatprep.subr.bf16.mxu1 %v6226_v49  ;;  %v4037_v18 = vshrl.u32 %v3960_v63, 16  ;;  %v4040_v20 = vshll.u32 %v3960_v63, 16  ;;  %v4071_v63 = vor.u32 %v4070_v19, %v4067_v52  ;;  %v4006_v26 = vrot.slane %v4004_v58, 5  ;;  %v6244_v61 = vld [vmem:[#allocation2 + $0x30] ss:$8 sps:$4 sm:$0xff]   ;;  %v6251_v52 = vld [vmem:[%s7572_s4 + $0x220] sm:$0xff]  }
 0x1d8   : > { %5948 = vmatmul.mubr.bf16.gmra.mxu0 %v5227_v54  ;;  %v4000_v54 = vrot.slane %v3998_v41, 5  ;;  %v6253_v58 = vld [vmem:[%s7572_s4 + $0x218] sm:$0xff]  }
 0x1d9   : > { %5980 = vmatpush3.bf16.msra.mxu0 %v6227_v32  ;;  %5991 = vmatprep.mubr.bf16.mxu0 %v5280_v39  ;;  %v3399_v32 = vrot.slane %v3397_v11, 5  ;;  %v4039_v23 = vrot.slane %v4037_v18, 4  ;;  %v4042_v34 = vrot.slane %v4040_v20, 5  ;;  %v7247_v39 = vld [vmem:[#allocation2 + $0x3c] sm:$0x1]  ;;  %v4034_v11 = vrot.slane %v4032_v62, 5 }
 0x1da   : > { %5918 = vmatpush3.bf16.msra.mxu1 %v6226_v49  ;;  %5981 = vmatprep.subr.bf16.mxu0 %v6229_v0  ;;  %v3997_v49 = vrot.slane %v3995_v40, 4  ;;  %v4046_v43 = vshll.u32 %v7247_v39, 16  ;;  %v6248_v62 = vld [vmem:[#allocation2 + $0x40] ss:$8 sps:$4 sm:$0xff]  }
 0x1db   : > { %5951 = vmatprep.subr.bf16.mxu1 %v6228_v44  ;;  %v3400_v53 = vsel %vm6441_vm2, %v3395_v28, %v3399_v32  ;;  %v4043_v60 = vor.u32 %v4042_v34, %v4039_v23  ;;  %v4035_v48 = vsel %vm6441_vm2, %v4030_v9, %v4034_v11  ;;  %v7309_v34 = vld [vmem:[%s7575_s7 + $0x20] sm:$0xff]   ;;  %v4235_v9 = vld [vmem:[#allocation2 + $0x28] sm:$0xe] }
 0x1dc   : > { %v5191_v2 = vcombine.low %v3400_v53, %v3414_v36  ;;  %v4001_v37 = vor.u32 %v4000_v54, %v3997_v49  ;;  %v4048_v28 = vrot.slane %v4046_v43, 5  ;;  %v4072_v36 = vrot.slane %v4071_v63, 4  ;;  %v6241_v49 = vld [vmem:[%s7572_s4 + $0x180] sm:$0xff]   ;;  %v4236_v43 = vld [vmem:[#allocation2 + $0x30] sm:$0xe] }
 0x1dd   : > { %5920 = vmatmul.mubr.bf16.vlgmr.msra.gmra.mxu1 %v5189_v33  ;;  %5982 = vmatpush3.bf16.msra.mxu0 %v6229_v0  ;;  %v6233_v0 = vld [vmem:[#allocation2 + $0x10] ss:$8 sps:$4 sm:$0xff]   ;;  %v4053_v33 = vrot.slane %v4051_v59, 4  ;;  %v4044_v21 = vrot.slane %v4043_v60, 4  ;;  %v5295_v11 = vrot.slane %v4235_v9, 9 }
 0x1de   : > { %5923 = vmatprep.mubr.bf16.mxu1 %v5190_v12  ;;  %5952 = vmatpush3.bf16.msra.mxu1 %v6228_v44  ;;  %v4018_v44 = vshll.u32 %v7234_v56, 16  ;;  %v4002_v55 = vrot.slane %v4001_v37, 4  ;;  %v7265_v12 = vld [vmem:[%s7575_s7 + $0x38] sm:$0xff]   ;;  %v6249_v37 = vld [vmem:[%s7572_s4 + $0x228] sm:$0xff]  }
 0x1df   : > { %5953 = vmatprep.subr.bf16.mxu1 %v6230_v57  ;;  %5983 = vmatprep.subr.bf16.mxu0 %v6231_v8  ;;  %v4049_v20 = vsel %vm6441_vm2, %v4044_v21, %v4048_v28  ;;  %v6261_v53 = vld [vmem:[%s6373_s20 + $0xd8] ss:$8 sps:$4 sm:$0xff]   ;;  %v4270_v21 = vrot.slane %v7234_v56, 5 }
 0x1e0   : > { %v4020_v51 = vrot.slane %v4018_v44, 5  ;;  %v4007_v14 = vsel %vm6441_vm2, %v4002_v55, %v4006_v26  ;;  %v5282_v13 = vcombine.low %v4035_v48, %v4049_v20  ;;  %v4233_v59 = vld [vmem:[#allocation2 + $0x18] sm:$0xe]  ;;  %v6259_v55 = vld [vmem:[%s7572_s4 + $0x200] sm:$0xff]   ;;  %v4274_v26 = vrot.slane %v7242_v38, 5 }
 0x1e1   : > { %5984 = vmatpush3.bf16.msra.mxu0 %v6231_v8  ;;  %v7258_v8 = vld [vmem:[#allocation2 + $0x4c] sm:$0x1]  ;;  %v5293_v44 = vrot.slane %v4233_v59, 9  ;;  %v4237_v63 = vld [vmem:[#allocation2 + $0x38] sm:$0xe]  ;;  %v4278_v48 = vrot.slane %v7247_v39, 5  ;;  %v4271_v28 = vsel %vm7025_vm12, %v5295_v11, %v4270_v21 }
 0x1e2   : > { %5954 = vmatpush3.bf16.msra.mxu1 %v6230_v57  ;;  %5985 = vmatprep.subr.bf16.mxu0 %v6234_v15  ;;  %v4056_v57 = vrot.slane %v4054_v42, 5  ;;  %v4021_v24 = vsel %vm6441_vm2, %v4016_v7, %v4020_v51  ;;  %v4074_v41 = vshll.u32 %v7258_v8, 16  ;;  %v5292_v42 = vrot.slane %v4232_v17, 9  ;;  %v6255_v7 = vld [vmem:[%s7572_s4 + $0x210] sm:$0xff]   ;;  %v4234_v51 = vld [vmem:[#allocation2 + $0x20] sm:$0xe] }
 0x1e3   : > { %5955 = vmatprep.subr.bf16.mxu1 %v6232_v27  ;;  %v5281_v18 = vcombine.low %v4007_v14, %v4021_v24  ;;  %v5294_v24 = vrot.slane %v4234_v51, 9  ;;  %v4239_v14 = vld [vmem:[#allocation2 + $0x48] sm:$0xe]  ;;  %v4238_v56 = vld [vmem:[#allocation2 + $0x40] sm:$0xe] }
 0x1e4   : > { %v4057_v40 = vor.u32 %v4056_v57, %v4053_v33  ;;  %v4076_v45 = vrot.slane %v4074_v41, 5  ;;  %v6262_v33 = vld [vmem:[%s6373_s20 + $0xe8] ss:$8 sps:$4 sm:$0xff]   ;;  %v5297_v41 = vrot.slane %v4237_v63, 9  ;;  %v5299_v39 = vrot.slane %v4239_v14, 9 }
 0x1e5   : > { %5924 = vmatmul.mubr.bf16.gmra.mxu1 %v5191_v2  ;;  %5986 = vmatpush3.bf16.msra.mxu0 %v6234_v15  ;;  %v4060_v15 = vshll.u32 %v7260_v10, 16  ;;  %v6242_v2 = vld [vmem:[#allocation2 + $0x20] ss:$8 sps:$4 sm:$0xff]  }
 0x1e6   : > { %5956 = vmatpush3.bf16.msra.mxu1 %v6232_v27  ;;  %5967 = vmatprep.mubr.bf16.mxu1 %v6233_v0  ;;  %v7284_v27 = vld [vmem:[%s7575_s7 + $0x30] sm:$0xff]   ;;  %v4058_v32 = vrot.slane %v4057_v40, 4  ;;  %v4077_v4 = vsel %vm6441_vm2, %v4072_v36, %v4076_v45  ;;  %v4258_v0 = vrot.slane %v7169_v3, 5  ;;  %v6257_v57 = vld [vmem:[%s7572_s4 + $0x208] sm:$0xff]   ;;  %v4266_v40 = vrot.slane %v7244_v30, 5 }
 0x1e7   : > { %5957 = vmatprep.subr.bf16.mxu1 %v6235_v25  ;;  %5987 = vmatprep.subr.bf16.mxu0 %v6236_v46  ;;  %v4062_v16 = vrot.slane %v4060_v15, 5  ;;  %v4279_v30 = vsel %vm7025_vm12, %v5297_v41, %v4278_v48 }
 0x1e8   : > { %v4259_v3 = vsel %vm7025_vm12, %v5292_v42, %v4258_v0  ;;  %v4267_v38 = vsel %vm7025_vm12, %v5294_v24, %v4266_v40 }
 0x1e9   : > { %5988 = vmatpush3.bf16.msra.mxu0 %v6236_v46  ;;  %v4063_v54 = vsel %vm6441_vm2, %v4058_v32, %v4062_v16  ;;  %v7322_v46 = vld [vmem:[%s7575_s7 + $0x18] sm:$0xff]   ;;  %v4286_v32 = vrot.slane %v7258_v8, 5 }
 0x1ea   : > { %5958 = vmatpush3.bf16.msra.mxu1 %v6235_v25  ;;  %5989 = vmatprep.subr.bf16.mxu0 %v6238_v1  ;;  %v5283_v23 = vcombine.low %v4063_v54, %v4077_v4  ;;  %v6246_v25 = vld [vmem:[%s7572_s4 + $0x230] sm:$0xff]   ;;  %v6263_v16 = vld [vmem:[%s6373_s20 + $0xf8] ss:$8 sps:$4 sm:$0xff]  }
 0x1eb   : > { %5959 = vmatprep.subr.bf16.mxu1 %v6237_v5  ;;  %v4287_v45 = vsel %vm7025_vm12, %v5299_v39, %v4286_v32 }
 0x1ed   : > { %5990 = vmatpush3.bf16.msra.mxu0 %v6238_v1  ;;  %v4262_v1 = vrot.slane %v7174_v6, 5  ;;  %v7348_v6 = vld [vmem:[%s7575_s7 + $0x8] sm:$0xff]  }
 0x1ee   : > { %5960 = vmatpush3.bf16.msra.mxu1 %v6237_v5  ;;  %6023 = vmatprep.subr.bf16.mxu0 %v7265_v12  ;;  %v7354_v5 = vld [vmem:[%s7575_s7] sm:$0xff]  }
 0x1ef   : > { %5961 = vmatprep.subr.bf16.mxu1 %v6239_v22  ;;  %v4263_v60 = vsel %vm7025_vm12, %v5293_v44, %v4262_v1 }
 0x1f0   : > { %5992 = vmatmul.mubr.bf16.vlgmr.msra.gmra.mxu0 %v5281_v18  ;;  %v5316_v19 = vcombine.low %v4259_v3, %v4263_v60  ;;  %v5317_v18 = vcombine.low %v4267_v38, %v4271_v28 }
 0x1f1   : > { %5995 = vmatprep.mubr.bf16.mxu0 %v5282_v13  ;;  %6024 = vmatpush3.bf16.msra.mxu0 %v7265_v12  ;;  %v4282_v13 = vrot.slane %v7260_v10, 5 }
 0x1f2   : > { %5962 = vmatpush3.bf16.msra.mxu1 %v6239_v22  ;;  %6025 = vmatprep.subr.bf16.mxu0 %v7284_v27  ;;  %v5296_v22 = vrot.slane %v4236_v43, 9 }
 0x1f3   : > { %5963 = vmatprep.subr.bf16.mxu1 %v6240_v29 }
 0x1f4   : > { %v4275_v15 = vsel %vm7025_vm12, %v5296_v22, %v4274_v26 }
 0x1f5   : > { %6026 = vmatpush3.bf16.msra.mxu0 %v7284_v27  ;;  %v5318_v20 = vcombine.low %v4275_v15, %v4279_v30 }
 0x1f6   : > { %5964 = vmatpush3.bf16.msra.mxu1 %v6240_v29  ;;  %6027 = vmatprep.subr.bf16.mxu0 %v7294_v31  ;;  %v5298_v29 = vrot.slane %v4238_v56, 9 }
 0x1f7   : > { %5965 = vmatprep.subr.bf16.mxu1 %v6241_v49 }
 0x1f8   : > { %5996 = vmatmul.mubr.bf16.gmra.mxu0 %v5283_v23  ;;  %v4283_v36 = vsel %vm7025_vm12, %v5298_v29, %v4282_v13 }
 0x1f9   : > { %6028 = vmatpush3.bf16.msra.mxu0 %v7294_v31  ;;  %6039 = vmatprep.mubr.bf16.mxu0 %v6261_v53 }
 0x1fa   : > { %5966 = vmatpush3.bf16.msra.mxu1 %v6241_v49  ;;  %6029 = vmatprep.subr.bf16.mxu0 %v7309_v34  ;;  %v5319_v49 = vcombine.low %v4283_v36, %v4287_v45 }
 0x1fb   : > { %5999 = vmatprep.subr.bf16.mxu1 %v6243_v35 }
 0x1fd   : > { %5968 = vmatmul.mubr.bf16.vlgmr.msra.gmra.mxu1 %v6242_v2  ;;  %6030 = vmatpush3.bf16.msra.mxu0 %v7309_v34 }
 0x1fe   : > { %5971 = vmatprep.mubr.bf16.mxu1 %v6244_v61  ;;  %6000 = vmatpush3.bf16.msra.mxu1 %v6243_v35 }
 0x1ff   : > { %6001 = vmatprep.subr.bf16.mxu1 %v6246_v25  ;;  %6031 = vmatprep.subr.bf16.mxu0 %v7322_v46 }
 0x201   : > { %6032 = vmatpush3.bf16.msra.mxu0 %v7322_v46 }
 0x202   : > { %6002 = vmatpush3.bf16.msra.mxu1 %v6246_v25  ;;  %6033 = vmatprep.subr.bf16.mxu0 %v7329_v50 }
 0x203   : > { %6003 = vmatprep.subr.bf16.mxu1 %v6249_v37 }
 0x205   : > { %5972 = vmatmul.mubr.bf16.gmra.mxu1 %v6248_v62  ;;  %6034 = vmatpush3.bf16.msra.mxu0 %v7329_v50 }
 0x206   : > { %6004 = vmatpush3.bf16.msra.mxu1 %v6249_v37  ;;  %6015 = vmatprep.mubr.bf16.mxu1 %v5316_v19 }
 0x207   : > { %6005 = vmatprep.subr.bf16.mxu1 %v6251_v52  ;;  %6035 = vmatprep.subr.bf16.mxu0 %v7348_v6 }
 0x209   : > { %6036 = vmatpush3.bf16.msra.mxu0 %v7348_v6 }
 0x20a   : > { %6006 = vmatpush3.bf16.msra.mxu1 %v6251_v52  ;;  %6037 = vmatprep.subr.bf16.mxu0 %v7354_v5 }
 0x20b   : > { %6007 = vmatprep.subr.bf16.mxu1 %v6253_v58 }
 0x20d   : > { %6038 = vmatpush3.bf16.msra.mxu0 %v7354_v5 }
 0x20e   : > { %6008 = vmatpush3.bf16.msra.mxu1 %v6253_v58 }
 0x20f   : > { %6009 = vmatprep.subr.bf16.mxu1 %v6255_v7 }
 0x210   : > { %6040 = vmatmul.mubr.bf16.vlgmr.msra.gmra.mxu0 %v6262_v33 }
 0x212   : > { %6010 = vmatpush3.bf16.msra.mxu1 %v6255_v7 }
 0x213   : > { %6011 = vmatprep.subr.bf16.mxu1 %v6257_v57 }
 0x216   : > { %6012 = vmatpush3.bf16.msra.mxu1 %v6257_v57 }
 0x217   : > { %6013 = vmatprep.subr.bf16.mxu1 %v6259_v55 }
 0x21a   : > { %6014 = vmatpush3.bf16.msra.mxu1 %v6259_v55 }
 0x21b   : > { %6047 = vmatprep.subr.bf16.mxu1 %v7265_v12 }
 0x21d   : > { %6016 = vmatmul.mubr.bf16.vlgmr.msra.gmra.mxu1 %v5317_v18 }
 0x21e   : > { %6019 = vmatprep.mubr.bf16.mxu1 %v5318_v20  ;;  %6055 = vmatpush3.bf16.msra.mxu1 %v7265_v12 }
 0x21f   : > { %6048 = vmatprep.subr.bf16.mxu1 %v7284_v27 }
 0x222   : > { %6056 = vmatpush3.bf16.msra.mxu1 %v7284_v27 }
 0x223   : > { %6049 = vmatprep.subr.bf16.mxu1 %v7294_v31 }
 0x225   : > { %6020 = vmatmul.mubr.bf16.gmra.mxu1 %v5319_v49 }
 0x226   : > { %6057 = vmatpush3.bf16.msra.mxu1 %v7294_v31  ;;  %6043 = vmatprep.mubr.bf16.mxu1 %v6263_v16 }
 0x227   : > { %6050 = vmatprep.subr.bf16.mxu1 %v7309_v34 }
 0x22a   : > { %6058 = vmatpush3.bf16.msra.mxu1 %v7309_v34 }
 0x22b   : > { %6051 = vmatprep.subr.bf16.mxu1 %v7322_v46 }
 0x22e   : > { %6059 = vmatpush3.bf16.msra.mxu1 %v7322_v46 }
 0x22f   : > { %6052 = vmatprep.subr.bf16.mxu1 %v7329_v50 }
 0x232   : > { %6060 = vmatpush3.bf16.msra.mxu1 %v7329_v50 }
 0x233   : > { %6053 = vmatprep.subr.bf16.mxu1 %v7348_v6 }
 0x236   : > { %6061 = vmatpush3.bf16.msra.mxu1 %v7348_v6 }
 0x237   : > { %6054 = vmatprep.subr.bf16.mxu1 %v7354_v5 }
 0x23a   : > { %6062 = vmatpush3.bf16.msra.mxu1 %v7354_v5 }
 0x23d   : > { %6044 = vmatmul.mubr.bf16.vlgmr.msra.gmra.mxu1 %v6264_v47 }
 0x250   : > { %v5849_v8 = vpop.f32.mrf.mxu0 }
 0x252   : > { %v2873_v10 = vpop.f32.mrf.mxu0 }
 0x254   : > { %v7409_v12 = vpop.f32.mrf.mxu0 }
 0x256   : > { %v7411_v27 = vpop.f32.mrf.mxu0 }
 0x25c   : > { %v5825_v31 = vpop.f32.mrf.mxu1 }
 0x25d   : > { %v2882_v16 = vadd.f32 %v5849_v8, %v5825_v31 }
 0x25e   : > { %v2736_v54 = vpop.f32.mrf.mxu1  ;;  %v5853_v4 = vpop.f32.mrf.mxu0 }
 0x25f   : > { %v2874_v47 = vadd.f32 %v2873_v10, %v2736_v54 }
 0x260   : > { %v5826_v53 = vpop.f32.mrf.mxu1  ;;  %v2889_v34 = vpop.f32.mrf.mxu0 }
 0x262   : > { %v2739_v23 = vpop.f32.mrf.mxu1  ;;  %v5854_v2 = vpop.f32.mrf.mxu0 }
 0x264   : > { %v2892_v42 = vpop.f32.mrf.mxu0 }
 0x267   : > { %v5829_v35 = vpop.f32.mrf.mxu1 }
 0x268   : > { %v7413_v17 = vadd.f32 %v5853_v4, %v5829_v35  ;;  %v2885_v35 = vadd.f32 %v7409_v12, %v5826_v53 }
 0x269   : > { %v2752_v25 = vpop.f32.mrf.mxu1 }
 0x26a   : > { %v7415_v46 = vadd.f32 %v2889_v34, %v2752_v25  ;;  %v2877_v25 = vadd.f32 %v7411_v27, %v2739_v23 }
 0x26b   : > { %v5830_v61 = vpop.f32.mrf.mxu1 }
 0x26c   : > { %v7417_v59 = vadd.f32 %v5854_v2, %v5830_v61 }
 0x26d   : > { %v2755_v0 = vpop.f32.mrf.mxu1 }
 0x26e   : > { %v7419_v50 = vadd.f32 %v2892_v42, %v2755_v0 }
 0x270   : > { %v5897_v37 = vpop.f32.mrf.mxu0 }
 0x272   : > { %v3248_v44 = vpop.f32.mrf.mxu0 }
 0x274   : > { %v5898_v1 = vpop.f32.mrf.mxu0 }
 0x276   : > { %v3251_v62 = vpop.f32.mrf.mxu0 }
 0x278   : > { %v7421_v52 = vpop.f32.mrf.mxu0 }
 0x27a   : > { %v7423_v19 = vpop.f32.mrf.mxu0 }
 0x27c   : > { %v7425_v58 = vpop.f32.mrf.mxu0 }
 0x27d   : > { %v5873_v3 = vpop.f32.mrf.mxu1 }
 0x27e   : > { %v7429_v33 = vpop.f32.mrf.mxu0  ;;  %v3111_v4 = vadd.f32 %v5873_v3, %v2882_v16 }
 0x27f   : > { %v3078_v60 = vpop.f32.mrf.mxu1 }
 0x280   : > { %v3109_v2 = vadd.f32 %v3078_v60, %v2874_v47  ;;  %v3281_v0 = vadd.f32 %v5897_v37, %v3111_v4  ;;  %v7472_v37 = vld [vmem:[%s7576_s8] ss:$0 sm:$0xff] }
 0x281   : > { %v5874_v6 = vpop.f32.mrf.mxu1 }
 0x282   : > { %v3112_v42 = vadd.f32 %v5874_v6, %v2885_v35 }
 0x283   : > { %v3081_v5 = vpop.f32.mrf.mxu1 }
 0x284   : > { %v3282_v54 = vadd.f32 %v5898_v1, %v3112_v42 }
 0x285   : > { %v7427_v7 = vpop.f32.mrf.mxu1 }
 0x287   : > { %v7431_v9 = vpop.f32.mrf.mxu1 }
 0x289   : > { %v7433_v55 = vpop.f32.mrf.mxu1 }
 0x28b   : > { %v7435_v11 = vpop.f32.mrf.mxu1 }
 0x290   : > { %v5945_v57 = vpop.f32.mrf.mxu0 }
 0x292   : > { %v3740_v43 = vpop.f32.mrf.mxu0 }
 0x294   : > { %v5946_v51 = vpop.f32.mrf.mxu0 }
 0x296   : > { %v3743_v63 = vpop.f32.mrf.mxu0 }
 0x298   : > { %v7437_v26 = vpop.f32.mrf.mxu0 }
 0x29a   : > { %v7439_v40 = vpop.f32.mrf.mxu0 }
 0x29c   : > { %v7441_v48 = vpop.f32.mrf.mxu0 }
 0x29d   : > { %v5921_v21 = vpop.f32.mrf.mxu1  ;;  %7605 = vst [vmem:[#allocation7_spill] sm:$0xff] %v7441_v48 }
 0x29e   : > { %v7445_v14 = vpop.f32.mrf.mxu0  ;;  %v3563_v48 = vadd.f32 %v5921_v21, %v3281_v0 }
 0x29f   : > { %v3530_v22 = vpop.f32.mrf.mxu1  ;;  %7606 = vst [vmem:[#allocation4_spill] sm:$0xff] %v7445_v14 }
 0x2a0   : > { %v3773_v12 = vadd.f32 %v5945_v57, %v3563_v48  ;;  %v7485_v48 = vld [vmem:[%s7577_s9] ss:$0 sm:$0xff] }
 0x2a1   : > { %v5922_v24 = vpop.f32.mrf.mxu1 }
 0x2a2   : > { %v3564_v16 = vadd.f32 %v5922_v24, %v3282_v54 }
 0x2a3   : > { %v3533_v41 = vpop.f32.mrf.mxu1 }
 0x2a5   : > { %v7443_v28 = vpop.f32.mrf.mxu1 }
 0x2a7   : > { %v7447_v56 = vpop.f32.mrf.mxu1 }
 0x2a9   : > { %v7449_v18 = vpop.f32.mrf.mxu1 }
 0x2ab   : > { %v7451_v39 = vpop.f32.mrf.mxu1 }
 0x2b0   : > { %v5993_v15 = vpop.f32.mrf.mxu0 }
 0x2b2   : > { %v4193_v38 = vpop.f32.mrf.mxu0 }
 0x2b4   : > { %v5994_v30 = vpop.f32.mrf.mxu0 }
 0x2b6   : > { %v4196_v29 = vpop.f32.mrf.mxu0 }
 0x2b8   : > { %v7453_v32 = vpop.f32.mrf.mxu0 }
 0x2b9   : > { %7607 = vst [vmem:[#allocation3_spill] sm:$0xff] %v7453_v32  ;;  %v3110_v32 = vadd.f32 %v3081_v5, %v2877_v25  ;;  %v3774_v5 = vadd.f32 %v5946_v51, %v3564_v16 }
 0x2ba   : > { %v7455_v45 = vpop.f32.mrf.mxu0 }
 0x2bb   : > { %7608 = vst [vmem:[#allocation5_spill] sm:$0xff] %v7455_v45  ;;  %v3279_v45 = vadd.f32 %v3248_v44, %v3109_v2  ;;  %v3280_v3 = vadd.f32 %v3251_v62, %v3110_v32 }
 0x2bc   : > { %v7457_v34 = vpop.f32.mrf.mxu0 }
 0x2bd   : > { %v5969_v20 = vpop.f32.mrf.mxu1  ;;  %v3561_v10 = vadd.f32 %v3530_v22, %v3279_v45  ;;  %v3562_v60 = vadd.f32 %v3533_v41, %v3280_v3 }
 0x2be   : > { %v7463_v14 = vpop.f32.mrf.mxu0  ;;  %v3944_v23 = vadd.f32 %v5969_v20, %v3773_v12 }
 0x2bf   : > { %v3911_v13 = vpop.f32.mrf.mxu1  ;;  %v3771_v6 = vadd.f32 %v3740_v43, %v3561_v10  ;;  %v3772_v47 = vadd.f32 %v3743_v63, %v3562_v60  ;;  %v7480_v43 = vld [vmem:[%s7573_s5] ss:$0 sm:$0xff] }
 0x2c0   : > { %v4226_v62 = vadd.f32 %v5993_v15, %v3944_v23 }
 0x2c1   : > { %v5970_v36 = vpop.f32.mrf.mxu1  ;;  %v3942_v44 = vadd.f32 %v3911_v13, %v3771_v6  ;;  %v7491_v13 = vld [vmem:[%s7574_s6] ss:$0 sm:$0xff] }
 0x2c2   : > { %v3945_v1 = vadd.f32 %v5970_v36, %v3774_v5 }
 0x2c3   : > { %v3914_v49 = vpop.f32.mrf.mxu1  ;;  %v4224_v63 = vadd.f32 %v4193_v38, %v3942_v44 }
 0x2c4   : > { %v3943_v24 = vadd.f32 %v3914_v49, %v3772_v47  ;;  %v4227_v35 = vadd.f32 %v5994_v30, %v3945_v1  ;;  %v3116_v1 = vadd.f32 %v7433_v55, %v7417_v59 }
 0x2c5   : > { %v7461_v61 = vpop.f32.mrf.mxu1 }
 0x2c6   : > { %v4225_v25 = vadd.f32 %v4196_v29, %v3943_v24  ;;  %v3115_v29 = vadd.f32 %v7427_v7, %v7413_v17 }
 0x2c7   : > { %v7465_v31 = vpop.f32.mrf.mxu1 }
 0x2c9   : > { %v7467_v27 = vpop.f32.mrf.mxu1 }
 0x2cb   : > { %v7474_v22 = vpop.f32.mrf.mxu1 }
 0x2d0   : > { %v6041_v8 = vpop.f32.mrf.mxu0 }
 0x2d1   : > { %v4642_v57 = vmul.f32 %v6041_v8, %v7472_v37 }
 0x2d2   : > { %v4602_v53 = vpop.f32.mrf.mxu0 }
 0x2d3   : > { %v4640_v20 = vmul.f32 %v7472_v37, %v4602_v53  ;;  %v4657_v4 = vadd.f32 %v7485_v48, %v4642_v57 }
 0x2d4   : > { %v6042_v21 = vpop.f32.mrf.mxu0 }
 0x2d5   : > { %v4643_v36 = vmul.f32 %v6042_v21, %v7472_v37  ;;  %v4655_v10 = vadd.f32 %v7485_v48, %v4640_v20  ;;  %v3113_v21 = vadd.f32 %v7431_v9, %v7415_v46  ;;  %v3286_v20 = vadd.f32 %v7425_v58, %v3116_v1 }
 0x2d6   : > { %v4605_v15 = vpop.f32.mrf.mxu0 }
 0x2d7   : > { %v4641_v38 = vmul.f32 %v7472_v37, %v4605_v15  ;;  %v4658_v3 = vadd.f32 %v7485_v48, %v4643_v36  ;;  %v3568_v59 = vadd.f32 %v7449_v18, %v3286_v20 }
 0x2d9   : > { %v4656_v60 = vadd.f32 %v7485_v48, %v4641_v38 }
 0x2dd   : > { %v6017_v41 = vpop.f32.mrf.mxu1 }
 0x2de   : > { %v4436_v51 = vadd.f32 %v6017_v41, %v4226_v62  ;;  %v3285_v62 = vadd.f32 %v7421_v52, %v3115_v29  ;;  %v3283_v41 = vadd.f32 %v7423_v19, %v3113_v21 }
 0x2df   : > { %v4403_v32 = vpop.f32.mrf.mxu1 }
 0x2e0   : > { %v4451_v45 = vmul.f32 %v7480_v43, %v4436_v51  ;;  %v4434_v49 = vadd.f32 %v4403_v32, %v4224_v63  ;;  %v3114_v51 = vadd.f32 %v7435_v11, %v7419_v50  ;;  %v3567_v46 = vadd.f32 %v7443_v28, %v3285_v62  ;;  %v7609_v32 = vld [vmem:[#allocation7_spill] sm:$0xff] }
 0x2e1   : > { %v6018_v2 = vpop.f32.mrf.mxu1  ;;  %v3565_v63 = vadd.f32 %v7447_v56, %v3283_v41  ;;  %v3778_v56 = vadd.f32 %v7609_v32, %v3568_v59 }
 0x2e2   : > { %v4466_v42 = vadd.f32 %v7491_v13, %v4451_v45  ;;  %v4449_v0 = vmul.f32 %v7480_v43, %v4434_v49  ;;  %v4437_v8 = vadd.f32 %v6018_v2, %v4227_v35  ;;  %v3284_v55 = vadd.f32 %v7429_v33, %v3114_v51  ;;  %v7610_v45 = vld [vmem:[#allocation4_spill] sm:$0xff]  ;;  %v7611_v49 = vld [vmem:[#allocation3_spill] sm:$0xff]  ;;  %v7612_v33 = vld [vmem:[#allocation5_spill] sm:$0xff] }
 0x2e3   : > { %v4406_v54 = vpop.f32.mrf.mxu1  ;;  %v3777_v15 = vadd.f32 %v7437_v26, %v3567_v46  ;;  %v3775_v19 = vadd.f32 %v7439_v40, %v3565_v63  ;;  %v3949_v58 = vadd.f32 %v7467_v27, %v3778_v56 }
 0x2e4   : > { %v4464_v16 = vadd.f32 %v7491_v13, %v4449_v0  ;;  %v4665_v12 = vadd.f32 %v4657_v4, %v4466_v42  ;;  %v4452_v30 = vmul.f32 %v7480_v43, %v4437_v8  ;;  %v4435_v53 = vadd.f32 %v4406_v54, %v4225_v25 }
 0x2e5   : > { %v6021_v52 = vpop.f32.mrf.mxu1  ;;  %v3566_v50 = vadd.f32 %v7451_v39, %v3284_v55  ;;  %v3948_v11 = vadd.f32 %v7461_v61, %v3777_v15  ;;  %v3946_v28 = vadd.f32 %v7465_v31, %v3775_v19  ;;  %v4231_v61 = vadd.f32 %v7457_v34, %v3949_v58 }
 0x2e6   : > { %v4673_v23 = vmax.f32 %v4665_v12, 0.0  ;;  %v4467_v6 = vadd.f32 %v7491_v13, %v4452_v30  ;;  %v4663_v44 = vadd.f32 %v4655_v10, %v4464_v16  ;;  %v4450_v5 = vmul.f32 %v7480_v43, %v4435_v53 }
 0x2e7   : > { %v4419_v36 = vpop.f32.mrf.mxu1  ;;  %v3776_v18 = vadd.f32 %v7610_v45, %v3566_v50  ;;  %v4230_v4 = vadd.f32 %v7611_v49, %v3948_v11  ;;  %v4228_v35 = vadd.f32 %v7612_v33, %v3946_v28 }
 0x2e8   : > { %4681 = vst [vmem:[%s7509_s30 + $0x10] sm:$0xff] %v4673_v23  ;;  %v4671_v17 = vmax.f32 %v4663_v44, 0.0  ;;  %v4465_v7 = vadd.f32 %v7491_v13, %v4450_v5  ;;  %v4666_v47 = vadd.f32 %v4658_v3, %v4467_v6 }
 0x2e9   : > { %v6022_v26 = vpop.f32.mrf.mxu1  ;;  %v3947_v40 = vadd.f32 %v7474_v22, %v3776_v18  ;;  %v4440_v2 = vadd.f32 %v6021_v52, %v4230_v4  ;;  %v4438_v39 = vadd.f32 %v4419_v36, %v4228_v35 }
 0x2ea   : > { %4679 = vst [vmem:[%s7509_s30] sm:$0xff] %v4671_v17  ;;  %v4674_v57 = vmax.f32 %v4666_v47, 0.0  ;;  %v4664_v24 = vadd.f32 %v4656_v60, %v4465_v7  ;;  %v4441_v25 = vadd.f32 %v6022_v26, %v4231_v61 }
 0x2eb   : > { %v4422_v31 = vpop.f32.mrf.mxu1  ;;  %v4455_v38 = vmul.f32 %v7480_v43, %v4440_v2  ;;  %v4229_v42 = vadd.f32 %v7463_v14, %v3947_v40  ;;  %v4453_v27 = vmul.f32 %v7480_v43, %v4438_v39 }
 0x2ec   : > { %4682 = vst [vmem:[%s7509_s30 + $0x18] sm:$0xff] %v4674_v57  ;;  %v4672_v9 = vmax.f32 %v4664_v24, 0.0  ;;  %v4456_v54 = vmul.f32 %v7480_v43, %v4441_v25 }
 0x2ed   : > { %v4439_v8 = vadd.f32 %v4422_v31, %v4229_v42  ;;  %v4470_v22 = vadd.f32 %v7491_v13, %v4455_v38  ;;  %v4468_v12 = vadd.f32 %v7491_v13, %v4453_v27 }
 0x2ee   : > { %4680 = vst [vmem:[%s7509_s30 + $0x8] sm:$0xff] %v4672_v9  ;;  %v4471_v23 = vadd.f32 %v7491_v13, %v4456_v54 }
 0x2ef   : > { %v4454_v14 = vmul.f32 %v7480_v43, %v4439_v8 }
 0x2f1   : > { %v4469_v7 = vadd.f32 %v7491_v13, %v4454_v14 }
 0x2fd   : > { %v6045_v0 = vpop.f32.mrf.mxu1 }
 0x2fe   : > { %v4646_v10 = vmul.f32 %v6045_v0, %v7472_v37 }
 0x2ff   : > { %v4618_v3 = vpop.f32.mrf.mxu1 }
 0x300   : > { %v4661_v34 = vadd.f32 %v7485_v48, %v4646_v10  ;;  %v4644_v16 = vmul.f32 %v7472_v37, %v4618_v3 }
 0x301   : > { %v6046_v30 = vpop.f32.mrf.mxu1 }
 0x302   : > { %v4669_v53 = vadd.f32 %v4661_v34, %v4470_v22  ;;  %v4659_v29 = vadd.f32 %v7485_v48, %v4644_v16  ;;  %v4647_v60 = vmul.f32 %v6046_v30, %v7472_v37 }
 0x303   : > { %v4621_v6 = vpop.f32.mrf.mxu1 }
 0x304   : > { %v4677_v44 = vmax.f32 %v4669_v53, 0.0  ;;  %v4667_v5 = vadd.f32 %v4659_v29, %v4468_v12  ;;  %v4662_v21 = vadd.f32 %v7485_v48, %v4647_v60  ;;  %v4645_v17 = vmul.f32 %v7472_v37, %v4621_v6 }
 0x306   : > { %4685 = vst [vmem:[%s7509_s30 + $0x30] sm:$0xff] %v4677_v44  ;;  %v4675_v43 = vmax.f32 %v4667_v5, 0.0  ;;  %v4670_v47 = vadd.f32 %v4662_v21, %v4471_v23  ;;  %v4660_v1 = vadd.f32 %v7485_v48, %v4645_v17 }
 0x308   : > { %4683 = vst [vmem:[%s7509_s30 + $0x20] sm:$0xff] %v4675_v43  ;;  %v4678_v62 = vmax.f32 %v4670_v47, 0.0  ;;  %v4668_v57 = vadd.f32 %v4660_v1, %v4469_v7 }
 0x30a   : > { %4686 = vst [vmem:[%s7509_s30 + $0x38] sm:$0xff] %v4678_v62  ;;  %v4676_v24 = vmax.f32 %v4668_v57, 0.0 }
 0x30c   : > { %4684 = vst [vmem:[%s7509_s30 + $0x28] sm:$0xff] %v4676_v24 }
 0x30d PF: > { %s20_s13 = sadd.s32 1, %s6271_s13  }
 0x30e   : > { %p17_p4 = scmp.ge.s32.totalorder %s20_s13, 4  }
 0x310   :  { %19 = sbr.rel (!%p17_p4) target bundleno = 1 (0x1), region = 114 }

</bundles_post_ra>
